<compile_context>
chip_gen: v5e
topology: v5e:2x2
jax: 0.10.0
libtpu: 0.0.40
codegen_flags: <defaults>
</compile_context>

<pallas_src>
import functools

import jax
import jax.numpy as jnp
from jax.experimental import pallas as pl
from jax.experimental.pallas import tpu as pltpu
import numpy as np

jax.config.update("jax_default_matmul_precision", "highest")


# -----------------------------------------------------------------------------
# Kernel helpers
# -----------------------------------------------------------------------------
def _sigmoid(v):
    # logistic via tanh: stays on the EUP, avoids the f32 divide of 1/(1+exp).
    return 0.5 * (jnp.tanh(0.5 * v) + 1.0)


# -----------------------------------------------------------------------------
# Kernel
# -----------------------------------------------------------------------------
def vae_lstm_kernel(x_ref, eps_ref, slab_ref,
                    recon_ref, mu_ref, logvar_ref,
                    hbuf_ref,
                    *, Bp, T, I, H, L, layout):
    def par(name):
        r0, nr, nc = layout[name]           # static offsets, 8-row aligned
        return slab_ref[r0:r0 + nr, 0:nc]

    def lstm_step(gx, h, c, whh):
        # ONE lane-dense MXU matmul per step: (Bp,H)@(H,4H=128); gates are
        # extracted via lane slices AFTER the dot (vld/XLU slots, MXU is bottleneck).
        g = jnp.dot(h, whh, preferred_element_type=jnp.float32) + gx   # (Bp, 4H)
        i = _sigmoid(g[:, 0 * H:1 * H])
        f = _sigmoid(g[:, 1 * H:2 * H])
        gg = jnp.tanh(g[:, 2 * H:3 * H])
        o = _sigmoid(g[:, 3 * H:4 * H])
        c_new = f * c + i * gg
        h_new = o * jnp.tanh(c_new)
        return h_new, c_new

    x2d = x_ref[...]        # (T*Bp, I), rows ordered (t, b), batch padded to 8
    eps = eps_ref[...]      # (Bp, L)

    # ---------------- Encoder LSTM ----------------
    whh_e = par("w_hh_e")                   # (H, 4H) fused, loop-invariant
    # Hoisted input->hidden projection for all T steps at once: (T*Bp, 4H).
    gx_e = (jnp.dot(x2d, par("w_ih_e"), preferred_element_type=jnp.float32)
            + par("b_e"))

    h = jnp.zeros((Bp, H), jnp.float32)
    c = jnp.zeros((Bp, H), jnp.float32)
    for t in range(T):                      # static unroll; T is small
        h, c = lstm_step(gx_e[t * Bp:(t + 1) * Bp, :], h, c, whh_e)

    mu = jnp.dot(h, par("w_mu"), preferred_element_type=jnp.float32) + par("b_mu")
    logvar = jnp.dot(h, par("w_lv"), preferred_element_type=jnp.float32) + par("b_lv")

    # ---------------- Reparameterize ----------------
    z = mu + eps * jnp.exp(0.5 * logvar)    # (Bp, L)

    # ---------------- Decoder ----------------
    h_d = jnp.dot(z, par("w_h0"), preferred_element_type=jnp.float32) + par("b_h0")
    c_d = jnp.dot(z, par("w_c0"), preferred_element_type=jnp.float32) + par("b_c0")
    x_in = jnp.dot(z, par("w_in"), preferred_element_type=jnp.float32) + par("b_in")

    whh_d = par("w_hh_d")                   # (H, 4H) fused, loop-invariant
    # x_in is identical at every decoder step -> input gates are loop-invariant.
    gx_d = (jnp.dot(x_in, par("w_ih_d"), preferred_element_type=jnp.float32)
            + par("b_d"))                   # (Bp, 4H)

    for t in range(T):
        h_d, c_d = lstm_step(gx_d, h_d, c_d, whh_d)
        hbuf_ref[t * Bp:(t + 1) * Bp, :] = h_d   # aligned per-step vst (no concat)

    # Deferred, lane-dense output projection: one (T*Bp,H)@(H,128) matmul and
    # one contiguous full-vst store (w_out/b_out zero-padded to 128 lanes).
    recon_ref[...] = (
        jnp.dot(hbuf_ref[...], par("w_out"), preferred_element_type=jnp.float32)
        + par("b_out"))
    mu_ref[...] = mu
    logvar_ref[...] = logvar


# -----------------------------------------------------------------------------
# Parameter packing (wrapper-side layout plumbing)
# -----------------------------------------------------------------------------
def pack_params(params, I, out_pad):
    """Transpose weights to (in, out), keep gate blocks FUSED (in, 4H), and pack
    everything into one f32 slab. Each entry is padded to a multiple of 8 rows
    and to the slab lane width so every in-kernel slice is (8,128)-tile aligned.
    Returns (slab, layout) with layout[name] = (row_offset, n_rows, n_cols)."""
    entries = [
        ("w_ih_e", params["w_ih_e"].T),     # (I, 4H)   fused gates
        ("w_hh_e", params["w_hh_e"].T),     # (H, 4H)   fused gates
        ("b_e",    params["b_e"]),          # (1, 4H)
        ("w_mu",   params["w_mu"].T),       # (H, L)
        ("b_mu",   params["b_mu"]),
        ("w_lv",   params["w_lv"].T),
        ("b_lv",   params["b_lv"]),
        ("w_h0",   params["w_h0"].T),       # (L, H)
        ("b_h0",   params["b_h0"]),
        ("w_c0",   params["w_c0"].T),
        ("b_c0",   params["b_c0"]),
        ("w_in",   params["w_in"].T),       # (L, I)
        ("b_in",   params["b_in"]),
        ("w_ih_d", params["w_ih_d"].T),     # (I, 4H)
        ("w_hh_d", params["w_hh_d"].T),     # (H, 4H)
        ("b_d",    params["b_d"]),
        # Lane-dense output projection: zero-pad I -> out_pad columns.
        ("w_out",  jnp.pad(jnp.asarray(params["w_out"]).T,
                           ((0, 0), (0, out_pad - I)))),   # (H, out_pad)
        ("b_out",  jnp.pad(jnp.asarray(params["b_out"]),
                           ((0, 0), (0, out_pad - I)))),   # (1, out_pad)
    ]
    max_cols = max(int(jnp.asarray(a).shape[-1]) for _, a in entries)
    slab_cols = ((max_cols + 127) // 128) * 128

    layout = {}
    blocks = []
    off = 0
    for name, arr in entries:
        arr = jnp.asarray(arr, jnp.float32)
        if arr.ndim == 1:
            arr = arr.reshape(1, -1)
        r, cdim = arr.shape
        rpad = (-r) % 8
        blocks.append(jnp.pad(arr, ((0, rpad), (0, slab_cols - cdim))))
        layout[name] = (off, r, cdim)
        off += r + rpad
    slab = jnp.concatenate(blocks, axis=0)
    return slab, layout


# -----------------------------------------------------------------------------
# Wrapper
# -----------------------------------------------------------------------------
def vae_lstm_forward(x, eps, params):
    """x: (B, T, I) f32, eps: (B, L) f32, params: PyTorch-convention arrays."""
    B, T, I = x.shape
    L = eps.shape[1]
    H = params["w_hh_e"].shape[1]
    Bp = max(8, ((B + 7) // 8) * 8)        # sublane-aligned batch
    OUT_PAD = 128                          # lane-dense output width

    slab, layout = pack_params(params, I=I, out_pad=OUT_PAD)

    # Layout plumbing outside the kernel: time-major, batch padded to 8 sublanes
    # so every per-step slice inside the kernel starts at t*8.
    x_t = jnp.transpose(x, (1, 0, 2))                       # (T, B, I)
    x_t = jnp.pad(x_t, ((0, 0), (0, Bp - B), (0, 0)))       # (T, Bp, I)
    x_tb = x_t.reshape(T * Bp, I)
    eps_p = jnp.pad(eps, ((0, Bp - B), (0, 0)))             # (Bp, L)

    vspec = pl.BlockSpec(memory_space=pltpu.MemorySpace.VMEM)
    kern = functools.partial(vae_lstm_kernel, Bp=Bp, T=T, I=I, H=H, L=L,
                             layout=layout)

    recon_p, mu_p, lv_p = pl.pallas_call(
        kern,
        out_shape=(
            jax.ShapeDtypeStruct((T * Bp, OUT_PAD), jnp.float32),
            jax.ShapeDtypeStruct((Bp, L), jnp.float32),
            jax.ShapeDtypeStruct((Bp, L), jnp.float32),
        ),
        in_specs=[vspec, vspec, vspec],
        out_specs=(vspec, vspec, vspec),
        scratch_shapes=[pltpu.VMEM((T * Bp, H), jnp.float32)],
        # NOTE: single invocation, no grid — the recurrence is strictly serial in
        # T and at Bp=8 the whole problem (<1 MiB) fits VMEM on v5e/v6e/v7x. If
        # batch is scaled up, add grid=(pl.cdiv(B, Bt),) with
        # dimension_semantics=("parallel",) over batch only (never over time).
    )(x_tb, eps_p, slab)

    recon = recon_p.reshape(T, Bp, OUT_PAD)[:, :B, :I].transpose(1, 0, 2)
    return recon, mu_p[:B], lv_p[:B]


# -----------------------------------------------------------------------------
# Pure-JAX reference (for correctness check)
# -----------------------------------------------------------------------------
def vae_lstm_reference(x, eps, params):
    B, T, I = x.shape
    H = params["w_hh_e"].shape[1]

    def sigmoid(v):
        return 1.0 / (1.0 + jnp.exp(-v))

    def cell(x_t, h, c, w_ih, w_hh, b):
        g = x_t @ w_ih.T + h @ w_hh.T + b
        i, f, gg, o = (g[:, :H], g[:, H:2 * H], g[:, 2 * H:3 * H], g[:, 3 * H:])
        c_new = sigmoid(f) * c + sigmoid(i) * jnp.tanh(gg)
        return sigmoid(o) * jnp.tanh(c_new), c_new

    h = jnp.zeros((B, H)); c = jnp.zeros((B, H))
    for t in range(T):
        h, c = cell(x[:, t, :], h, c, params["w_ih_e"], params["w_hh_e"], params["b_e"])
    mu = h @ params["w_mu"].T + params["b_mu"]
    logvar = h @ params["w_lv"].T + params["b_lv"]
    z = mu + eps * jnp.exp(0.5 * logvar)

    h_d = z @ params["w_h0"].T + params["b_h0"]
    c_d = z @ params["w_c0"].T + params["b_c0"]
    x_in = z @ params["w_in"].T + params["b_in"]
    outs = []
    for t in range(T):
        h_d, c_d = cell(x_in, h_d, c_d, params["w_ih_d"], params["w_hh_d"], params["b_d"])
        outs.append(h_d @ params["w_out"].T + params["b_out"])
    recon = jnp.stack(outs, axis=1)
    return recon, mu, logvar


# -----------------------------------------------------------------------------
# Main
# -----------------------------------------------------------------------------
if __name__ == "__main__":
    # batch, seq_length, input_size, hidden_size, latent_dim
    B, T, I, H, L = 2, 8, 4, 32, 16

    root = jax.random.PRNGKey(0)
    keys = jax.random.split(root, 24)
    k = iter(keys)

    def init(key, shape, scale=0.1):
        return (scale * jax.random.normal(key, shape)).astype(jnp.float32)

    # Parameters (PyTorch shape conventions; LSTM biases pre-summed b_ih + b_hh).
    params = {
        # Encoder LSTM
        "w_ih_e": init(next(k), (4 * H, I)),
        "w_hh_e": init(next(k), (4 * H, H)),
        "b_e":    init(next(k), (1, 4 * H)),
        # fc_mu / fc_logvar
        "w_mu":   init(next(k), (L, H)),
        "b_mu":   init(next(k), (1, L)),
        "w_lv":   init(next(k), (L, H)),
        "b_lv":   init(next(k), (1, L)),
        # Decoder fc_hidden / fc_cell / fc_input
        "w_h0":   init(next(k), (H, L)),
        "b_h0":   init(next(k), (1, H)),
        "w_c0":   init(next(k), (H, L)),
        "b_c0":   init(next(k), (1, H)),
        "w_in":   init(next(k), (I, L)),
        "b_in":   init(next(k), (1, I)),
        # Decoder LSTM
        "w_ih_d": init(next(k), (4 * H, I)),
        "w_hh_d": init(next(k), (4 * H, H)),
        "b_d":    init(next(k), (1, 4 * H)),
        # fc_output
        "w_out":  init(next(k), (I, H)),
        "b_out":  init(next(k), (1, I)),
    }

    x = jax.random.normal(next(k), (B, T, I), dtype=jnp.float32)
    # reparameterization noise (torch.randn_like equivalent) drawn outside the kernel
    eps = jax.random.normal(next(k), (B, L), dtype=jnp.float32)

    recon, mu, logvar = vae_lstm_forward(x, eps, params)
    jax.block_until_ready((recon, mu, logvar))

    # Verify against the pure-JAX reference.
    r_ref, mu_ref, lv_ref = vae_lstm_reference(x, eps, params)
    np.testing.assert_allclose(np.asarray(recon), np.asarray(r_ref), rtol=1e-4, atol=1e-4)
    np.testing.assert_allclose(np.asarray(mu), np.asarray(mu_ref), rtol=1e-4, atol=1e-4)
    np.testing.assert_allclose(np.asarray(logvar), np.asarray(lv_ref), rtol=1e-4, atol=1e-4)

    print("KERNEL_OK")
</pallas_src>

<mosaic_0001>
module attributes {stable_mosaic.version = 11 : i64} {
  func.func @vae_lstm_kernel(%arg0: memref<64x4xf32, #tpu.memory_space<vmem>>, %arg1: memref<8x16xf32, #tpu.memory_space<vmem>>, %arg2: memref<288x128xf32, #tpu.memory_space<vmem>>, %arg3: memref<64x128xf32, #tpu.memory_space<vmem>>, %arg4: memref<8x16xf32, #tpu.memory_space<vmem>>, %arg5: memref<8x16xf32, #tpu.memory_space<vmem>>, %arg6: memref<64x32xf32, #tpu.memory_space<vmem>>) attributes {dimension_semantics = [], scalar_prefetch = 0 : i64, scratch_operands = 1 : i64, tpu.core_type = #tpu.core_type<tc>} {
    %c0 = arith.constant 0 : index
    %c0_0 = arith.constant 0 : index
    %0 = vector.load %arg0[%c0, %c0_0] : memref<64x4xf32, #tpu.memory_space<vmem>>, vector<64x4xf32>
    %c0_1 = arith.constant 0 : index
    %c0_2 = arith.constant 0 : index
    %1 = vector.load %arg1[%c0_1, %c0_2] : memref<8x16xf32, #tpu.memory_space<vmem>>, vector<8x16xf32>
    %c8 = arith.constant 8 : index
    %c0_3 = arith.constant 0 : index
    %2 = vector.load %arg2[%c8, %c0_3] : memref<288x128xf32, #tpu.memory_space<vmem>>, vector<32x128xf32>
    %c0_4 = arith.constant 0 : index
    %c0_5 = arith.constant 0 : index
    %3 = vector.load %arg2[%c0_4, %c0_5] : memref<288x128xf32, #tpu.memory_space<vmem>>, vector<4x128xf32>
    %cst = arith.constant dense<0.000000e+00> : vector<64x128xf32>
    %4 = tpu.matmul %0, %3, %cst {dimension_numbers = #tpu.dot_dimension_numbers<[1], [0], [0], [1], [0, 0, 1, 1], [], []>, precision = #tpu.contract_precision<fp32>} : vector<64x4xf32>, vector<4x128xf32>, vector<64x128xf32> -> vector<64x128xf32>
    %c40 = arith.constant 40 : index
    %c0_6 = arith.constant 0 : index
    %5 = vector.load %arg2[%c40, %c0_6] : memref<288x128xf32, #tpu.memory_space<vmem>>, vector<1x128xf32>
    %6 = vector.broadcast %5 : vector<1x128xf32> to vector<64x128xf32>
    %7 = arith.addf %4, %6 : vector<64x128xf32>
    %cst_7 = arith.constant 0.000000e+00 : f32
    %8 = vector.broadcast %cst_7 : f32 to vector<8x32xf32>
    %cst_8 = arith.constant 0.000000e+00 : f32
    %9 = vector.broadcast %cst_8 : f32 to vector<8x32xf32>
    %10 = vector.extract_strided_slice %7 {offsets = [0, 0], sizes = [8, 128], strides = [1, 1]} : vector<64x128xf32> to vector<8x128xf32>
    %cst_9 = arith.constant dense<0.000000e+00> : vector<8x128xf32>
    %11 = tpu.matmul %8, %2, %cst_9 {dimension_numbers = #tpu.dot_dimension_numbers<[1], [0], [0], [1], [0, 0, 1, 1], [], []>, precision = #tpu.contract_precision<fp32>} : vector<8x32xf32>, vector<32x128xf32>, vector<8x128xf32> -> vector<8x128xf32>
    %12 = arith.addf %11, %10 : vector<8x128xf32>
    %13 = vector.extract_strided_slice %12 {offsets = [0, 0], sizes = [8, 32], strides = [1, 1]} : vector<8x128xf32> to vector<8x32xf32>
    %cst_10 = arith.constant 5.000000e-01 : f32
    %14 = vector.broadcast %cst_10 : f32 to vector<8x32xf32>
    %15 = arith.mulf %14, %13 : vector<8x32xf32>
    %16 = math.tanh %15 : vector<8x32xf32>
    %cst_11 = arith.constant 1.000000e+00 : f32
    %17 = vector.broadcast %cst_11 : f32 to vector<8x32xf32>
    %18 = arith.addf %16, %17 : vector<8x32xf32>
    %cst_12 = arith.constant 5.000000e-01 : f32
    %19 = vector.broadcast %cst_12 : f32 to vector<8x32xf32>
    %20 = arith.mulf %19, %18 : vector<8x32xf32>
    %21 = vector.extract_strided_slice %12 {offsets = [0, 32], sizes = [8, 32], strides = [1, 1]} : vector<8x128xf32> to vector<8x32xf32>
    %cst_13 = arith.constant 5.000000e-01 : f32
    %22 = vector.broadcast %cst_13 : f32 to vector<8x32xf32>
    %23 = arith.mulf %22, %21 : vector<8x32xf32>
    %24 = math.tanh %23 : vector<8x32xf32>
    %cst_14 = arith.constant 1.000000e+00 : f32
    %25 = vector.broadcast %cst_14 : f32 to vector<8x32xf32>
    %26 = arith.addf %24, %25 : vector<8x32xf32>
    %cst_15 = arith.constant 5.000000e-01 : f32
    %27 = vector.broadcast %cst_15 : f32 to vector<8x32xf32>
    %28 = arith.mulf %27, %26 : vector<8x32xf32>
    %29 = vector.extract_strided_slice %12 {offsets = [0, 64], sizes = [8, 32], strides = [1, 1]} : vector<8x128xf32> to vector<8x32xf32>
    %30 = math.tanh %29 : vector<8x32xf32>
    %31 = vector.extract_strided_slice %12 {offsets = [0, 96], sizes = [8, 32], strides = [1, 1]} : vector<8x128xf32> to vector<8x32xf32>
    %cst_16 = arith.constant 5.000000e-01 : f32
    %32 = vector.broadcast %cst_16 : f32 to vector<8x32xf32>
    %33 = arith.mulf %32, %31 : vector<8x32xf32>
    %34 = math.tanh %33 : vector<8x32xf32>
    %cst_17 = arith.constant 1.000000e+00 : f32
    %35 = vector.broadcast %cst_17 : f32 to vector<8x32xf32>
    %36 = arith.addf %34, %35 : vector<8x32xf32>
    %cst_18 = arith.constant 5.000000e-01 : f32
    %37 = vector.broadcast %cst_18 : f32 to vector<8x32xf32>
    %38 = arith.mulf %37, %36 : vector<8x32xf32>
    %39 = arith.mulf %28, %9 : vector<8x32xf32>
    %40 = arith.mulf %20, %30 : vector<8x32xf32>
    %41 = arith.addf %39, %40 : vector<8x32xf32>
    %42 = math.tanh %41 : vector<8x32xf32>
    %43 = arith.mulf %38, %42 : vector<8x32xf32>
    %44 = vector.extract_strided_slice %7 {offsets = [8, 0], sizes = [8, 128], strides = [1, 1]} : vector<64x128xf32> to vector<8x128xf32>
    %cst_19 = arith.constant dense<0.000000e+00> : vector<8x128xf32>
    %45 = tpu.matmul %43, %2, %cst_19 {dimension_numbers = #tpu.dot_dimension_numbers<[1], [0], [0], [1], [0, 0, 1, 1], [], []>, precision = #tpu.contract_precision<fp32>} : vector<8x32xf32>, vector<32x128xf32>, vector<8x128xf32> -> vector<8x128xf32>
    %46 = arith.addf %45, %44 : vector<8x128xf32>
    %47 = vector.extract_strided_slice %46 {offsets = [0, 0], sizes = [8, 32], strides = [1, 1]} : vector<8x128xf32> to vector<8x32xf32>
    %cst_20 = arith.constant 5.000000e-01 : f32
    %48 = vector.broadcast %cst_20 : f32 to vector<8x32xf32>
    %49 = arith.mulf %48, %47 : vector<8x32xf32>
    %50 = math.tanh %49 : vector<8x32xf32>
    %cst_21 = arith.constant 1.000000e+00 : f32
    %51 = vector.broadcast %cst_21 : f32 to vector<8x32xf32>
    %52 = arith.addf %50, %51 : vector<8x32xf32>
    %cst_22 = arith.constant 5.000000e-01 : f32
    %53 = vector.broadcast %cst_22 : f32 to vector<8x32xf32>
    %54 = arith.mulf %53, %52 : vector<8x32xf32>
    %55 = vector.extract_strided_slice %46 {offsets = [0, 32], sizes = [8, 32], strides = [1, 1]} : vector<8x128xf32> to vector<8x32xf32>
    %cst_23 = arith.constant 5.000000e-01 : f32
    %56 = vector.broadcast %cst_23 : f32 to vector<8x32xf32>
    %57 = arith.mulf %56, %55 : vector<8x32xf32>
    %58 = math.tanh %57 : vector<8x32xf32>
    %cst_24 = arith.constant 1.000000e+00 : f32
    %59 = vector.broadcast %cst_24 : f32 to vector<8x32xf32>
    %60 = arith.addf %58, %59 : vector<8x32xf32>
    %cst_25 = arith.constant 5.000000e-01 : f32
    %61 = vector.broadcast %cst_25 : f32 to vector<8x32xf32>
    %62 = arith.mulf %61, %60 : vector<8x32xf32>
    %63 = vector.extract_strided_slice %46 {offsets = [0, 64], sizes = [8, 32], strides = [1, 1]} : vector<8x128xf32> to vector<8x32xf32>
    %64 = math.tanh %63 : vector<8x32xf32>
    %65 = vector.extract_strided_slice %46 {offsets = [0, 96], sizes = [8, 32], strides = [1, 1]} : vector<8x128xf32> to vector<8x32xf32>
    %cst_26 = arith.constant 5.000000e-01 : f32
    %66 = vector.broadcast %cst_26 : f32 to vector<8x32xf32>
    %67 = arith.mulf %66, %65 : vector<8x32xf32>
    %68 = math.tanh %67 : vector<8x32xf32>
    %cst_27 = arith.constant 1.000000e+00 : f32
    %69 = vector.broadcast %cst_27 : f32 to vector<8x32xf32>
    %70 = arith.addf %68, %69 : vector<8x32xf32>
    %cst_28 = arith.constant 5.000000e-01 : f32
    %71 = vector.broadcast %cst_28 : f32 to vector<8x32xf32>
    %72 = arith.mulf %71, %70 : vector<8x32xf32>
    %73 = arith.mulf %62, %41 : vector<8x32xf32>
    %74 = arith.mulf %54, %64 : vector<8x32xf32>
    %75 = arith.addf %73, %74 : vector<8x32xf32>
    %76 = math.tanh %75 : vector<8x32xf32>
    %77 = arith.mulf %72, %76 : vector<8x32xf32>
    %78 = vector.extract_strided_slice %7 {offsets = [16, 0], sizes = [8, 128], strides = [1, 1]} : vector<64x128xf32> to vector<8x128xf32>
    %cst_29 = arith.constant dense<0.000000e+00> : vector<8x128xf32>
    %79 = tpu.matmul %77, %2, %cst_29 {dimension_numbers = #tpu.dot_dimension_numbers<[1], [0], [0], [1], [0, 0, 1, 1], [], []>, precision = #tpu.contract_precision<fp32>} : vector<8x32xf32>, vector<32x128xf32>, vector<8x128xf32> -> vector<8x128xf32>
    %80 = arith.addf %79, %78 : vector<8x128xf32>
    %81 = vector.extract_strided_slice %80 {offsets = [0, 0], sizes = [8, 32], strides = [1, 1]} : vector<8x128xf32> to vector<8x32xf32>
    %cst_30 = arith.constant 5.000000e-01 : f32
    %82 = vector.broadcast %cst_30 : f32 to vector<8x32xf32>
    %83 = arith.mulf %82, %81 : vector<8x32xf32>
    %84 = math.tanh %83 : vector<8x32xf32>
    %cst_31 = arith.constant 1.000000e+00 : f32
    %85 = vector.broadcast %cst_31 : f32 to vector<8x32xf32>
    %86 = arith.addf %84, %85 : vector<8x32xf32>
    %cst_32 = arith.constant 5.000000e-01 : f32
    %87 = vector.broadcast %cst_32 : f32 to vector<8x32xf32>
    %88 = arith.mulf %87, %86 : vector<8x32xf32>
    %89 = vector.extract_strided_slice %80 {offsets = [0, 32], sizes = [8, 32], strides = [1, 1]} : vector<8x128xf32> to vector<8x32xf32>
    %cst_33 = arith.constant 5.000000e-01 : f32
    %90 = vector.broadcast %cst_33 : f32 to vector<8x32xf32>
    %91 = arith.mulf %90, %89 : vector<8x32xf32>
    %92 = math.tanh %91 : vector<8x32xf32>
    %cst_34 = arith.constant 1.000000e+00 : f32
    %93 = vector.broadcast %cst_34 : f32 to vector<8x32xf32>
    %94 = arith.addf %92, %93 : vector<8x32xf32>
    %cst_35 = arith.constant 5.000000e-01 : f32
    %95 = vector.broadcast %cst_35 : f32 to vector<8x32xf32>
    %96 = arith.mulf %95, %94 : vector<8x32xf32>
    %97 = vector.extract_strided_slice %80 {offsets = [0, 64], sizes = [8, 32], strides = [1, 1]} : vector<8x128xf32> to vector<8x32xf32>
    %98 = math.tanh %97 : vector<8x32xf32>
    %99 = vector.extract_strided_slice %80 {offsets = [0, 96], sizes = [8, 32], strides = [1, 1]} : vector<8x128xf32> to vector<8x32xf32>
    %cst_36 = arith.constant 5.000000e-01 : f32
    %100 = vector.broadcast %cst_36 : f32 to vector<8x32xf32>
    %101 = arith.mulf %100, %99 : vector<8x32xf32>
    %102 = math.tanh %101 : vector<8x32xf32>
    %cst_37 = arith.constant 1.000000e+00 : f32
    %103 = vector.broadcast %cst_37 : f32 to vector<8x32xf32>
    %104 = arith.addf %102, %103 : vector<8x32xf32>
    %cst_38 = arith.constant 5.000000e-01 : f32
    %105 = vector.broadcast %cst_38 : f32 to vector<8x32xf32>
    %106 = arith.mulf %105, %104 : vector<8x32xf32>
    %107 = arith.mulf %96, %75 : vector<8x32xf32>
    %108 = arith.mulf %88, %98 : vector<8x32xf32>
    %109 = arith.addf %107, %108 : vector<8x32xf32>
    %110 = math.tanh %109 : vector<8x32xf32>
    %111 = arith.mulf %106, %110 : vector<8x32xf32>
    %112 = vector.extract_strided_slice %7 {offsets = [24, 0], sizes = [8, 128], strides = [1, 1]} : vector<64x128xf32> to vector<8x128xf32>
    %cst_39 = arith.constant dense<0.000000e+00> : vector<8x128xf32>
    %113 = tpu.matmul %111, %2, %cst_39 {dimension_numbers = #tpu.dot_dimension_numbers<[1], [0], [0], [1], [0, 0, 1, 1], [], []>, precision = #tpu.contract_precision<fp32>} : vector<8x32xf32>, vector<32x128xf32>, vector<8x128xf32> -> vector<8x128xf32>
    %114 = arith.addf %113, %112 : vector<8x128xf32>
    %115 = vector.extract_strided_slice %114 {offsets = [0, 0], sizes = [8, 32], strides = [1, 1]} : vector<8x128xf32> to vector<8x32xf32>
    %cst_40 = arith.constant 5.000000e-01 : f32
    %116 = vector.broadcast %cst_40 : f32 to vector<8x32xf32>
    %117 = arith.mulf %116, %115 : vector<8x32xf32>
    %118 = math.tanh %117 : vector<8x32xf32>
    %cst_41 = arith.constant 1.000000e+00 : f32
    %119 = vector.broadcast %cst_41 : f32 to vector<8x32xf32>
    %120 = arith.addf %118, %119 : vector<8x32xf32>
    %cst_42 = arith.constant 5.000000e-01 : f32
    %121 = vector.broadcast %cst_42 : f32 to vector<8x32xf32>
    %122 = arith.mulf %121, %120 : vector<8x32xf32>
    %123 = vector.extract_strided_slice %114 {offsets = [0, 32], sizes = [8, 32], strides = [1, 1]} : vector<8x128xf32> to vector<8x32xf32>
    %cst_43 = arith.constant 5.000000e-01 : f32
    %124 = vector.broadcast %cst_43 : f32 to vector<8x32xf32>
    %125 = arith.mulf %124, %123 : vector<8x32xf32>
    %126 = math.tanh %125 : vector<8x32xf32>
    %cst_44 = arith.constant 1.000000e+00 : f32
    %127 = vector.broadcast %cst_44 : f32 to vector<8x32xf32>
    %128 = arith.addf %126, %127 : vector<8x32xf32>
    %cst_45 = arith.constant 5.000000e-01 : f32
    %129 = vector.broadcast %cst_45 : f32 to vector<8x32xf32>
    %130 = arith.mulf %129, %128 : vector<8x32xf32>
    %131 = vector.extract_strided_slice %114 {offsets = [0, 64], sizes = [8, 32], strides = [1, 1]} : vector<8x128xf32> to vector<8x32xf32>
    %132 = math.tanh %131 : vector<8x32xf32>
    %133 = vector.extract_strided_slice %114 {offsets = [0, 96], sizes = [8, 32], strides = [1, 1]} : vector<8x128xf32> to vector<8x32xf32>
    %cst_46 = arith.constant 5.000000e-01 : f32
    %134 = vector.broadcast %cst_46 : f32 to vector<8x32xf32>
    %135 = arith.mulf %134, %133 : vector<8x32xf32>
    %136 = math.tanh %135 : vector<8x32xf32>
    %cst_47 = arith.constant 1.000000e+00 : f32
    %137 = vector.broadcast %cst_47 : f32 to vector<8x32xf32>
    %138 = arith.addf %136, %137 : vector<8x32xf32>
    %cst_48 = arith.constant 5.000000e-01 : f32
    %139 = vector.broadcast %cst_48 : f32 to vector<8x32xf32>
    %140 = arith.mulf %139, %138 : vector<8x32xf32>
    %141 = arith.mulf %130, %109 : vector<8x32xf32>
    %142 = arith.mulf %122, %132 : vector<8x32xf32>
    %143 = arith.addf %141, %142 : vector<8x32xf32>
    %144 = math.tanh %143 : vector<8x32xf32>
    %145 = arith.mulf %140, %144 : vector<8x32xf32>
    %146 = vector.extract_strided_slice %7 {offsets = [32, 0], sizes = [8, 128], strides = [1, 1]} : vector<64x128xf32> to vector<8x128xf32>
    %cst_49 = arith.constant dense<0.000000e+00> : vector<8x128xf32>
    %147 = tpu.matmul %145, %2, %cst_49 {dimension_numbers = #tpu.dot_dimension_numbers<[1], [0], [0], [1], [0, 0, 1, 1], [], []>, precision = #tpu.contract_precision<fp32>} : vector<8x32xf32>, vector<32x128xf32>, vector<8x128xf32> -> vector<8x128xf32>
    %148 = arith.addf %147, %146 : vector<8x128xf32>
    %149 = vector.extract_strided_slice %148 {offsets = [0, 0], sizes = [8, 32], strides = [1, 1]} : vector<8x128xf32> to vector<8x32xf32>
    %cst_50 = arith.constant 5.000000e-01 : f32
    %150 = vector.broadcast %cst_50 : f32 to vector<8x32xf32>
    %151 = arith.mulf %150, %149 : vector<8x32xf32>
    %152 = math.tanh %151 : vector<8x32xf32>
    %cst_51 = arith.constant 1.000000e+00 : f32
    %153 = vector.broadcast %cst_51 : f32 to vector<8x32xf32>
    %154 = arith.addf %152, %153 : vector<8x32xf32>
    %cst_52 = arith.constant 5.000000e-01 : f32
    %155 = vector.broadcast %cst_52 : f32 to vector<8x32xf32>
    %156 = arith.mulf %155, %154 : vector<8x32xf32>
    %157 = vector.extract_strided_slice %148 {offsets = [0, 32], sizes = [8, 32], strides = [1, 1]} : vector<8x128xf32> to vector<8x32xf32>
    %cst_53 = arith.constant 5.000000e-01 : f32
    %158 = vector.broadcast %cst_53 : f32 to vector<8x32xf32>
    %159 = arith.mulf %158, %157 : vector<8x32xf32>
    %160 = math.tanh %159 : vector<8x32xf32>
    %cst_54 = arith.constant 1.000000e+00 : f32
    %161 = vector.broadcast %cst_54 : f32 to vector<8x32xf32>
    %162 = arith.addf %160, %161 : vector<8x32xf32>
    %cst_55 = arith.constant 5.000000e-01 : f32
    %163 = vector.broadcast %cst_55 : f32 to vector<8x32xf32>
    %164 = arith.mulf %163, %162 : vector<8x32xf32>
    %165 = vector.extract_strided_slice %148 {offsets = [0, 64], sizes = [8, 32], strides = [1, 1]} : vector<8x128xf32> to vector<8x32xf32>
    %166 = math.tanh %165 : vector<8x32xf32>
    %167 = vector.extract_strided_slice %148 {offsets = [0, 96], sizes = [8, 32], strides = [1, 1]} : vector<8x128xf32> to vector<8x32xf32>
    %cst_56 = arith.constant 5.000000e-01 : f32
    %168 = vector.broadcast %cst_56 : f32 to vector<8x32xf32>
    %169 = arith.mulf %168, %167 : vector<8x32xf32>
    %170 = math.tanh %169 : vector<8x32xf32>
    %cst_57 = arith.constant 1.000000e+00 : f32
    %171 = vector.broadcast %cst_57 : f32 to vector<8x32xf32>
    %172 = arith.addf %170, %171 : vector<8x32xf32>
    %cst_58 = arith.constant 5.000000e-01 : f32
    %173 = vector.broadcast %cst_58 : f32 to vector<8x32xf32>
    %174 = arith.mulf %173, %172 : vector<8x32xf32>
    %175 = arith.mulf %164, %143 : vector<8x32xf32>
    %176 = arith.mulf %156, %166 : vector<8x32xf32>
    %177 = arith.addf %175, %176 : vector<8x32xf32>
    %178 = math.tanh %177 : vector<8x32xf32>
    %179 = arith.mulf %174, %178 : vector<8x32xf32>
    %180 = vector.extract_strided_slice %7 {offsets = [40, 0], sizes = [8, 128], strides = [1, 1]} : vector<64x128xf32> to vector<8x128xf32>
    %cst_59 = arith.constant dense<0.000000e+00> : vector<8x128xf32>
    %181 = tpu.matmul %179, %2, %cst_59 {dimension_numbers = #tpu.dot_dimension_numbers<[1], [0], [0], [1], [0, 0, 1, 1], [], []>, precision = #tpu.contract_precision<fp32>} : vector<8x32xf32>, vector<32x128xf32>, vector<8x128xf32> -> vector<8x128xf32>
    %182 = arith.addf %181, %180 : vector<8x128xf32>
    %183 = vector.extract_strided_slice %182 {offsets = [0, 0], sizes = [8, 32], strides = [1, 1]} : vector<8x128xf32> to vector<8x32xf32>
    %cst_60 = arith.constant 5.000000e-01 : f32
    %184 = vector.broadcast %cst_60 : f32 to vector<8x32xf32>
    %185 = arith.mulf %184, %183 : vector<8x32xf32>
    %186 = math.tanh %185 : vector<8x32xf32>
    %cst_61 = arith.constant 1.000000e+00 : f32
    %187 = vector.broadcast %cst_61 : f32 to vector<8x32xf32>
    %188 = arith.addf %186, %187 : vector<8x32xf32>
    %cst_62 = arith.constant 5.000000e-01 : f32
    %189 = vector.broadcast %cst_62 : f32 to vector<8x32xf32>
    %190 = arith.mulf %189, %188 : vector<8x32xf32>
    %191 = vector.extract_strided_slice %182 {offsets = [0, 32], sizes = [8, 32], strides = [1, 1]} : vector<8x128xf32> to vector<8x32xf32>
    %cst_63 = arith.constant 5.000000e-01 : f32
    %192 = vector.broadcast %cst_63 : f32 to vector<8x32xf32>
    %193 = arith.mulf %192, %191 : vector<8x32xf32>
    %194 = math.tanh %193 : vector<8x32xf32>
    %cst_64 = arith.constant 1.000000e+00 : f32
    %195 = vector.broadcast %cst_64 : f32 to vector<8x32xf32>
    %196 = arith.addf %194, %195 : vector<8x32xf32>
    %cst_65 = arith.constant 5.000000e-01 : f32
    %197 = vector.broadcast %cst_65 : f32 to vector<8x32xf32>
    %198 = arith.mulf %197, %196 : vector<8x32xf32>
    %199 = vector.extract_strided_slice %182 {offsets = [0, 64], sizes = [8, 32], strides = [1, 1]} : vector<8x128xf32> to vector<8x32xf32>
    %200 = math.tanh %199 : vector<8x32xf32>
    %201 = vector.extract_strided_slice %182 {offsets = [0, 96], sizes = [8, 32], strides = [1, 1]} : vector<8x128xf32> to vector<8x32xf32>
    %cst_66 = arith.constant 5.000000e-01 : f32
    %202 = vector.broadcast %cst_66 : f32 to vector<8x32xf32>
    %203 = arith.mulf %202, %201 : vector<8x32xf32>
    %204 = math.tanh %203 : vector<8x32xf32>
    %cst_67 = arith.constant 1.000000e+00 : f32
    %205 = vector.broadcast %cst_67 : f32 to vector<8x32xf32>
    %206 = arith.addf %204, %205 : vector<8x32xf32>
    %cst_68 = arith.constant 5.000000e-01 : f32
    %207 = vector.broadcast %cst_68 : f32 to vector<8x32xf32>
    %208 = arith.mulf %207, %206 : vector<8x32xf32>
    %209 = arith.mulf %198, %177 : vector<8x32xf32>
    %210 = arith.mulf %190, %200 : vector<8x32xf32>
    %211 = arith.addf %209, %210 : vector<8x32xf32>
    %212 = math.tanh %211 : vector<8x32xf32>
    %213 = arith.mulf %208, %212 : vector<8x32xf32>
    %214 = vector.extract_strided_slice %7 {offsets = [48, 0], sizes = [8, 128], strides = [1, 1]} : vector<64x128xf32> to vector<8x128xf32>
    %cst_69 = arith.constant dense<0.000000e+00> : vector<8x128xf32>
    %215 = tpu.matmul %213, %2, %cst_69 {dimension_numbers = #tpu.dot_dimension_numbers<[1], [0], [0], [1], [0, 0, 1, 1], [], []>, precision = #tpu.contract_precision<fp32>} : vector<8x32xf32>, vector<32x128xf32>, vector<8x128xf32> -> vector<8x128xf32>
    %216 = arith.addf %215, %214 : vector<8x128xf32>
    %217 = vector.extract_strided_slice %216 {offsets = [0, 0], sizes = [8, 32], strides = [1, 1]} : vector<8x128xf32> to vector<8x32xf32>
    %cst_70 = arith.constant 5.000000e-01 : f32
    %218 = vector.broadcast %cst_70 : f32 to vector<8x32xf32>
    %219 = arith.mulf %218, %217 : vector<8x32xf32>
    %220 = math.tanh %219 : vector<8x32xf32>
    %cst_71 = arith.constant 1.000000e+00 : f32
    %221 = vector.broadcast %cst_71 : f32 to vector<8x32xf32>
    %222 = arith.addf %220, %221 : vector<8x32xf32>
    %cst_72 = arith.constant 5.000000e-01 : f32
    %223 = vector.broadcast %cst_72 : f32 to vector<8x32xf32>
    %224 = arith.mulf %223, %222 : vector<8x32xf32>
    %225 = vector.extract_strided_slice %216 {offsets = [0, 32], sizes = [8, 32], strides = [1, 1]} : vector<8x128xf32> to vector<8x32xf32>
    %cst_73 = arith.constant 5.000000e-01 : f32
    %226 = vector.broadcast %cst_73 : f32 to vector<8x32xf32>
    %227 = arith.mulf %226, %225 : vector<8x32xf32>
    %228 = math.tanh %227 : vector<8x32xf32>
    %cst_74 = arith.constant 1.000000e+00 : f32
    %229 = vector.broadcast %cst_74 : f32 to vector<8x32xf32>
    %230 = arith.addf %228, %229 : vector<8x32xf32>
    %cst_75 = arith.constant 5.000000e-01 : f32
    %231 = vector.broadcast %cst_75 : f32 to vector<8x32xf32>
    %232 = arith.mulf %231, %230 : vector<8x32xf32>
    %233 = vector.extract_strided_slice %216 {offsets = [0, 64], sizes = [8, 32], strides = [1, 1]} : vector<8x128xf32> to vector<8x32xf32>
    %234 = math.tanh %233 : vector<8x32xf32>
    %235 = vector.extract_strided_slice %216 {offsets = [0, 96], sizes = [8, 32], strides = [1, 1]} : vector<8x128xf32> to vector<8x32xf32>
    %cst_76 = arith.constant 5.000000e-01 : f32
    %236 = vector.broadcast %cst_76 : f32 to vector<8x32xf32>
    %237 = arith.mulf %236, %235 : vector<8x32xf32>
    %238 = math.tanh %237 : vector<8x32xf32>
    %cst_77 = arith.constant 1.000000e+00 : f32
    %239 = vector.broadcast %cst_77 : f32 to vector<8x32xf32>
    %240 = arith.addf %238, %239 : vector<8x32xf32>
    %cst_78 = arith.constant 5.000000e-01 : f32
    %241 = vector.broadcast %cst_78 : f32 to vector<8x32xf32>
    %242 = arith.mulf %241, %240 : vector<8x32xf32>
    %243 = arith.mulf %232, %211 : vector<8x32xf32>
    %244 = arith.mulf %224, %234 : vector<8x32xf32>
    %245 = arith.addf %243, %244 : vector<8x32xf32>
    %246 = math.tanh %245 : vector<8x32xf32>
    %247 = arith.mulf %242, %246 : vector<8x32xf32>
    %248 = vector.extract_strided_slice %7 {offsets = [56, 0], sizes = [8, 128], strides = [1, 1]} : vector<64x128xf32> to vector<8x128xf32>
    %cst_79 = arith.constant dense<0.000000e+00> : vector<8x128xf32>
    %249 = tpu.matmul %247, %2, %cst_79 {dimension_numbers = #tpu.dot_dimension_numbers<[1], [0], [0], [1], [0, 0, 1, 1], [], []>, precision = #tpu.contract_precision<fp32>} : vector<8x32xf32>, vector<32x128xf32>, vector<8x128xf32> -> vector<8x128xf32>
    %250 = arith.addf %249, %248 : vector<8x128xf32>
    %251 = vector.extract_strided_slice %250 {offsets = [0, 0], sizes = [8, 32], strides = [1, 1]} : vector<8x128xf32> to vector<8x32xf32>
    %cst_80 = arith.constant 5.000000e-01 : f32
    %252 = vector.broadcast %cst_80 : f32 to vector<8x32xf32>
    %253 = arith.mulf %252, %251 : vector<8x32xf32>
    %254 = math.tanh %253 : vector<8x32xf32>
    %cst_81 = arith.constant 1.000000e+00 : f32
    %255 = vector.broadcast %cst_81 : f32 to vector<8x32xf32>
    %256 = arith.addf %254, %255 : vector<8x32xf32>
    %cst_82 = arith.constant 5.000000e-01 : f32
    %257 = vector.broadcast %cst_82 : f32 to vector<8x32xf32>
    %258 = arith.mulf %257, %256 : vector<8x32xf32>
    %259 = vector.extract_strided_slice %250 {offsets = [0, 32], sizes = [8, 32], strides = [1, 1]} : vector<8x128xf32> to vector<8x32xf32>
    %cst_83 = arith.constant 5.000000e-01 : f32
    %260 = vector.broadcast %cst_83 : f32 to vector<8x32xf32>
    %261 = arith.mulf %260, %259 : vector<8x32xf32>
    %262 = math.tanh %261 : vector<8x32xf32>
    %cst_84 = arith.constant 1.000000e+00 : f32
    %263 = vector.broadcast %cst_84 : f32 to vector<8x32xf32>
    %264 = arith.addf %262, %263 : vector<8x32xf32>
    %cst_85 = arith.constant 5.000000e-01 : f32
    %265 = vector.broadcast %cst_85 : f32 to vector<8x32xf32>
    %266 = arith.mulf %265, %264 : vector<8x32xf32>
    %267 = vector.extract_strided_slice %250 {offsets = [0, 64], sizes = [8, 32], strides = [1, 1]} : vector<8x128xf32> to vector<8x32xf32>
    %268 = math.tanh %267 : vector<8x32xf32>
    %269 = vector.extract_strided_slice %250 {offsets = [0, 96], sizes = [8, 32], strides = [1, 1]} : vector<8x128xf32> to vector<8x32xf32>
    %cst_86 = arith.constant 5.000000e-01 : f32
    %270 = vector.broadcast %cst_86 : f32 to vector<8x32xf32>
    %271 = arith.mulf %270, %269 : vector<8x32xf32>
    %272 = math.tanh %271 : vector<8x32xf32>
    %cst_87 = arith.constant 1.000000e+00 : f32
    %273 = vector.broadcast %cst_87 : f32 to vector<8x32xf32>
    %274 = arith.addf %272, %273 : vector<8x32xf32>
    %cst_88 = arith.constant 5.000000e-01 : f32
    %275 = vector.broadcast %cst_88 : f32 to vector<8x32xf32>
    %276 = arith.mulf %275, %274 : vector<8x32xf32>
    %277 = arith.mulf %266, %245 : vector<8x32xf32>
    %278 = arith.mulf %258, %268 : vector<8x32xf32>
    %279 = arith.addf %277, %278 : vector<8x32xf32>
    %280 = math.tanh %279 : vector<8x32xf32>
    %281 = arith.mulf %276, %280 : vector<8x32xf32>
    %c48 = arith.constant 48 : index
    %c0_89 = arith.constant 0 : index
    %282 = vector.load %arg2[%c48, %c0_89] : memref<288x128xf32, #tpu.memory_space<vmem>>, vector<32x16xf32>
    %cst_90 = arith.constant dense<0.000000e+00> : vector<8x16xf32>
    %283 = tpu.matmul %281, %282, %cst_90 {dimension_numbers = #tpu.dot_dimension_numbers<[1], [0], [0], [1], [0, 0, 1, 1], [], []>, precision = #tpu.contract_precision<fp32>} : vector<8x32xf32>, vector<32x16xf32>, vector<8x16xf32> -> vector<8x16xf32>
    %c80 = arith.constant 80 : index
    %c0_91 = arith.constant 0 : index
    %284 = vector.load %arg2[%c80, %c0_91] : memref<288x128xf32, #tpu.memory_space<vmem>>, vector<1x16xf32>
    %285 = vector.broadcast %284 : vector<1x16xf32> to vector<8x16xf32>
    %286 = arith.addf %283, %285 : vector<8x16xf32>
    %c88 = arith.constant 88 : index
    %c0_92 = arith.constant 0 : index
    %287 = vector.load %arg2[%c88, %c0_92] : memref<288x128xf32, #tpu.memory_space<vmem>>, vector<32x16xf32>
    %cst_93 = arith.constant dense<0.000000e+00> : vector<8x16xf32>
    %288 = tpu.matmul %281, %287, %cst_93 {dimension_numbers = #tpu.dot_dimension_numbers<[1], [0], [0], [1], [0, 0, 1, 1], [], []>, precision = #tpu.contract_precision<fp32>} : vector<8x32xf32>, vector<32x16xf32>, vector<8x16xf32> -> vector<8x16xf32>
    %c120 = arith.constant 120 : index
    %c0_94 = arith.constant 0 : index
    %289 = vector.load %arg2[%c120, %c0_94] : memref<288x128xf32, #tpu.memory_space<vmem>>, vector<1x16xf32>
    %290 = vector.broadcast %289 : vector<1x16xf32> to vector<8x16xf32>
    %291 = arith.addf %288, %290 : vector<8x16xf32>
    %cst_95 = arith.constant 5.000000e-01 : f32
    %292 = vector.broadcast %cst_95 : f32 to vector<8x16xf32>
    %293 = arith.mulf %292, %291 : vector<8x16xf32>
    %294 = math.exp %293 : vector<8x16xf32>
    %295 = arith.mulf %1, %294 : vector<8x16xf32>
    %296 = arith.addf %286, %295 : vector<8x16xf32>
    %c128 = arith.constant 128 : index
    %c0_96 = arith.constant 0 : index
    %297 = vector.load %arg2[%c128, %c0_96] : memref<288x128xf32, #tpu.memory_space<vmem>>, vector<16x32xf32>
    %cst_97 = arith.constant dense<0.000000e+00> : vector<8x32xf32>
    %298 = tpu.matmul %296, %297, %cst_97 {dimension_numbers = #tpu.dot_dimension_numbers<[1], [0], [0], [1], [0, 0, 1, 1], [], []>, precision = #tpu.contract_precision<fp32>} : vector<8x16xf32>, vector<16x32xf32>, vector<8x32xf32> -> vector<8x32xf32>
    %c144 = arith.constant 144 : index
    %c0_98 = arith.constant 0 : index
    %299 = vector.load %arg2[%c144, %c0_98] : memref<288x128xf32, #tpu.memory_space<vmem>>, vector<1x32xf32>
    %300 = vector.broadcast %299 : vector<1x32xf32> to vector<8x32xf32>
    %301 = arith.addf %298, %300 : vector<8x32xf32>
    %c152 = arith.constant 152 : index
    %c0_99 = arith.constant 0 : index
    %302 = vector.load %arg2[%c152, %c0_99] : memref<288x128xf32, #tpu.memory_space<vmem>>, vector<16x32xf32>
    %cst_100 = arith.constant dense<0.000000e+00> : vector<8x32xf32>
    %303 = tpu.matmul %296, %302, %cst_100 {dimension_numbers = #tpu.dot_dimension_numbers<[1], [0], [0], [1], [0, 0, 1, 1], [], []>, precision = #tpu.contract_precision<fp32>} : vector<8x16xf32>, vector<16x32xf32>, vector<8x32xf32> -> vector<8x32xf32>
    %c168 = arith.constant 168 : index
    %c0_101 = arith.constant 0 : index
    %304 = vector.load %arg2[%c168, %c0_101] : memref<288x128xf32, #tpu.memory_space<vmem>>, vector<1x32xf32>
    %305 = vector.broadcast %304 : vector<1x32xf32> to vector<8x32xf32>
    %306 = arith.addf %303, %305 : vector<8x32xf32>
    %c176 = arith.constant 176 : index
    %c0_102 = arith.constant 0 : index
    %307 = vector.load %arg2[%c176, %c0_102] : memref<288x128xf32, #tpu.memory_space<vmem>>, vector<16x4xf32>
    %cst_103 = arith.constant dense<0.000000e+00> : vector<8x4xf32>
    %308 = tpu.matmul %296, %307, %cst_103 {dimension_numbers = #tpu.dot_dimension_numbers<[1], [0], [0], [1], [0, 0, 1, 1], [], []>, precision = #tpu.contract_precision<fp32>} : vector<8x16xf32>, vector<16x4xf32>, vector<8x4xf32> -> vector<8x4xf32>
    %c192 = arith.constant 192 : index
    %c0_104 = arith.constant 0 : index
    %309 = vector.load %arg2[%c192, %c0_104] : memref<288x128xf32, #tpu.memory_space<vmem>>, vector<1x4xf32>
    %310 = vector.broadcast %309 : vector<1x4xf32> to vector<8x4xf32>
    %311 = arith.addf %308, %310 : vector<8x4xf32>
    %c208 = arith.constant 208 : index
    %c0_105 = arith.constant 0 : index
    %312 = vector.load %arg2[%c208, %c0_105] : memref<288x128xf32, #tpu.memory_space<vmem>>, vector<32x128xf32>
    %c200 = arith.constant 200 : index
    %c0_106 = arith.constant 0 : index
    %313 = vector.load %arg2[%c200, %c0_106] : memref<288x128xf32, #tpu.memory_space<vmem>>, vector<4x128xf32>
    %cst_107 = arith.constant dense<0.000000e+00> : vector<8x128xf32>
    %314 = tpu.matmul %311, %313, %cst_107 {dimension_numbers = #tpu.dot_dimension_numbers<[1], [0], [0], [1], [0, 0, 1, 1], [], []>, precision = #tpu.contract_precision<fp32>} : vector<8x4xf32>, vector<4x128xf32>, vector<8x128xf32> -> vector<8x128xf32>
    %c240 = arith.constant 240 : index
    %c0_108 = arith.constant 0 : index
    %315 = vector.load %arg2[%c240, %c0_108] : memref<288x128xf32, #tpu.memory_space<vmem>>, vector<1x128xf32>
    %316 = vector.broadcast %315 : vector<1x128xf32> to vector<8x128xf32>
    %317 = arith.addf %314, %316 : vector<8x128xf32>
    %cst_109 = arith.constant dense<0.000000e+00> : vector<8x128xf32>
    %318 = tpu.matmul %301, %312, %cst_109 {dimension_numbers = #tpu.dot_dimension_numbers<[1], [0], [0], [1], [0, 0, 1, 1], [], []>, precision = #tpu.contract_precision<fp32>} : vector<8x32xf32>, vector<32x128xf32>, vector<8x128xf32> -> vector<8x128xf32>
    %319 = arith.addf %318, %317 : vector<8x128xf32>
    %320 = vector.extract_strided_slice %319 {offsets = [0, 0], sizes = [8, 32], strides = [1, 1]} : vector<8x128xf32> to vector<8x32xf32>
    %cst_110 = arith.constant 5.000000e-01 : f32
    %321 = vector.broadcast %cst_110 : f32 to vector<8x32xf32>
    %322 = arith.mulf %321, %320 : vector<8x32xf32>
    %323 = math.tanh %322 : vector<8x32xf32>
    %cst_111 = arith.constant 1.000000e+00 : f32
    %324 = vector.broadcast %cst_111 : f32 to vector<8x32xf32>
    %325 = arith.addf %323, %324 : vector<8x32xf32>
    %cst_112 = arith.constant 5.000000e-01 : f32
    %326 = vector.broadcast %cst_112 : f32 to vector<8x32xf32>
    %327 = arith.mulf %326, %325 : vector<8x32xf32>
    %328 = vector.extract_strided_slice %319 {offsets = [0, 32], sizes = [8, 32], strides = [1, 1]} : vector<8x128xf32> to vector<8x32xf32>
    %cst_113 = arith.constant 5.000000e-01 : f32
    %329 = vector.broadcast %cst_113 : f32 to vector<8x32xf32>
    %330 = arith.mulf %329, %328 : vector<8x32xf32>
    %331 = math.tanh %330 : vector<8x32xf32>
    %cst_114 = arith.constant 1.000000e+00 : f32
    %332 = vector.broadcast %cst_114 : f32 to vector<8x32xf32>
    %333 = arith.addf %331, %332 : vector<8x32xf32>
    %cst_115 = arith.constant 5.000000e-01 : f32
    %334 = vector.broadcast %cst_115 : f32 to vector<8x32xf32>
    %335 = arith.mulf %334, %333 : vector<8x32xf32>
    %336 = vector.extract_strided_slice %319 {offsets = [0, 64], sizes = [8, 32], strides = [1, 1]} : vector<8x128xf32> to vector<8x32xf32>
    %337 = math.tanh %336 : vector<8x32xf32>
    %338 = vector.extract_strided_slice %319 {offsets = [0, 96], sizes = [8, 32], strides = [1, 1]} : vector<8x128xf32> to vector<8x32xf32>
    %cst_116 = arith.constant 5.000000e-01 : f32
    %339 = vector.broadcast %cst_116 : f32 to vector<8x32xf32>
    %340 = arith.mulf %339, %338 : vector<8x32xf32>
    %341 = math.tanh %340 : vector<8x32xf32>
    %cst_117 = arith.constant 1.000000e+00 : f32
    %342 = vector.broadcast %cst_117 : f32 to vector<8x32xf32>
    %343 = arith.addf %341, %342 : vector<8x32xf32>
    %cst_118 = arith.constant 5.000000e-01 : f32
    %344 = vector.broadcast %cst_118 : f32 to vector<8x32xf32>
    %345 = arith.mulf %344, %343 : vector<8x32xf32>
    %346 = arith.mulf %335, %306 : vector<8x32xf32>
    %347 = arith.mulf %327, %337 : vector<8x32xf32>
    %348 = arith.addf %346, %347 : vector<8x32xf32>
    %349 = math.tanh %348 : vector<8x32xf32>
    %350 = arith.mulf %345, %349 : vector<8x32xf32>
    %c0_119 = arith.constant 0 : index
    %c0_120 = arith.constant 0 : index
    %351 = vector.load %arg6[%c0_119, %c0_120] : memref<64x32xf32, #tpu.memory_space<vmem>>, vector<8x32xf32>
    tpu.vector_store %arg6[%c0_119, %c0_120], %350 {strides = array<i32>} : memref<64x32xf32, #tpu.memory_space<vmem>>, vector<8x32xf32>,
    %cst_121 = arith.constant dense<0.000000e+00> : vector<8x128xf32>
    %352 = tpu.matmul %350, %312, %cst_121 {dimension_numbers = #tpu.dot_dimension_numbers<[1], [0], [0], [1], [0, 0, 1, 1], [], []>, precision = #tpu.contract_precision<fp32>} : vector<8x32xf32>, vector<32x128xf32>, vector<8x128xf32> -> vector<8x128xf32>
    %353 = arith.addf %352, %317 : vector<8x128xf32>
    %354 = vector.extract_strided_slice %353 {offsets = [0, 0], sizes = [8, 32], strides = [1, 1]} : vector<8x128xf32> to vector<8x32xf32>
    %cst_122 = arith.constant 5.000000e-01 : f32
    %355 = vector.broadcast %cst_122 : f32 to vector<8x32xf32>
    %356 = arith.mulf %355, %354 : vector<8x32xf32>
    %357 = math.tanh %356 : vector<8x32xf32>
    %cst_123 = arith.constant 1.000000e+00 : f32
    %358 = vector.broadcast %cst_123 : f32 to vector<8x32xf32>
    %359 = arith.addf %357, %358 : vector<8x32xf32>
    %cst_124 = arith.constant 5.000000e-01 : f32
    %360 = vector.broadcast %cst_124 : f32 to vector<8x32xf32>
    %361 = arith.mulf %360, %359 : vector<8x32xf32>
    %362 = vector.extract_strided_slice %353 {offsets = [0, 32], sizes = [8, 32], strides = [1, 1]} : vector<8x128xf32> to vector<8x32xf32>
    %cst_125 = arith.constant 5.000000e-01 : f32
    %363 = vector.broadcast %cst_125 : f32 to vector<8x32xf32>
    %364 = arith.mulf %363, %362 : vector<8x32xf32>
    %365 = math.tanh %364 : vector<8x32xf32>
    %cst_126 = arith.constant 1.000000e+00 : f32
    %366 = vector.broadcast %cst_126 : f32 to vector<8x32xf32>
    %367 = arith.addf %365, %366 : vector<8x32xf32>
    %cst_127 = arith.constant 5.000000e-01 : f32
    %368 = vector.broadcast %cst_127 : f32 to vector<8x32xf32>
    %369 = arith.mulf %368, %367 : vector<8x32xf32>
    %370 = vector.extract_strided_slice %353 {offsets = [0, 64], sizes = [8, 32], strides = [1, 1]} : vector<8x128xf32> to vector<8x32xf32>
    %371 = math.tanh %370 : vector<8x32xf32>
    %372 = vector.extract_strided_slice %353 {offsets = [0, 96], sizes = [8, 32], strides = [1, 1]} : vector<8x128xf32> to vector<8x32xf32>
    %cst_128 = arith.constant 5.000000e-01 : f32
    %373 = vector.broadcast %cst_128 : f32 to vector<8x32xf32>
    %374 = arith.mulf %373, %372 : vector<8x32xf32>
    %375 = math.tanh %374 : vector<8x32xf32>
    %cst_129 = arith.constant 1.000000e+00 : f32
    %376 = vector.broadcast %cst_129 : f32 to vector<8x32xf32>
    %377 = arith.addf %375, %376 : vector<8x32xf32>
    %cst_130 = arith.constant 5.000000e-01 : f32
    %378 = vector.broadcast %cst_130 : f32 to vector<8x32xf32>
    %379 = arith.mulf %378, %377 : vector<8x32xf32>
    %380 = arith.mulf %369, %348 : vector<8x32xf32>
    %381 = arith.mulf %361, %371 : vector<8x32xf32>
    %382 = arith.addf %380, %381 : vector<8x32xf32>
    %383 = math.tanh %382 : vector<8x32xf32>
    %384 = arith.mulf %379, %383 : vector<8x32xf32>
    %c8_131 = arith.constant 8 : index
    %c0_132 = arith.constant 0 : index
    %385 = vector.load %arg6[%c8_131, %c0_132] : memref<64x32xf32, #tpu.memory_space<vmem>>, vector<8x32xf32>
    tpu.vector_store %arg6[%c8_131, %c0_132], %384 {strides = array<i32>} : memref<64x32xf32, #tpu.memory_space<vmem>>, vector<8x32xf32>,
    %cst_133 = arith.constant dense<0.000000e+00> : vector<8x128xf32>
    %386 = tpu.matmul %384, %312, %cst_133 {dimension_numbers = #tpu.dot_dimension_numbers<[1], [0], [0], [1], [0, 0, 1, 1], [], []>, precision = #tpu.contract_precision<fp32>} : vector<8x32xf32>, vector<32x128xf32>, vector<8x128xf32> -> vector<8x128xf32>
    %387 = arith.addf %386, %317 : vector<8x128xf32>
    %388 = vector.extract_strided_slice %387 {offsets = [0, 0], sizes = [8, 32], strides = [1, 1]} : vector<8x128xf32> to vector<8x32xf32>
    %cst_134 = arith.constant 5.000000e-01 : f32
    %389 = vector.broadcast %cst_134 : f32 to vector<8x32xf32>
    %390 = arith.mulf %389, %388 : vector<8x32xf32>
    %391 = math.tanh %390 : vector<8x32xf32>
    %cst_135 = arith.constant 1.000000e+00 : f32
    %392 = vector.broadcast %cst_135 : f32 to vector<8x32xf32>
    %393 = arith.addf %391, %392 : vector<8x32xf32>
    %cst_136 = arith.constant 5.000000e-01 : f32
    %394 = vector.broadcast %cst_136 : f32 to vector<8x32xf32>
    %395 = arith.mulf %394, %393 : vector<8x32xf32>
    %396 = vector.extract_strided_slice %387 {offsets = [0, 32], sizes = [8, 32], strides = [1, 1]} : vector<8x128xf32> to vector<8x32xf32>
    %cst_137 = arith.constant 5.000000e-01 : f32
    %397 = vector.broadcast %cst_137 : f32 to vector<8x32xf32>
    %398 = arith.mulf %397, %396 : vector<8x32xf32>
    %399 = math.tanh %398 : vector<8x32xf32>
    %cst_138 = arith.constant 1.000000e+00 : f32
    %400 = vector.broadcast %cst_138 : f32 to vector<8x32xf32>
    %401 = arith.addf %399, %400 : vector<8x32xf32>
    %cst_139 = arith.constant 5.000000e-01 : f32
    %402 = vector.broadcast %cst_139 : f32 to vector<8x32xf32>
    %403 = arith.mulf %402, %401 : vector<8x32xf32>
    %404 = vector.extract_strided_slice %387 {offsets = [0, 64], sizes = [8, 32], strides = [1, 1]} : vector<8x128xf32> to vector<8x32xf32>
    %405 = math.tanh %404 : vector<8x32xf32>
    %406 = vector.extract_strided_slice %387 {offsets = [0, 96], sizes = [8, 32], strides = [1, 1]} : vector<8x128xf32> to vector<8x32xf32>
    %cst_140 = arith.constant 5.000000e-01 : f32
    %407 = vector.broadcast %cst_140 : f32 to vector<8x32xf32>
    %408 = arith.mulf %407, %406 : vector<8x32xf32>
    %409 = math.tanh %408 : vector<8x32xf32>
    %cst_141 = arith.constant 1.000000e+00 : f32
    %410 = vector.broadcast %cst_141 : f32 to vector<8x32xf32>
    %411 = arith.addf %409, %410 : vector<8x32xf32>
    %cst_142 = arith.constant 5.000000e-01 : f32
    %412 = vector.broadcast %cst_142 : f32 to vector<8x32xf32>
    %413 = arith.mulf %412, %411 : vector<8x32xf32>
    %414 = arith.mulf %403, %382 : vector<8x32xf32>
    %415 = arith.mulf %395, %405 : vector<8x32xf32>
    %416 = arith.addf %414, %415 : vector<8x32xf32>
    %417 = math.tanh %416 : vector<8x32xf32>
    %418 = arith.mulf %413, %417 : vector<8x32xf32>
    %c16 = arith.constant 16 : index
    %c0_143 = arith.constant 0 : index
    %419 = vector.load %arg6[%c16, %c0_143] : memref<64x32xf32, #tpu.memory_space<vmem>>, vector<8x32xf32>
    tpu.vector_store %arg6[%c16, %c0_143], %418 {strides = array<i32>} : memref<64x32xf32, #tpu.memory_space<vmem>>, vector<8x32xf32>,
    %cst_144 = arith.constant dense<0.000000e+00> : vector<8x128xf32>
    %420 = tpu.matmul %418, %312, %cst_144 {dimension_numbers = #tpu.dot_dimension_numbers<[1], [0], [0], [1], [0, 0, 1, 1], [], []>, precision = #tpu.contract_precision<fp32>} : vector<8x32xf32>, vector<32x128xf32>, vector<8x128xf32> -> vector<8x128xf32>
    %421 = arith.addf %420, %317 : vector<8x128xf32>
    %422 = vector.extract_strided_slice %421 {offsets = [0, 0], sizes = [8, 32], strides = [1, 1]} : vector<8x128xf32> to vector<8x32xf32>
    %cst_145 = arith.constant 5.000000e-01 : f32
    %423 = vector.broadcast %cst_145 : f32 to vector<8x32xf32>
    %424 = arith.mulf %423, %422 : vector<8x32xf32>
    %425 = math.tanh %424 : vector<8x32xf32>
    %cst_146 = arith.constant 1.000000e+00 : f32
    %426 = vector.broadcast %cst_146 : f32 to vector<8x32xf32>
    %427 = arith.addf %425, %426 : vector<8x32xf32>
    %cst_147 = arith.constant 5.000000e-01 : f32
    %428 = vector.broadcast %cst_147 : f32 to vector<8x32xf32>
    %429 = arith.mulf %428, %427 : vector<8x32xf32>
    %430 = vector.extract_strided_slice %421 {offsets = [0, 32], sizes = [8, 32], strides = [1, 1]} : vector<8x128xf32> to vector<8x32xf32>
    %cst_148 = arith.constant 5.000000e-01 : f32
    %431 = vector.broadcast %cst_148 : f32 to vector<8x32xf32>
    %432 = arith.mulf %431, %430 : vector<8x32xf32>
    %433 = math.tanh %432 : vector<8x32xf32>
    %cst_149 = arith.constant 1.000000e+00 : f32
    %434 = vector.broadcast %cst_149 : f32 to vector<8x32xf32>
    %435 = arith.addf %433, %434 : vector<8x32xf32>
    %cst_150 = arith.constant 5.000000e-01 : f32
    %436 = vector.broadcast %cst_150 : f32 to vector<8x32xf32>
    %437 = arith.mulf %436, %435 : vector<8x32xf32>
    %438 = vector.extract_strided_slice %421 {offsets = [0, 64], sizes = [8, 32], strides = [1, 1]} : vector<8x128xf32> to vector<8x32xf32>
    %439 = math.tanh %438 : vector<8x32xf32>
    %440 = vector.extract_strided_slice %421 {offsets = [0, 96], sizes = [8, 32], strides = [1, 1]} : vector<8x128xf32> to vector<8x32xf32>
    %cst_151 = arith.constant 5.000000e-01 : f32
    %441 = vector.broadcast %cst_151 : f32 to vector<8x32xf32>
    %442 = arith.mulf %441, %440 : vector<8x32xf32>
    %443 = math.tanh %442 : vector<8x32xf32>
    %cst_152 = arith.constant 1.000000e+00 : f32
    %444 = vector.broadcast %cst_152 : f32 to vector<8x32xf32>
    %445 = arith.addf %443, %444 : vector<8x32xf32>
    %cst_153 = arith.constant 5.000000e-01 : f32
    %446 = vector.broadcast %cst_153 : f32 to vector<8x32xf32>
    %447 = arith.mulf %446, %445 : vector<8x32xf32>
    %448 = arith.mulf %437, %416 : vector<8x32xf32>
    %449 = arith.mulf %429, %439 : vector<8x32xf32>
    %450 = arith.addf %448, %449 : vector<8x32xf32>
    %451 = math.tanh %450 : vector<8x32xf32>
    %452 = arith.mulf %447, %451 : vector<8x32xf32>
    %c24 = arith.constant 24 : index
    %c0_154 = arith.constant 0 : index
    %453 = vector.load %arg6[%c24, %c0_154] : memref<64x32xf32, #tpu.memory_space<vmem>>, vector<8x32xf32>
    tpu.vector_store %arg6[%c24, %c0_154], %452 {strides = array<i32>} : memref<64x32xf32, #tpu.memory_space<vmem>>, vector<8x32xf32>,
    %cst_155 = arith.constant dense<0.000000e+00> : vector<8x128xf32>
    %454 = tpu.matmul %452, %312, %cst_155 {dimension_numbers = #tpu.dot_dimension_numbers<[1], [0], [0], [1], [0, 0, 1, 1], [], []>, precision = #tpu.contract_precision<fp32>} : vector<8x32xf32>, vector<32x128xf32>, vector<8x128xf32> -> vector<8x128xf32>
    %455 = arith.addf %454, %317 : vector<8x128xf32>
    %456 = vector.extract_strided_slice %455 {offsets = [0, 0], sizes = [8, 32], strides = [1, 1]} : vector<8x128xf32> to vector<8x32xf32>
    %cst_156 = arith.constant 5.000000e-01 : f32
    %457 = vector.broadcast %cst_156 : f32 to vector<8x32xf32>
    %458 = arith.mulf %457, %456 : vector<8x32xf32>
    %459 = math.tanh %458 : vector<8x32xf32>
    %cst_157 = arith.constant 1.000000e+00 : f32
    %460 = vector.broadcast %cst_157 : f32 to vector<8x32xf32>
    %461 = arith.addf %459, %460 : vector<8x32xf32>
    %cst_158 = arith.constant 5.000000e-01 : f32
    %462 = vector.broadcast %cst_158 : f32 to vector<8x32xf32>
    %463 = arith.mulf %462, %461 : vector<8x32xf32>
    %464 = vector.extract_strided_slice %455 {offsets = [0, 32], sizes = [8, 32], strides = [1, 1]} : vector<8x128xf32> to vector<8x32xf32>
    %cst_159 = arith.constant 5.000000e-01 : f32
    %465 = vector.broadcast %cst_159 : f32 to vector<8x32xf32>
    %466 = arith.mulf %465, %464 : vector<8x32xf32>
    %467 = math.tanh %466 : vector<8x32xf32>
    %cst_160 = arith.constant 1.000000e+00 : f32
    %468 = vector.broadcast %cst_160 : f32 to vector<8x32xf32>
    %469 = arith.addf %467, %468 : vector<8x32xf32>
    %cst_161 = arith.constant 5.000000e-01 : f32
    %470 = vector.broadcast %cst_161 : f32 to vector<8x32xf32>
    %471 = arith.mulf %470, %469 : vector<8x32xf32>
    %472 = vector.extract_strided_slice %455 {offsets = [0, 64], sizes = [8, 32], strides = [1, 1]} : vector<8x128xf32> to vector<8x32xf32>
    %473 = math.tanh %472 : vector<8x32xf32>
    %474 = vector.extract_strided_slice %455 {offsets = [0, 96], sizes = [8, 32], strides = [1, 1]} : vector<8x128xf32> to vector<8x32xf32>
    %cst_162 = arith.constant 5.000000e-01 : f32
    %475 = vector.broadcast %cst_162 : f32 to vector<8x32xf32>
    %476 = arith.mulf %475, %474 : vector<8x32xf32>
    %477 = math.tanh %476 : vector<8x32xf32>
    %cst_163 = arith.constant 1.000000e+00 : f32
    %478 = vector.broadcast %cst_163 : f32 to vector<8x32xf32>
    %479 = arith.addf %477, %478 : vector<8x32xf32>
    %cst_164 = arith.constant 5.000000e-01 : f32
    %480 = vector.broadcast %cst_164 : f32 to vector<8x32xf32>
    %481 = arith.mulf %480, %479 : vector<8x32xf32>
    %482 = arith.mulf %471, %450 : vector<8x32xf32>
    %483 = arith.mulf %463, %473 : vector<8x32xf32>
    %484 = arith.addf %482, %483 : vector<8x32xf32>
    %485 = math.tanh %484 : vector<8x32xf32>
    %486 = arith.mulf %481, %485 : vector<8x32xf32>
    %c32 = arith.constant 32 : index
    %c0_165 = arith.constant 0 : index
    %487 = vector.load %arg6[%c32, %c0_165] : memref<64x32xf32, #tpu.memory_space<vmem>>, vector<8x32xf32>
    tpu.vector_store %arg6[%c32, %c0_165], %486 {strides = array<i32>} : memref<64x32xf32, #tpu.memory_space<vmem>>, vector<8x32xf32>,
    %cst_166 = arith.constant dense<0.000000e+00> : vector<8x128xf32>
    %488 = tpu.matmul %486, %312, %cst_166 {dimension_numbers = #tpu.dot_dimension_numbers<[1], [0], [0], [1], [0, 0, 1, 1], [], []>, precision = #tpu.contract_precision<fp32>} : vector<8x32xf32>, vector<32x128xf32>, vector<8x128xf32> -> vector<8x128xf32>
    %489 = arith.addf %488, %317 : vector<8x128xf32>
    %490 = vector.extract_strided_slice %489 {offsets = [0, 0], sizes = [8, 32], strides = [1, 1]} : vector<8x128xf32> to vector<8x32xf32>
    %cst_167 = arith.constant 5.000000e-01 : f32
    %491 = vector.broadcast %cst_167 : f32 to vector<8x32xf32>
    %492 = arith.mulf %491, %490 : vector<8x32xf32>
    %493 = math.tanh %492 : vector<8x32xf32>
    %cst_168 = arith.constant 1.000000e+00 : f32
    %494 = vector.broadcast %cst_168 : f32 to vector<8x32xf32>
    %495 = arith.addf %493, %494 : vector<8x32xf32>
    %cst_169 = arith.constant 5.000000e-01 : f32
    %496 = vector.broadcast %cst_169 : f32 to vector<8x32xf32>
    %497 = arith.mulf %496, %495 : vector<8x32xf32>
    %498 = vector.extract_strided_slice %489 {offsets = [0, 32], sizes = [8, 32], strides = [1, 1]} : vector<8x128xf32> to vector<8x32xf32>
    %cst_170 = arith.constant 5.000000e-01 : f32
    %499 = vector.broadcast %cst_170 : f32 to vector<8x32xf32>
    %500 = arith.mulf %499, %498 : vector<8x32xf32>
    %501 = math.tanh %500 : vector<8x32xf32>
    %cst_171 = arith.constant 1.000000e+00 : f32
    %502 = vector.broadcast %cst_171 : f32 to vector<8x32xf32>
    %503 = arith.addf %501, %502 : vector<8x32xf32>
    %cst_172 = arith.constant 5.000000e-01 : f32
    %504 = vector.broadcast %cst_172 : f32 to vector<8x32xf32>
    %505 = arith.mulf %504, %503 : vector<8x32xf32>
    %506 = vector.extract_strided_slice %489 {offsets = [0, 64], sizes = [8, 32], strides = [1, 1]} : vector<8x128xf32> to vector<8x32xf32>
    %507 = math.tanh %506 : vector<8x32xf32>
    %508 = vector.extract_strided_slice %489 {offsets = [0, 96], sizes = [8, 32], strides = [1, 1]} : vector<8x128xf32> to vector<8x32xf32>
    %cst_173 = arith.constant 5.000000e-01 : f32
    %509 = vector.broadcast %cst_173 : f32 to vector<8x32xf32>
    %510 = arith.mulf %509, %508 : vector<8x32xf32>
    %511 = math.tanh %510 : vector<8x32xf32>
    %cst_174 = arith.constant 1.000000e+00 : f32
    %512 = vector.broadcast %cst_174 : f32 to vector<8x32xf32>
    %513 = arith.addf %511, %512 : vector<8x32xf32>
    %cst_175 = arith.constant 5.000000e-01 : f32
    %514 = vector.broadcast %cst_175 : f32 to vector<8x32xf32>
    %515 = arith.mulf %514, %513 : vector<8x32xf32>
    %516 = arith.mulf %505, %484 : vector<8x32xf32>
    %517 = arith.mulf %497, %507 : vector<8x32xf32>
    %518 = arith.addf %516, %517 : vector<8x32xf32>
    %519 = math.tanh %518 : vector<8x32xf32>
    %520 = arith.mulf %515, %519 : vector<8x32xf32>
    %c40_176 = arith.constant 40 : index
    %c0_177 = arith.constant 0 : index
    %521 = vector.load %arg6[%c40_176, %c0_177] : memref<64x32xf32, #tpu.memory_space<vmem>>, vector<8x32xf32>
    tpu.vector_store %arg6[%c40_176, %c0_177], %520 {strides = array<i32>} : memref<64x32xf32, #tpu.memory_space<vmem>>, vector<8x32xf32>,
    %cst_178 = arith.constant dense<0.000000e+00> : vector<8x128xf32>
    %522 = tpu.matmul %520, %312, %cst_178 {dimension_numbers = #tpu.dot_dimension_numbers<[1], [0], [0], [1], [0, 0, 1, 1], [], []>, precision = #tpu.contract_precision<fp32>} : vector<8x32xf32>, vector<32x128xf32>, vector<8x128xf32> -> vector<8x128xf32>
    %523 = arith.addf %522, %317 : vector<8x128xf32>
    %524 = vector.extract_strided_slice %523 {offsets = [0, 0], sizes = [8, 32], strides = [1, 1]} : vector<8x128xf32> to vector<8x32xf32>
    %cst_179 = arith.constant 5.000000e-01 : f32
    %525 = vector.broadcast %cst_179 : f32 to vector<8x32xf32>
    %526 = arith.mulf %525, %524 : vector<8x32xf32>
    %527 = math.tanh %526 : vector<8x32xf32>
    %cst_180 = arith.constant 1.000000e+00 : f32
    %528 = vector.broadcast %cst_180 : f32 to vector<8x32xf32>
    %529 = arith.addf %527, %528 : vector<8x32xf32>
    %cst_181 = arith.constant 5.000000e-01 : f32
    %530 = vector.broadcast %cst_181 : f32 to vector<8x32xf32>
    %531 = arith.mulf %530, %529 : vector<8x32xf32>
    %532 = vector.extract_strided_slice %523 {offsets = [0, 32], sizes = [8, 32], strides = [1, 1]} : vector<8x128xf32> to vector<8x32xf32>
    %cst_182 = arith.constant 5.000000e-01 : f32
    %533 = vector.broadcast %cst_182 : f32 to vector<8x32xf32>
    %534 = arith.mulf %533, %532 : vector<8x32xf32>
    %535 = math.tanh %534 : vector<8x32xf32>
    %cst_183 = arith.constant 1.000000e+00 : f32
    %536 = vector.broadcast %cst_183 : f32 to vector<8x32xf32>
    %537 = arith.addf %535, %536 : vector<8x32xf32>
    %cst_184 = arith.constant 5.000000e-01 : f32
    %538 = vector.broadcast %cst_184 : f32 to vector<8x32xf32>
    %539 = arith.mulf %538, %537 : vector<8x32xf32>
    %540 = vector.extract_strided_slice %523 {offsets = [0, 64], sizes = [8, 32], strides = [1, 1]} : vector<8x128xf32> to vector<8x32xf32>
    %541 = math.tanh %540 : vector<8x32xf32>
    %542 = vector.extract_strided_slice %523 {offsets = [0, 96], sizes = [8, 32], strides = [1, 1]} : vector<8x128xf32> to vector<8x32xf32>
    %cst_185 = arith.constant 5.000000e-01 : f32
    %543 = vector.broadcast %cst_185 : f32 to vector<8x32xf32>
    %544 = arith.mulf %543, %542 : vector<8x32xf32>
    %545 = math.tanh %544 : vector<8x32xf32>
    %cst_186 = arith.constant 1.000000e+00 : f32
    %546 = vector.broadcast %cst_186 : f32 to vector<8x32xf32>
    %547 = arith.addf %545, %546 : vector<8x32xf32>
    %cst_187 = arith.constant 5.000000e-01 : f32
    %548 = vector.broadcast %cst_187 : f32 to vector<8x32xf32>
    %549 = arith.mulf %548, %547 : vector<8x32xf32>
    %550 = arith.mulf %539, %518 : vector<8x32xf32>
    %551 = arith.mulf %531, %541 : vector<8x32xf32>
    %552 = arith.addf %550, %551 : vector<8x32xf32>
    %553 = math.tanh %552 : vector<8x32xf32>
    %554 = arith.mulf %549, %553 : vector<8x32xf32>
    %c48_188 = arith.constant 48 : index
    %c0_189 = arith.constant 0 : index
    %555 = vector.load %arg6[%c48_188, %c0_189] : memref<64x32xf32, #tpu.memory_space<vmem>>, vector<8x32xf32>
    tpu.vector_store %arg6[%c48_188, %c0_189], %554 {strides = array<i32>} : memref<64x32xf32, #tpu.memory_space<vmem>>, vector<8x32xf32>,
    %cst_190 = arith.constant dense<0.000000e+00> : vector<8x128xf32>
    %556 = tpu.matmul %554, %312, %cst_190 {dimension_numbers = #tpu.dot_dimension_numbers<[1], [0], [0], [1], [0, 0, 1, 1], [], []>, precision = #tpu.contract_precision<fp32>} : vector<8x32xf32>, vector<32x128xf32>, vector<8x128xf32> -> vector<8x128xf32>
    %557 = arith.addf %556, %317 : vector<8x128xf32>
    %558 = vector.extract_strided_slice %557 {offsets = [0, 0], sizes = [8, 32], strides = [1, 1]} : vector<8x128xf32> to vector<8x32xf32>
    %cst_191 = arith.constant 5.000000e-01 : f32
    %559 = vector.broadcast %cst_191 : f32 to vector<8x32xf32>
    %560 = arith.mulf %559, %558 : vector<8x32xf32>
    %561 = math.tanh %560 : vector<8x32xf32>
    %cst_192 = arith.constant 1.000000e+00 : f32
    %562 = vector.broadcast %cst_192 : f32 to vector<8x32xf32>
    %563 = arith.addf %561, %562 : vector<8x32xf32>
    %cst_193 = arith.constant 5.000000e-01 : f32
    %564 = vector.broadcast %cst_193 : f32 to vector<8x32xf32>
    %565 = arith.mulf %564, %563 : vector<8x32xf32>
    %566 = vector.extract_strided_slice %557 {offsets = [0, 32], sizes = [8, 32], strides = [1, 1]} : vector<8x128xf32> to vector<8x32xf32>
    %cst_194 = arith.constant 5.000000e-01 : f32
    %567 = vector.broadcast %cst_194 : f32 to vector<8x32xf32>
    %568 = arith.mulf %567, %566 : vector<8x32xf32>
    %569 = math.tanh %568 : vector<8x32xf32>
    %cst_195 = arith.constant 1.000000e+00 : f32
    %570 = vector.broadcast %cst_195 : f32 to vector<8x32xf32>
    %571 = arith.addf %569, %570 : vector<8x32xf32>
    %cst_196 = arith.constant 5.000000e-01 : f32
    %572 = vector.broadcast %cst_196 : f32 to vector<8x32xf32>
    %573 = arith.mulf %572, %571 : vector<8x32xf32>
    %574 = vector.extract_strided_slice %557 {offsets = [0, 64], sizes = [8, 32], strides = [1, 1]} : vector<8x128xf32> to vector<8x32xf32>
    %575 = math.tanh %574 : vector<8x32xf32>
    %576 = vector.extract_strided_slice %557 {offsets = [0, 96], sizes = [8, 32], strides = [1, 1]} : vector<8x128xf32> to vector<8x32xf32>
    %cst_197 = arith.constant 5.000000e-01 : f32
    %577 = vector.broadcast %cst_197 : f32 to vector<8x32xf32>
    %578 = arith.mulf %577, %576 : vector<8x32xf32>
    %579 = math.tanh %578 : vector<8x32xf32>
    %cst_198 = arith.constant 1.000000e+00 : f32
    %580 = vector.broadcast %cst_198 : f32 to vector<8x32xf32>
    %581 = arith.addf %579, %580 : vector<8x32xf32>
    %cst_199 = arith.constant 5.000000e-01 : f32
    %582 = vector.broadcast %cst_199 : f32 to vector<8x32xf32>
    %583 = arith.mulf %582, %581 : vector<8x32xf32>
    %584 = arith.mulf %573, %552 : vector<8x32xf32>
    %585 = arith.mulf %565, %575 : vector<8x32xf32>
    %586 = arith.addf %584, %585 : vector<8x32xf32>
    %587 = math.tanh %586 : vector<8x32xf32>
    %588 = arith.mulf %583, %587 : vector<8x32xf32>
    %c56 = arith.constant 56 : index
    %c0_200 = arith.constant 0 : index
    %589 = vector.load %arg6[%c56, %c0_200] : memref<64x32xf32, #tpu.memory_space<vmem>>, vector<8x32xf32>
    tpu.vector_store %arg6[%c56, %c0_200], %588 {strides = array<i32>} : memref<64x32xf32, #tpu.memory_space<vmem>>, vector<8x32xf32>,
    %c0_201 = arith.constant 0 : index
    %c0_202 = arith.constant 0 : index
    %590 = vector.load %arg6[%c0_201, %c0_202] : memref<64x32xf32, #tpu.memory_space<vmem>>, vector<64x32xf32>
    %c248 = arith.constant 248 : index
    %c0_203 = arith.constant 0 : index
    %591 = vector.load %arg2[%c248, %c0_203] : memref<288x128xf32, #tpu.memory_space<vmem>>, vector<32x128xf32>
    %cst_204 = arith.constant dense<0.000000e+00> : vector<64x128xf32>
    %592 = tpu.matmul %590, %591, %cst_204 {dimension_numbers = #tpu.dot_dimension_numbers<[1], [0], [0], [1], [0, 0, 1, 1], [], []>, precision = #tpu.contract_precision<fp32>} : vector<64x32xf32>, vector<32x128xf32>, vector<64x128xf32> -> vector<64x128xf32>
    %c280 = arith.constant 280 : index
    %c0_205 = arith.constant 0 : index
    %593 = vector.load %arg2[%c280, %c0_205] : memref<288x128xf32, #tpu.memory_space<vmem>>, vector<1x128xf32>
    %594 = vector.broadcast %593 : vector<1x128xf32> to vector<64x128xf32>
    %595 = arith.addf %592, %594 : vector<64x128xf32>
    %c0_206 = arith.constant 0 : index
    %c0_207 = arith.constant 0 : index
    %596 = vector.load %arg3[%c0_206, %c0_207] : memref<64x128xf32, #tpu.memory_space<vmem>>, vector<64x128xf32>
    tpu.vector_store %arg3[%c0_206, %c0_207], %595 {strides = array<i32>} : memref<64x128xf32, #tpu.memory_space<vmem>>, vector<64x128xf32>,
    %c0_208 = arith.constant 0 : index
    %c0_209 = arith.constant 0 : index
    %597 = vector.load %arg4[%c0_208, %c0_209] : memref<8x16xf32, #tpu.memory_space<vmem>>, vector<8x16xf32>
    tpu.vector_store %arg4[%c0_208, %c0_209], %286 {strides = array<i32>} : memref<8x16xf32, #tpu.memory_space<vmem>>, vector<8x16xf32>,
    %c0_210 = arith.constant 0 : index
    %c0_211 = arith.constant 0 : index
    %598 = vector.load %arg5[%c0_210, %c0_211] : memref<8x16xf32, #tpu.memory_space<vmem>>, vector<8x16xf32>
    tpu.vector_store %arg5[%c0_210, %c0_211], %291 {strides = array<i32>} : memref<8x16xf32, #tpu.memory_space<vmem>>, vector<8x16xf32>,
    return
  }
}

</mosaic_0001>

<bundles_post_ra>
// kernel: tpu_custom_call.1
= control target key start
LH: loop header
LB: loop body
LE: loop exit
PB: predicated region body
PF: predicated region fallthrough
CT: control target
= control target key end

     0   :  { %11 = vsyncpa [#allocation4], 0  ;;  %s6659_s0 = inlined_call_operand.vmem [shape: f32[64,4], index: 0, kind: input, shape index: {}]   ;;  %s6660_s1 = inlined_call_operand.vmem [shape: f32[8,16], index: 1, kind: input, shape index: {}]   ;;  %s6661_s2 = inlined_call_operand.hbm [shape: f32[288,128], index: 2, kind: input, shape index: {}]   ;;  %s6662_s3 = inlined_call_operand.hbm [shape: f32[64,128], index: 3, kind: output, shape index: {0}]   ;;  %s6663_s4 = inlined_call_operand.hbm [shape: f32[8,16], index: 4, kind: output, shape index: {1}]   ;;  %s6664_s5 = inlined_call_operand.hbm [shape: f32[8,16], index: 5, kind: output, shape index: {2}]  }
   0x1   :  { %12 = vsyncpa [#allocation5], 0 }
   0x2   :  { %13 = vsyncpa [#allocation8], 0  ;;  %s22_s20 = sshll.u32 %s6661_s2, 4  ;;  %s5619_s21 = smov [#allocation3]   ;;  %s23_s20 = int_to_ptr.hbm [resolvable:$true] %s22_s20 }
   0x3   :  { %s24_s22 = sshll.u32 %s5619_s21, 4  ;;  %s5620_s23 = smov 128   ;;  %s25_s22 = int_to_ptr.vmem [resolvable:$true] %s24_s22 }
   0x4   :  { %s5621_s24 = smov 8  }
   0x5   :  { %30 = dma.hbm_to_vmem [thread:$0]  %s23_s20, 4608, %s25_s22, [#allocation4], %s5620_s23, %s5620_s23, %s5621_s24  }
   0x6   :  { %5613 = dma.done.wait [#allocation4], 4608  }
   0x7   :  { %5614 = vsyncadd [#allocation4], 4294962688  ;;  %vm76_vm0 = vcmask 1043456   ;;  %vm51_vm1 = vcmask 31744   ;;  %v48_v0 = vld [vmem:[#allocation3] sm:$0xf] }
   0x8   :  { %v39_v1 = vld [vmem:[%s6659_s0 + $0x20] sm:$0xff]  ;;  %v40_v2 = vld [vmem:[%s6659_s0 + $0x28] sm:$0xff]  ;;  %v78_v3 = vsel %vm76_vm0, %v48_v0, 0  ;;  %v41_v12 = vld [vmem:[%s6659_s0 + $0x30] sm:$0xff]  ;;  %s5624_s15 = smov 32   ;;  %vm443_vm2 = vcmask 261120  }
   0x9   :  { %v65_v4 = vsel %vm51_vm1, %v39_v1, 0  ;;  %v68_v5 = vsel %vm51_vm1, %v40_v2, 0  ;;  %v35_v6 = vld [vmem:[%s6659_s0] sm:$0xff]  ;;  %v36_v7 = vld [vmem:[%s6659_s0 + $0x8] sm:$0xff]  ;;  %v95_v8 = vand.u32 4294901760, %v78_v3  ;;  %v37_v15 = vld [vmem:[%s6659_s0 + $0x10] sm:$0xff] }
   0xa   :  { %v5679_v9 = vand.u32 4294901760, %v65_v4  ;;  %v5681_v10 = vand.u32 4294901760, %v68_v5  ;;  %v53_v11 = vsel %vm51_vm1, %v35_v6, 0  ;;  %v56_v14 = vsel %vm51_vm1, %v36_v7, 0  ;;  %v42_v36 = vld [vmem:[%s6659_s0 + $0x38] sm:$0xff]  ;;  %v47_v41 = vld [vmem:[#allocation3 + $0x20] sm:$0xff] }
   0xb   :  { %v5687_v13 = vand.u32 4294901760, %v53_v11  ;;  %5399 = vmatpush.msra.mxu2 %v95_v8  ;;  %v178_v17 = vsub.f32 %v78_v3, %v95_v8  ;;  %96 = vmatpush.msra.mxu0 %v95_v8  ;;  %v71_v20 = vsel %vm51_vm1, %v41_v12, 0  ;;  %v5703_v21 = vand.u32 4294901760, %v56_v14  ;;  %v38_v38 = vld [vmem:[%s6659_s0 + $0x18] sm:$0xff]  ;;  %s5623_s0 = smov 64   ;;  %s5369_s21 = sshll.u32 %s6663_s4, 4  ;;  %s5370_s21 = int_to_ptr.hbm [resolvable:$true] %s5369_s21 }
   0xc   :  { %v5694_v16 = vsub.f32 %v65_v4, %v5679_v9  ;;  %v5697_v18 = vsub.f32 %v68_v5, %v5681_v10  ;;  %v59_v24 = vsel %vm51_vm1, %v37_v15, 0  ;;  %v5715_v30 = vand.u32 4294901760, %v71_v20  ;;  %v46_v2 = vld [vmem:[#allocation3 + $0x18] sm:$0xff]  ;;  %s5626_s22 = smov [#allocation9]   ;;  %s5380_s27 = sshll.u32 %s6664_s5, 4  ;;  %s5381_s27 = int_to_ptr.hbm [resolvable:$true] %s5380_s27 }
   0xd   :  { %v5700_v19 = vsub.f32 %v53_v11, %v5687_v13  ;;  %233 = vmatpush.msrb.mxu2 %v178_v17  ;;  %v179_v23 = vand.u32 4294901760, %v178_v17  ;;  %v5709_v26 = vsub.f32 %v56_v14, %v5703_v21  ;;  %v5721_v33 = vand.u32 4294901760, %v59_v24  ;;  %v45_v14 = vld [vmem:[#allocation3 + $0x10] sm:$0xff]  ;;  %s5378_s25 = sshll.u32 %s5626_s22, 4  ;;  %s5627_s4 = smov [#allocation6]   ;;  %s5379_s25 = int_to_ptr.vmem [resolvable:$true] %s5378_s25 }
   0xe   :  { %v131_v22 = vand.u32 4294901760, %v5694_v16  ;;  %v139_v29 = vand.u32 4294901760, %v5697_v18  ;;  %v5733_v40 = vsub.f32 %v71_v20, %v5715_v30  ;;  %v74_v43 = vsel %vm51_vm1, %v42_v36, 0  ;;  %s5353_s5 = sshll.u32 %s5627_s4, 4  ;;  %s5355_s30 = sshll.u32 %s6662_s3, 4  ;;  %s5354_s5 = int_to_ptr.vmem [resolvable:$true] %s5353_s5  ;;  %s5356_s30 = int_to_ptr.hbm [resolvable:$true] %s5355_s30 }
   0xf   :  { %v99_v25 = vand.u32 4294901760, %v5700_v19  ;;  %v180_v28 = vsub.f32 %v178_v17, %v179_v23  ;;  %359 = vmatpush.msrb.mxu0 %v179_v23  ;;  %v107_v32 = vand.u32 4294901760, %v5709_v26  ;;  %v5741_v44 = vsub.f32 %v59_v24, %v5721_v33  ;;  %v44_v23 = vld [vmem:[#allocation3 + $0x8] sm:$0xff] }
  0x10   :  { %v132_v27 = vsub.f32 %v5694_v16, %v131_v22  ;;  %v140_v39 = vsub.f32 %v5697_v18, %v139_v29  ;;  %v5743_v45 = vand.u32 4294901760, %v47_v41  ;;  %v62_v46 = vsel %vm51_vm1, %v38_v38, 0 }
  0x11   :  { %v100_v31 = vsub.f32 %v5700_v19, %v99_v25  ;;  %v181_v35 = vand.u32 4294901760, %v180_v28  ;;  %v108_v42 = vsub.f32 %v5709_v26, %v107_v32  ;;  %v147_v49 = vand.u32 4294901760, %v5733_v40 }
  0x12   :  { %v133_v34 = vand.u32 4294901760, %v132_v27  ;;  %v5749_v47 = vsub.f32 %v47_v41, %v5743_v45  ;;  %v141_v48 = vand.u32 4294901760, %v140_v39  ;;  %v5752_v50 = vand.u32 4294901760, %v74_v43 }
  0x13   :  { %v101_v37 = vand.u32 4294901760, %v100_v31  ;;  %5400 = vmatpush.msra.mxu3 %v181_v35  ;;  %182 = vmatpush.msra.mxu1 %v181_v35  ;;  %v109_v51 = vand.u32 4294901760, %v108_v42  ;;  %v115_v52 = vand.u32 4294901760, %v5741_v44  ;;  %v5755_v53 = vand.u32 4294901760, %v62_v46 }
  0x14   :  { %134 = vmatmul.f32.vlgmr.msra.gmra.mxu2 %v133_v34  ;;  %200 = vmatmul.f32.vlgmr.msra.gmra.mxu3 %v5679_v9  ;;  %v5758_v54 = vand.u32 4294901760, %v5749_v47  ;;  %v148_v56 = vsub.f32 %v5733_v40, %v147_v49  ;;  %v5768_v57 = vsub.f32 %v74_v43, %v5752_v50  ;;  %v5786_v4 = vand.u32 4294901760, %v46_v2 }
  0x15   :  { %102 = vmatmul.f32.vlgmr.msra.gmra.mxu0 %v101_v37  ;;  %291 = vmatpush.msrb.mxu3 %v95_v8  ;;  %v116_v58 = vsub.f32 %v5741_v44, %v115_v52  ;;  %v5773_v59 = vsub.f32 %v62_v46, %v5755_v53  ;;  %v5809_v15 = vand.u32 4294901760, %v45_v14  ;;  %v5833_v24 = vand.u32 4294901760, %v44_v23 }
  0x16   :  { %184 = vmatmul.f32.vlgmr.msra.gmra.mxu1 %v5687_v13  ;;  %460 = vmatpush.msra.mxu2 %v5743_v45  ;;  %v491_v55 = vsub.f32 %v5749_v47, %v5758_v54  ;;  %v149_v61 = vand.u32 4294901760, %v148_v56  ;;  %v155_v62 = vand.u32 4294901760, %v5768_v57  ;;  %v5791_v5 = vsub.f32 %v46_v2, %v5786_v4 }
  0x17   :  { %409 = vmatpush.msrb.mxu1 %v95_v8  ;;  %1013 = vmatpush.msra.mxu0 %v5758_v54  ;;  %v117_v63 = vand.u32 4294901760, %v116_v58  ;;  %v123_v0 = vand.u32 4294901760, %v5773_v59  ;;  %v5814_v17 = vsub.f32 %v45_v14, %v5809_v15  ;;  %vm2534_vm3 = vcmask 130048  }
  0x18   :  { %v5775_v60 = vand.u32 4294901760, %v491_v55  ;;  %v156_v1 = vsub.f32 %v5768_v57, %v155_v62  ;;  %462 = vmatpush.msra.mxu2 %v5786_v4  ;;  %v5795_v8 = vand.u32 4294901760, %v5791_v5 }
  0x19   :  { %1044 = vmatpush.msra.mxu1 %v5743_v45  ;;  %v124_v3 = vsub.f32 %v5773_v59, %v123_v0  ;;  %v5818_v20 = vand.u32 4294901760, %v5814_v17 }
  0x1a   :  { %493 = vmatpush.msra.mxu3 %v5775_v60  ;;  %v157_v6 = vand.u32 4294901760, %v156_v1  ;;  %v497_v11 = vsub.f32 %v5791_v5, %v5795_v8  ;;  %1017 = vmatpush.msra.mxu0 %v5795_v8 }
  0x1b   :  { %1046 = vmatpush.msra.mxu1 %v5786_v4  ;;  %v125_v7 = vand.u32 4294901760, %v124_v3  ;;  %464 = vmatpush.msra.mxu2 %v5809_v15 }
  0x1c   :  { %142 = vmatmul.f32.gmra.mxu2 %v141_v48  ;;  %204 = vmatmul.f32.gmra.mxu3 %v5681_v10  ;;  %v5801_v12 = vand.u32 4294901760, %v497_v11 }
  0x1d   :  { %110 = vmatmul.f32.gmra.mxu0 %v109_v51  ;;  %1048 = vmatpush.msra.mxu1 %v5809_v15 }
  0x1e   :  { %188 = vmatmul.f32.gmra.mxu1 %v5703_v21  ;;  %499 = vmatpush.msra.mxu3 %v5801_v12 }
  0x1f   :  { %1021 = vmatpush.msra.mxu0 %v5818_v20  ;;  %466 = vmatpush.msra.mxu2 %v5833_v24 }
  0x20   :  { %1050 = vmatpush.msra.mxu1 %v5833_v24 }
  0x24   :  { %150 = vmatmul.f32.gmra.mxu2 %v149_v61  ;;  %208 = vmatmul.f32.gmra.mxu3 %v5715_v30 }
  0x25   :  { %118 = vmatmul.f32.gmra.mxu0 %v117_v63 }
  0x26   :  { %192 = vmatmul.f32.gmra.mxu1 %v5721_v33 }
  0x2c   :  { %158 = vmatmul.f32.gmra.mxu2 %v157_v6  ;;  %212 = vmatmul.f32.gmra.mxu3 %v5752_v50 }
  0x2d   :  { %126 = vmatmul.f32.gmra.mxu0 %v125_v7 }
  0x2e   :  { %196 = vmatmul.f32.gmra.mxu1 %v5755_v53 }
  0x34   :  { %236 = vmatmul.f32.vlgmr.msrb.gmra.mxu2 %v5700_v19  ;;  %295 = vmatmul.f32.vlgmr.msrb.gmra.mxu3 %v99_v25  ;;  %v503_v19 = vsub.f32 %v5814_v17, %v5818_v20  ;;  %v5838_v25 = vsub.f32 %v44_v23, %v5833_v24 }
  0x35   :  { %361 = vmatmul.f32.vlgmr.msrb.gmra.mxu0 %v5687_v13  ;;  %531 = vmatpush.msrb.mxu2 %v5749_v47 }
  0x36   :  { %411 = vmatmul.f32.vlgmr.msrb.gmra.mxu1 %v5687_v13  ;;  %v5827_v13 = vand.u32 4294901760, %v503_v19 }
  0x37   :  { %1196 = vmatpush.msrb.mxu1 %v5743_v45  ;;  %534 = vmatpush.msrb.mxu2 %v5791_v5 }
  0x38   :  { %505 = vmatpush.msra.mxu3 %v5827_v13 }
  0x39   :  { %1198 = vmatpush.msrb.mxu1 %v5786_v4  ;;  %537 = vmatpush.msrb.mxu2 %v5814_v17 }
  0x3b   :  { %540 = vmatpush.msrb.mxu2 %v5838_v25  ;;  %1200 = vmatpush.msrb.mxu1 %v5809_v15 }
  0x3c   :  { %241 = vmatmul.f32.gmra.mxu2 %v5709_v26  ;;  %301 = vmatmul.f32.gmra.mxu3 %v107_v32 }
  0x3d   :  { %365 = vmatmul.f32.gmra.mxu0 %v5703_v21  ;;  %1202 = vmatpush.msrb.mxu1 %v5833_v24 }
  0x3e   :  { %415 = vmatmul.f32.gmra.mxu1 %v5703_v21  ;;  %v5843_v21 = vand.u32 4294901760, %v5838_v25 }
  0x40   :  { %v509_v26 = vsub.f32 %v5838_v25, %v5843_v21  ;;  %1025 = vmatpush.msra.mxu0 %v5843_v21 }
  0x42   :  { %1167 = vmatpush.msrb.mxu0 %v5749_v47  ;;  %v5854_v27 = vand.u32 4294901760, %v509_v26 }
  0x44   :  { %246 = vmatmul.f32.gmra.mxu2 %v5741_v44  ;;  %307 = vmatmul.f32.gmra.mxu3 %v115_v52  ;;  %v5957_v52 = vld [vmem:[#allocation3 + $0x28] ss:$0 sm:$0xff] }
  0x45   :  { %369 = vmatmul.f32.gmra.mxu0 %v5721_v33  ;;  %511 = vmatpush.msra.mxu3 %v5854_v27 }
  0x46   :  { %419 = vmatmul.f32.gmra.mxu1 %v5721_v33  ;;  %1170 = vmatpush.msrb.mxu0 %v5791_v5 }
  0x47   :  { %560 = vmatpush.msrb.mxu3 %v5743_v45 }
  0x48   :  { %1173 = vmatpush.msrb.mxu0 %v5814_v17 }
  0x49   :  { %562 = vmatpush.msrb.mxu3 %v5786_v4 }
  0x4a   :  { %1176 = vmatpush.msrb.mxu0 %v5838_v25 }
  0x4b   :  { %564 = vmatpush.msrb.mxu3 %v5809_v15 }
  0x4c   :  { %251 = vmatmul.f32.gmra.mxu2 %v5773_v59  ;;  %313 = vmatmul.f32.gmra.mxu3 %v123_v0 }
  0x4d   :  { %373 = vmatmul.f32.gmra.mxu0 %v5755_v53  ;;  %566 = vmatpush.msrb.mxu3 %v5833_v24 }
  0x4e   :  { %423 = vmatmul.f32.gmra.mxu1 %v5755_v53 }
  0x54   :  { %256 = vmatmul.f32.gmra.mxu2 %v5694_v16  ;;  %319 = vmatmul.f32.gmra.mxu3 %v131_v22 }
  0x55   :  { %377 = vmatmul.f32.gmra.mxu0 %v5679_v9 }
  0x56   :  { %427 = vmatmul.f32.gmra.mxu1 %v5679_v9  ;;  %v5622_v9 = vmov 0.0  }
  0x5c   :  { %261 = vmatmul.f32.gmra.mxu2 %v5697_v18  ;;  %325 = vmatmul.f32.gmra.mxu3 %v139_v29 }
  0x5d   :  { %381 = vmatmul.f32.gmra.mxu0 %v5681_v10 }
  0x5e   :  { %431 = vmatmul.f32.gmra.mxu1 %v5681_v10 }
  0x64   :  { %266 = vmatmul.f32.gmra.mxu2 %v5733_v40  ;;  %331 = vmatmul.f32.gmra.mxu3 %v147_v49 }
  0x65   :  { %385 = vmatmul.f32.gmra.mxu0 %v5715_v30 }
  0x66   :  { %435 = vmatmul.f32.gmra.mxu1 %v5715_v30 }
  0x6c   :  { %271 = vmatmul.f32.gmra.mxu2 %v5768_v57  ;;  %337 = vmatmul.f32.gmra.mxu3 %v155_v62 }
  0x6d   :  { %389 = vmatmul.f32.gmra.mxu0 %v5752_v50 }
  0x6e   :  { %439 = vmatmul.f32.gmra.mxu1 %v5752_v50 }
  0x74   :  { %472 = vmatmul.f32.vlgmr.msra.gmra.mxu2 %v5622_v9  ;;  %513 = vmatmul.f32.vlgmr.msra.gmra.mxu3 %v5622_v9 }
  0x75   :  { %589 = vmatpush.msra.mxu2 %v5758_v54  ;;  %620 = vmatpush.msra.mxu3 %v5743_v45 }
  0x77   :  { %593 = vmatpush.msra.mxu2 %v5795_v8  ;;  %622 = vmatpush.msra.mxu3 %v5786_v4 }
  0x79   :  { %597 = vmatpush.msra.mxu2 %v5818_v20  ;;  %624 = vmatpush.msra.mxu3 %v5809_v15 }
  0x7b   :  { %601 = vmatpush.msra.mxu2 %v5843_v21  ;;  %626 = vmatpush.msra.mxu3 %v5833_v24 }
  0x7c   :  { %543 = vmatmul.f32.vlgmr.msrb.gmra.mxu2 %v5622_v9  ;;  %570 = vmatmul.f32.vlgmr.msrb.gmra.mxu3 %v5622_v9 }
  0x7d   :  { %672 = vmatpush.msrb.mxu2 %v5743_v45  ;;  %705 = vmatpush.msrb.mxu3 %v5775_v60 }
  0x7f   :  { %674 = vmatpush.msrb.mxu2 %v5786_v4  ;;  %711 = vmatpush.msrb.mxu3 %v5801_v12 }
  0x81   :  { %676 = vmatpush.msrb.mxu2 %v5809_v15  ;;  %717 = vmatpush.msrb.mxu3 %v5827_v13 }
  0x83   :  { %678 = vmatpush.msrb.mxu2 %v5833_v24  ;;  %723 = vmatpush.msrb.mxu3 %v5854_v27 }
  0x84   :  { %603 = vmatmul.f32.vlgmr.msra.gmra.mxu2 %v5622_v9  ;;  %628 = vmatmul.f32.vlgmr.msra.gmra.mxu3 %v5622_v9 }
  0x85   :  { %743 = vmatpush.msra.mxu2 %v5749_v47  ;;  %772 = vmatpush.msra.mxu3 %v5743_v45 }
  0x87   :  { %746 = vmatpush.msra.mxu2 %v5791_v5  ;;  %774 = vmatpush.msra.mxu3 %v5786_v4 }
  0x89   :  { %749 = vmatpush.msra.mxu2 %v5814_v17  ;;  %776 = vmatpush.msra.mxu3 %v5809_v15 }
  0x8b   :  { %752 = vmatpush.msra.mxu2 %v5838_v25  ;;  %778 = vmatpush.msra.mxu3 %v5833_v24 }
  0x92   :  { %v103_v38 = vpop.f32.mrf.mxu0 }
  0x93   :  { %v185_v39 = vpop.f32.mrf.mxu1  ;;  %v104_v53 = vadd.f32 %v5957_v52, %v103_v38 }
  0x95   :  { %v186_v58 = vadd.f32 %v185_v39, %v104_v53 }
  0x97   :  { %v5913_v10 = vpop.f32.mrf.mxu2  ;;  %v5915_v16 = vpop.f32.mrf.mxu3 }
  0x9a   :  { %v5941_v42 = vpop.f32.mrf.mxu0 }
  0x9b   :  { %v5947_v46 = vpop.f32.mrf.mxu1 }
  0x9f   :  { %v5917_v18 = vpop.f32.mrf.mxu2  ;;  %v5919_v22 = vpop.f32.mrf.mxu3 }
  0xa2   :  { %v5949_v48 = vpop.f32.mrf.mxu0 }
  0xa3   :  { %v5955_v51 = vpop.f32.mrf.mxu1 }
  0xa7   :  { %v5921_v28 = vpop.f32.mrf.mxu2  ;;  %v5923_v29 = vpop.f32.mrf.mxu3 }
  0xaa   :  { %v5964_v57 = vpop.f32.mrf.mxu0 }
  0xab   :  { %v5966_v59 = vpop.f32.mrf.mxu1 }
  0xaf   :  { %v5925_v30 = vpop.f32.mrf.mxu2  ;;  %v5927_v31 = vpop.f32.mrf.mxu3 }
  0xb2   :  { %v362_v1 = vpop.f32.mrf.mxu0 }
  0xb3   :  { %v412_v3 = vpop.f32.mrf.mxu1 }
  0xb7   :  { %v237_v32 = vpop.f32.mrf.mxu2  ;;  %v296_v33 = vpop.f32.mrf.mxu3 }
  0xb8   :  { %v238_v61 = vadd.f32 %v237_v32, %v186_v58 }
  0xba   :  { %v297_v0 = vadd.f32 %v296_v33, %v238_v61 }
  0xbc   :  { %v363_v2 = vadd.f32 %v362_v1, %v297_v0 }
  0xbe   :  { %v413_v11 = vadd.f32 %v412_v3, %v363_v2 }
  0xbf   :  { %v5929_v34 = vpop.f32.mrf.mxu2  ;;  %v5931_v35 = vpop.f32.mrf.mxu3 }
  0xc7   :  { %v5933_v36 = vpop.f32.mrf.mxu2  ;;  %v5935_v37 = vpop.f32.mrf.mxu3 }
  0xcf   :  { %v5937_v40 = vpop.f32.mrf.mxu2  ;;  %v5939_v41 = vpop.f32.mrf.mxu3 }
  0xd7   :  { %v5943_v43 = vpop.f32.mrf.mxu2  ;;  %v5945_v44 = vpop.f32.mrf.mxu3 }
  0xdf   :  { %v5951_v49 = vpop.f32.mrf.mxu2  ;;  %v5953_v50 = vpop.f32.mrf.mxu3 }
  0xe7   :  { %v5960_v55 = vpop.f32.mrf.mxu2  ;;  %v5962_v56 = vpop.f32.mrf.mxu3 }
  0xef   :  { %v5968_v62 = vpop.f32.mrf.mxu2  ;;  %v5970_v63 = vpop.f32.mrf.mxu3 }
  0xf0   :  { %6665 = vst [vmem:[#allocation13_spill] sm:$0xff] %v5968_v62 }
  0xf1   :  { %6666 = vst [vmem:[#allocation14_spill] sm:$0xff] %v5970_v63 }
  0xf7   :  { %v473_v6 = vpop.f32.mrf.mxu2  ;;  %v514_v7 = vpop.f32.mrf.mxu3 }
  0xf8   :  { %v474_v14 = vadd.f32 %v473_v6, %v413_v11 }
  0xfa   :  { %v515_v23 = vadd.f32 %v514_v7, %v474_v14 }
  0xff   :  { %v544_v19 = vpop.f32.mrf.mxu2  ;;  %v571_v26 = vpop.f32.mrf.mxu3 }
 0x100   :  { %v545_v9 = vadd.f32 %v544_v19, %v515_v23 }
 0x102   :  { %v572_v38 = vadd.f32 %v571_v26, %v545_v9 }
 0x107   :  { %v604_v39 = vpop.f32.mrf.mxu2  ;;  %v629_v32 = vpop.f32.mrf.mxu3 }
 0x108   :  { %v605_v53 = vadd.f32 %v604_v39, %v572_v38 }
 0x10a   :  { %v630_v58 = vadd.f32 %v629_v32, %v605_v53 }
 0x10c   :  { %5418 = vtanh.f32 %v630_v58  ;;  %v632_v33 = vmul.f32 0.5, %v630_v58  ;;  %v112_v58 = vadd.f32 %v5957_v52, %v5941_v42 }
 0x10e   :  { %5420 = vtanh.f32 %v632_v33  ;;  %v190_v33 = vadd.f32 %v5947_v46, %v112_v58 }
 0x112   :  { %v5419_v62 = vpop.eup %5418 }
 0x113   :  { %639 = vrot.lane.b32.xlu0 %v5419_v62, %s5623_s0 }
 0x114   :  { %v5421_v61 = vpop.eup %5420 }
 0x115   :  { %v634_v0 = vadd.f32 1.0, %v5421_v61  ;;  %v243_v61 = vadd.f32 %v5929_v34, %v190_v33 }
 0x117   :  { %v635_v1 = vmul.f32 0.5, %v634_v0  ;;  %v303_v0 = vadd.f32 %v5931_v35, %v243_v61 }
 0x119   :  { %v637_v6 = vmul.f32 0.0, %v635_v1 }
 0x185   :  { %v640_v2 = vpop.permute.xlu0 %639 }
 0x186   :  { %v642_v3 = vmul.f32 %v640_v2, %v635_v1 }
 0x188   :  { %644 = vrot.lane.b32.xlu0 %v642_v3, %s5624_s15 }
 0x1fa   :  { %v645_v7 = vpop.permute.xlu0 %644 }
 0x1fb   :  { %v5974_v11 = vadd.f32 %v645_v7, %v637_v6  ;;  %v416_v6 = vpop.f32.mrf.mxu1 }
 0x1fd   :  { %5422 = vtanh.f32 %v5974_v11 }
 0x203   :  { %v5423_v14 = vpop.eup %5422 }
 0x204   :  { %650 = vrot.lane.b32.xlu1 %v5423_v14, %s5623_s0 }
 0x276   :  { %v651_v62 = vpop.permute.xlu1 %650 }
 0x277   :  { %v653_v19 = vmul.f32 %v651_v62, %v635_v1  ;;  %v366_v1 = vpop.f32.mrf.mxu0 }
 0x278   :  { %v367_v3 = vadd.f32 %v366_v1, %v303_v0 }
 0x279   :  { %655 = vrot.lane.b32.xlu1 %v653_v19, %s5624_s15 }
 0x27a   :  { %v417_v14 = vadd.f32 %v416_v6, %v367_v3 }
 0x2eb   :  { %v656_v23 = vpop.permute.xlu1 %655 }
 0x2ec   :  { %v657_v26 = vsel %vm443_vm2, %v656_v23, 0 }
 0x2ed   :  { %v679_v9 = vand.u32 4294901760, %v657_v26 }
 0x2ef   :  { %v680_v38 = vsub.f32 %v657_v26, %v679_v9  ;;  %725 = vmatmul.f32.vlgmr.msrb.gmra.mxu3 %v679_v9 }
 0x2f0   :  { %832 = vmatpush.msrb.mxu3 %v5743_v45 }
 0x2f1   :  { %v681_v39 = vand.u32 4294901760, %v680_v38 }
 0x2f2   :  { %834 = vmatpush.msrb.mxu3 %v5786_v4 }
 0x2f3   :  { %v682_v53 = vsub.f32 %v680_v38, %v681_v39 }
 0x2f4   :  { %836 = vmatpush.msrb.mxu3 %v5809_v15 }
 0x2f5   :  { %v683_v32 = vand.u32 4294901760, %v682_v53 }
 0x2f6   :  { %838 = vmatpush.msrb.mxu3 %v5833_v24 }
 0x2f7   :  { %684 = vmatmul.f32.vlgmr.msrb.gmra.mxu2 %v683_v32  ;;  %782 = vmatmul.f32.vlgmr.msra.gmra.mxu3 %v681_v39 }
 0x2f8   :  { %801 = vmatpush.msrb.mxu2 %v5758_v54  ;;  %917 = vmatpush.msra.mxu3 %v5775_v60 }
 0x2fa   :  { %805 = vmatpush.msrb.mxu2 %v5795_v8  ;;  %923 = vmatpush.msra.mxu3 %v5801_v12 }
 0x2fc   :  { %809 = vmatpush.msrb.mxu2 %v5818_v20  ;;  %929 = vmatpush.msra.mxu3 %v5827_v13 }
 0x2fe   :  { %813 = vmatpush.msrb.mxu2 %v5843_v21  ;;  %935 = vmatpush.msra.mxu3 %v5854_v27 }
 0x2ff   :  { %755 = vmatmul.f32.vlgmr.msra.gmra.mxu2 %v680_v38  ;;  %840 = vmatmul.f32.vlgmr.msrb.gmra.mxu3 %v679_v9 }
 0x300   :  { %884 = vmatpush.msra.mxu2 %v5743_v45  ;;  %984 = vmatpush.msrb.mxu3 %v5743_v45 }
 0x302   :  { %886 = vmatpush.msra.mxu2 %v5786_v4  ;;  %986 = vmatpush.msrb.mxu3 %v5786_v4 }
 0x304   :  { %888 = vmatpush.msra.mxu2 %v5809_v15  ;;  %988 = vmatpush.msrb.mxu3 %v5809_v15 }
 0x306   :  { %890 = vmatpush.msra.mxu2 %v5833_v24  ;;  %990 = vmatpush.msrb.mxu3 %v5833_v24 }
 0x307   :  { %815 = vmatmul.f32.vlgmr.msrb.gmra.mxu2 %v679_v9 }
 0x308   :  { %955 = vmatpush.msrb.mxu2 %v5749_v47 }
 0x30a   :  { %958 = vmatpush.msrb.mxu2 %v5791_v5 }
 0x30c   :  { %961 = vmatpush.msrb.mxu2 %v5814_v17 }
 0x30e   :  { %964 = vmatpush.msrb.mxu2 %v5838_v25 }
 0x372   :  { %v726_v2 = vpop.f32.mrf.mxu3 }
 0x37a   :  { %v685_v7 = vpop.f32.mrf.mxu2  ;;  %v783_v19 = vpop.f32.mrf.mxu3 }
 0x37b   :  { %v686_v62 = vadd.f32 %v685_v7, %v417_v14 }
 0x37d   :  { %v727_v26 = vadd.f32 %v726_v2, %v686_v62 }
 0x382   :  { %v756_v23 = vpop.f32.mrf.mxu2  ;;  %v841_v53 = vpop.f32.mrf.mxu3 }
 0x383   :  { %v757_v9 = vadd.f32 %v756_v23, %v727_v26 }
 0x385   :  { %v784_v38 = vadd.f32 %v783_v19, %v757_v9 }
 0x38a   :  { %v816_v39 = vpop.f32.mrf.mxu2 }
 0x38b   :  { %v817_v42 = vadd.f32 %v816_v39, %v784_v38  ;;  %v370_v39 = vpop.f32.mrf.mxu0 }
 0x38d   :  { %v842_v46 = vadd.f32 %v841_v53, %v817_v42  ;;  %v420_v42 = vpop.f32.mrf.mxu1 }
 0x38f   :  { %5424 = vtanh.f32 %v842_v46  ;;  %v844_v35 = vmul.f32 0.5, %v842_v46 }
 0x391   :  { %5426 = vtanh.f32 %v844_v35 }
 0x393   :  { %v6042_v53 = vpop.f32.mrf.mxu0 }
 0x395   :  { %v5425_v34 = vpop.eup %5424  ;;  %v6044_v46 = vpop.f32.mrf.mxu1 }
 0x396   :  { %851 = vrot.lane.b32.xlu2 %v5425_v34, %s5623_s0 }
 0x397   :  { %v5427_v32 = vpop.eup %5426 }
 0x398   :  { %v846_v58 = vadd.f32 1.0, %v5427_v32  ;;  %v120_v32 = vadd.f32 %v5957_v52, %v5949_v48 }
 0x39a   :  { %v847_v33 = vmul.f32 0.5, %v846_v58 }
 0x39b   :  { %v6046_v34 = vpop.f32.mrf.mxu0 }
 0x39c   :  { %v849_v1 = vmul.f32 %v847_v33, %v5974_v11 }
 0x39d   :  { %v6048_v35 = vpop.f32.mrf.mxu1 }
 0x3a3   :  { %v6052_v58 = vpop.f32.mrf.mxu0 }
 0x3f0   :  { %v852_v61 = vpop.permute.xlu2 %851 }
 0x3f1   :  { %v854_v0 = vmul.f32 %v852_v61, %v847_v33  ;;  %v6055_v61 = vpop.f32.mrf.mxu1 }
 0x3f3   :  { %856 = vrot.lane.b32.xlu2 %v854_v0, %s5624_s15 }
 0x44d   :  { %v857_v2 = vpop.permute.xlu2 %856 }
 0x44e   :  { %v6012_v3 = vadd.f32 %v857_v2, %v849_v1  ;;  %v6059_v2 = vpop.f32.mrf.mxu0 }
 0x450   :  { %5428 = vtanh.f32 %v6012_v3 }
 0x456   :  { %v5429_v6 = vpop.eup %5428  ;;  %v6063_v48 = vpop.f32.mrf.mxu0 }
 0x457   :  { %862 = vrot.lane.b32.xlu0 %v5429_v6, %s5623_s0  ;;  %v6061_v6 = vpop.f32.mrf.mxu1 }
 0x4c9   :  { %v863_v7 = vpop.permute.xlu0 %862 }
 0x4ca   :  { %v865_v14 = vmul.f32 %v863_v7, %v847_v33  ;;  %v194_v33 = vadd.f32 %v5955_v51, %v120_v32 }
 0x4cc   :  { %867 = vrot.lane.b32.xlu1 %v865_v14, %s5624_s15  ;;  %v248_v0 = vadd.f32 %v5933_v36, %v194_v33 }
 0x4ce   :  { %v309_v1 = vadd.f32 %v5935_v37, %v248_v0 }
 0x4d0   :  { %v371_v7 = vadd.f32 %v370_v39, %v309_v1 }
 0x53e   :  { %v868_v62 = vpop.permute.xlu1 %867 }
 0x53f   :  { %v869_v19 = vsel %vm443_vm2, %v868_v62, 0 }
 0x540   :  { %v891_v23 = vand.u32 4294901760, %v869_v19 }
 0x542   :  { %v892_v26 = vsub.f32 %v869_v19, %v891_v23  ;;  %937 = vmatmul.f32.vlgmr.msra.gmra.mxu3 %v891_v23  ;;  %1027 = vmatmul.f32.vlgmr.msra.gmra.mxu0 %v891_v23  ;;  %v421_v19 = vadd.f32 %v420_v42, %v371_v7 }
 0x543   :  { %1052 = vmatmul.f32.vlgmr.msra.gmra.mxu1 %v891_v23  ;;  %1129 = vmatpush.msra.mxu3 %v5775_v60 }
 0x544   :  { %v893_v11 = vand.u32 4294901760, %v892_v26  ;;  %1341 = vmatpush.msra.mxu1 %v5775_v60  ;;  %1308 = vmatpush.msra.mxu0 %v5743_v45 }
 0x545   :  { %1135 = vmatpush.msra.mxu3 %v5801_v12 }
 0x546   :  { %v894_v9 = vsub.f32 %v892_v26, %v893_v11  ;;  %1347 = vmatpush.msra.mxu1 %v5801_v12  ;;  %1310 = vmatpush.msra.mxu0 %v5786_v4 }
 0x547   :  { %1141 = vmatpush.msra.mxu3 %v5827_v13 }
 0x548   :  { %v895_v38 = vand.u32 4294901760, %v894_v9  ;;  %1353 = vmatpush.msra.mxu1 %v5827_v13  ;;  %1312 = vmatpush.msra.mxu0 %v5809_v15 }
 0x549   :  { %1147 = vmatpush.msra.mxu3 %v5854_v27 }
 0x54a   :  { %896 = vmatmul.f32.vlgmr.msra.gmra.mxu2 %v895_v38  ;;  %994 = vmatmul.f32.vlgmr.msrb.gmra.mxu3 %v893_v11 }
 0x54b   :  { %1096 = vmatpush.msra.mxu2 %v5743_v45  ;;  %1256 = vmatpush.msrb.mxu3 %v5743_v45 }
 0x54c   :  { %1359 = vmatpush.msra.mxu1 %v5854_v27  ;;  %1314 = vmatpush.msra.mxu0 %v5833_v24 }
 0x54d   :  { %1098 = vmatpush.msra.mxu2 %v5786_v4  ;;  %1258 = vmatpush.msrb.mxu3 %v5786_v4 }
 0x54f   :  { %1100 = vmatpush.msra.mxu2 %v5809_v15  ;;  %1260 = vmatpush.msrb.mxu3 %v5809_v15 }
 0x551   :  { %1102 = vmatpush.msra.mxu2 %v5833_v24  ;;  %1262 = vmatpush.msrb.mxu3 %v5833_v24 }
 0x552   :  { %967 = vmatmul.f32.vlgmr.msrb.gmra.mxu2 %v892_v26  ;;  %v6065_v26 = vpop.f32.mrf.mxu1 }
 0x553   :  { %1225 = vmatpush.msrb.mxu2 %v5758_v54 }
 0x555   :  { %1229 = vmatpush.msrb.mxu2 %v5795_v8 }
 0x557   :  { %1233 = vmatpush.msrb.mxu2 %v5818_v20 }
 0x559   :  { %1237 = vmatpush.msrb.mxu2 %v5843_v21 }
 0x5bf   :  { %v1028_v32 = vpop.f32.mrf.mxu0 }
 0x5c0   :  { %v1053_v33 = vpop.f32.mrf.mxu1 }
 0x5c5   :  { %v938_v14 = vpop.f32.mrf.mxu3 }
 0x5cd   :  { %v897_v62 = vpop.f32.mrf.mxu2  ;;  %v995_v38 = vpop.f32.mrf.mxu3 }
 0x5ce   :  { %v898_v23 = vadd.f32 %v897_v62, %v421_v19 }
 0x5d0   :  { %v939_v51 = vadd.f32 %v938_v14, %v898_v23 }
 0x5d5   :  { %v968_v11 = vpop.f32.mrf.mxu2 }
 0x5d6   :  { %v969_v9 = vadd.f32 %v968_v11, %v939_v51 }
 0x5d8   :  { %v996_v36 = vadd.f32 %v995_v38, %v969_v9 }
 0x5da   :  { %v1029_v37 = vadd.f32 %v1028_v32, %v996_v36 }
 0x5dc   :  { %v1054_v0 = vadd.f32 %v1053_v33, %v1029_v37 }
 0x5de   :  { %5430 = vtanh.f32 %v1054_v0  ;;  %v1056_v39 = vmul.f32 0.5, %v1054_v0 }
 0x5e0   :  { %5432 = vtanh.f32 %v1056_v39  ;;  %v128_v39 = vadd.f32 %v5957_v52, %v5964_v57 }
 0x5e4   :  { %v5431_v63 = vpop.eup %5430 }
 0x5e5   :  { %1063 = vrot.lane.b32.xlu2 %v5431_v63, %s5623_s0 }
 0x5e6   :  { %v5433_v42 = vpop.eup %5432 }
 0x5e7   :  { %v1058_v1 = vadd.f32 1.0, %v5433_v42  ;;  %v198_v42 = vadd.f32 %v5966_v59, %v128_v39 }
 0x5e9   :  { %v1059_v7 = vmul.f32 0.5, %v1058_v1  ;;  %v253_v1 = vadd.f32 %v5937_v40, %v198_v42 }
 0x5eb   :  { %v1061_v14 = vmul.f32 %v1059_v7, %v6012_v3 }
 0x63f   :  { %v1064_v62 = vpop.permute.xlu2 %1063 }
 0x640   :  { %v1066_v19 = vmul.f32 %v1064_v62, %v1059_v7 }
 0x642   :  { %1068 = vrot.lane.b32.xlu0 %v1066_v19, %s5624_s15 }
 0x6b4   :  { %v1069_v23 = vpop.permute.xlu0 %1068 }
 0x6b5   :  { %v6070_v51 = vadd.f32 %v1069_v23, %v1061_v14 }
 0x6b7   :  { %5434 = vtanh.f32 %v6070_v51 }
 0x6bd   :  { %v5435_v11 = vpop.eup %5434 }
 0x6be   :  { %1074 = vrot.lane.b32.xlu1 %v5435_v11, %s5623_s0 }
 0x730   :  { %v1075_v63 = vpop.permute.xlu1 %1074 }
 0x731   :  { %v1077_v9 = vmul.f32 %v1075_v63, %v1059_v7  ;;  %v315_v7 = vadd.f32 %v5939_v41, %v253_v1 }
 0x733   :  { %1079 = vrot.lane.b32.xlu2 %v1077_v9, %s5624_s15  ;;  %v375_v62 = vadd.f32 %v6042_v53, %v315_v7 }
 0x735   :  { %v425_v19 = vadd.f32 %v6044_v46, %v375_v62 }
 0x78d   :  { %v1080_v38 = vpop.permute.xlu2 %1079 }
 0x78e   :  { %v1081_v36 = vsel %vm443_vm2, %v1080_v38, 0 }
 0x78f   :  { %v1103_v32 = vand.u32 4294901760, %v1081_v36 }
 0x791   :  { %v1104_v37 = vsub.f32 %v1081_v36, %v1103_v32  ;;  %1149 = vmatmul.f32.vlgmr.msra.gmra.mxu3 %v1103_v32 }
 0x792   :  { %1408 = vmatpush.msra.mxu3 %v5743_v45 }
 0x793   :  { %v1105_v3 = vand.u32 4294901760, %v1104_v37  ;;  %1179 = vmatmul.f32.vlgmr.msrb.gmra.mxu0 %v1104_v37 }
 0x794   :  { %1410 = vmatpush.msra.mxu3 %v5786_v4  ;;  %1437 = vmatpush.msrb.mxu0 %v5758_v54 }
 0x795   :  { %v1106_v33 = vsub.f32 %v1104_v37, %v1105_v3  ;;  %1206 = vmatmul.f32.vlgmr.msrb.gmra.mxu1 %v1105_v3 }
 0x796   :  { %1412 = vmatpush.msra.mxu3 %v5809_v15  ;;  %1468 = vmatpush.msrb.mxu1 %v5743_v45 }
 0x797   :  { %v1107_v0 = vand.u32 4294901760, %v1106_v33  ;;  %1441 = vmatpush.msrb.mxu0 %v5795_v8 }
 0x798   :  { %1414 = vmatpush.msra.mxu3 %v5833_v24  ;;  %1470 = vmatpush.msrb.mxu1 %v5786_v4 }
 0x799   :  { %1108 = vmatmul.f32.vlgmr.msra.gmra.mxu2 %v1107_v0  ;;  %1264 = vmatmul.f32.vlgmr.msrb.gmra.mxu3 %v1103_v32 }
 0x79a   :  { %1379 = vmatpush.msra.mxu2 %v5749_v47  ;;  %1472 = vmatpush.msrb.mxu1 %v5809_v15 }
 0x79b   :  { %1445 = vmatpush.msrb.mxu0 %v5818_v20  ;;  %1553 = vmatpush.msrb.mxu3 %v5775_v60 }
 0x79c   :  { %1382 = vmatpush.msra.mxu2 %v5791_v5  ;;  %1474 = vmatpush.msrb.mxu1 %v5833_v24 }
 0x79d   :  { %1449 = vmatpush.msrb.mxu0 %v5843_v21  ;;  %1559 = vmatpush.msrb.mxu3 %v5801_v12 }
 0x79e   :  { %1385 = vmatpush.msra.mxu2 %v5814_v17 }
 0x79f   :  { %1565 = vmatpush.msrb.mxu3 %v5827_v13 }
 0x7a0   :  { %1388 = vmatpush.msra.mxu2 %v5838_v25 }
 0x7a1   :  { %1239 = vmatmul.f32.vlgmr.msrb.gmra.mxu2 %v1103_v32  ;;  %1571 = vmatpush.msrb.mxu3 %v5854_v27 }
 0x7a2   :  { %1520 = vmatpush.msrb.mxu2 %v5743_v45 }
 0x7a4   :  { %1522 = vmatpush.msrb.mxu2 %v5786_v4 }
 0x7a6   :  { %1524 = vmatpush.msrb.mxu2 %v5809_v15 }
 0x7a8   :  { %1526 = vmatpush.msrb.mxu2 %v5833_v24 }
 0x810   :  { %v1180_v9 = vpop.f32.mrf.mxu0 }
 0x812   :  { %v1207_v36 = vpop.f32.mrf.mxu1 }
 0x814   :  { %v1150_v14 = vpop.f32.mrf.mxu3 }
 0x81c   :  { %v1109_v23 = vpop.f32.mrf.mxu2  ;;  %v1265_v3 = vpop.f32.mrf.mxu3 }
 0x81d   :  { %v1110_v11 = vadd.f32 %v1109_v23, %v425_v19 }
 0x81f   :  { %v1151_v63 = vadd.f32 %v1150_v14, %v1110_v11 }
 0x821   :  { %v1181_v38 = vadd.f32 %v1180_v9, %v1151_v63 }
 0x823   :  { %v1208_v32 = vadd.f32 %v1207_v36, %v1181_v38 }
 0x824   :  { %v1240_v37 = vpop.f32.mrf.mxu2 }
 0x825   :  { %v1241_v57 = vadd.f32 %v1240_v37, %v1208_v32  ;;  %v136_v32 = vadd.f32 %v5957_v52, %v5913_v10 }
 0x827   :  { %v1266_v59 = vadd.f32 %v1265_v3, %v1241_v57  ;;  %v202_v37 = vadd.f32 %v5915_v16, %v136_v32 }
 0x829   :  { %5436 = vtanh.f32 %v1266_v59  ;;  %v1268_v41 = vmul.f32 0.5, %v1266_v59  ;;  %v258_v57 = vadd.f32 %v5943_v43, %v202_v37 }
 0x82b   :  { %5438 = vtanh.f32 %v1268_v41  ;;  %v321_v3 = vadd.f32 %v5945_v44, %v258_v57 }
 0x82d   :  { %v379_v59 = vadd.f32 %v6046_v34, %v321_v3 }
 0x82f   :  { %v5437_v40 = vpop.eup %5436 }
 0x830   :  { %1275 = vrot.lane.b32.xlu0 %v5437_v40, %s5623_s0  ;;  %v429_v40 = vadd.f32 %v6048_v35, %v379_v59 }
 0x831   :  { %v5439_v53 = vpop.eup %5438 }
 0x832   :  { %v1270_v46 = vadd.f32 1.0, %v5439_v53 }
 0x834   :  { %v1271_v33 = vmul.f32 0.5, %v1270_v46 }
 0x836   :  { %v1273_v42 = vmul.f32 %v1271_v33, %v6070_v51 }
 0x8a2   :  { %v1276_v0 = vpop.permute.xlu0 %1275 }
 0x8a3   :  { %v1278_v39 = vmul.f32 %v1276_v0, %v1271_v33 }
 0x8a5   :  { %1280 = vrot.lane.b32.xlu1 %v1278_v39, %s5624_s15 }
 0x917   :  { %v1281_v1 = vpop.permute.xlu1 %1280 }
 0x918   :  { %v6110_v7 = vadd.f32 %v1281_v1, %v1273_v42 }
 0x91a   :  { %5440 = vtanh.f32 %v6110_v7 }
 0x920   :  { %v5441_v62 = vpop.eup %5440 }
 0x921   :  { %1286 = vrot.lane.b32.xlu2 %v5441_v62, %s5623_s0 }
 0x97b   :  { %v1287_v19 = vpop.permute.xlu2 %1286 }
 0x97c   :  { %v1289_v14 = vmul.f32 %v1287_v19, %v1271_v33 }
 0x97e   :  { %1291 = vrot.lane.b32.xlu0 %v1289_v14, %s5624_s15 }
 0x9f0   :  { %v1292_v23 = vpop.permute.xlu0 %1291 }
 0x9f1   :  { %v1293_v11 = vsel %vm443_vm2, %v1292_v23, 0 }
 0x9f2   :  { %v1315_v63 = vand.u32 4294901760, %v1293_v11 }
 0x9f4   :  { %v1316_v9 = vsub.f32 %v1293_v11, %v1315_v63  ;;  %1361 = vmatmul.f32.vlgmr.msra.gmra.mxu1 %v1315_v63 }
 0x9f5   :  { %1620 = vmatpush.msra.mxu1 %v5743_v45 }
 0x9f6   :  { %v1317_v51 = vand.u32 4294901760, %v1316_v9  ;;  %1391 = vmatmul.f32.vlgmr.msra.gmra.mxu2 %v1316_v9 }
 0x9f7   :  { %1622 = vmatpush.msra.mxu1 %v5786_v4  ;;  %1649 = vmatpush.msra.mxu2 %v5758_v54 }
 0x9f8   :  { %v1318_v38 = vsub.f32 %v1316_v9, %v1317_v51  ;;  %1418 = vmatmul.f32.vlgmr.msra.gmra.mxu3 %v1317_v51 }
 0x9f9   :  { %1624 = vmatpush.msra.mxu1 %v5809_v15  ;;  %1680 = vmatpush.msra.mxu3 %v5743_v45 }
 0x9fa   :  { %v1319_v36 = vand.u32 4294901760, %v1318_v38  ;;  %1653 = vmatpush.msra.mxu2 %v5795_v8 }
 0x9fb   :  { %1626 = vmatpush.msra.mxu1 %v5833_v24  ;;  %1682 = vmatpush.msra.mxu3 %v5786_v4 }
 0x9fc   :  { %1320 = vmatmul.f32.vlgmr.msra.gmra.mxu0 %v1319_v36  ;;  %1476 = vmatmul.f32.vlgmr.msrb.gmra.mxu1 %v1315_v63 }
 0x9fd   :  { %1591 = vmatpush.msra.mxu0 %v5749_v47  ;;  %1684 = vmatpush.msra.mxu3 %v5809_v15 }
 0x9fe   :  { %1657 = vmatpush.msra.mxu2 %v5818_v20  ;;  %1765 = vmatpush.msrb.mxu1 %v5775_v60 }
 0x9ff   :  { %1594 = vmatpush.msra.mxu0 %v5791_v5  ;;  %1686 = vmatpush.msra.mxu3 %v5833_v24 }
 0xa00   :  { %1661 = vmatpush.msra.mxu2 %v5843_v21  ;;  %1771 = vmatpush.msrb.mxu1 %v5801_v12 }
 0xa01   :  { %1597 = vmatpush.msra.mxu0 %v5814_v17 }
 0xa02   :  { %1777 = vmatpush.msrb.mxu1 %v5827_v13 }
 0xa03   :  { %1600 = vmatpush.msra.mxu0 %v5838_v25 }
 0xa04   :  { %1451 = vmatmul.f32.vlgmr.msrb.gmra.mxu0 %v1315_v63  ;;  %1783 = vmatpush.msrb.mxu1 %v5854_v27 }
 0xa05   :  { %1732 = vmatpush.msrb.mxu0 %v5743_v45 }
 0xa07   :  { %1734 = vmatpush.msrb.mxu0 %v5786_v4 }
 0xa09   :  { %1736 = vmatpush.msrb.mxu0 %v5809_v15 }
 0xa0b   :  { %1738 = vmatpush.msrb.mxu0 %v5833_v24 }
 0xa71   :  { %v1362_v41 = vpop.f32.mrf.mxu1 }
 0xa79   :  { %v1321_v53 = vpop.f32.mrf.mxu0  ;;  %v1392_v0 = vpop.f32.mrf.mxu2 }
 0xa7a   :  { %v1322_v46 = vadd.f32 %v1321_v53, %v429_v40  ;;  %v1477_v19 = vpop.f32.mrf.mxu1 }
 0xa7b   :  { %v1419_v42 = vpop.f32.mrf.mxu3 }
 0xa7c   :  { %v1363_v33 = vadd.f32 %v1362_v41, %v1322_v46 }
 0xa7e   :  { %v1393_v39 = vadd.f32 %v1392_v0, %v1363_v33 }
 0xa80   :  { %v1420_v1 = vadd.f32 %v1419_v42, %v1393_v39 }
 0xa81   :  { %v1452_v62 = vpop.f32.mrf.mxu0 }
 0xa82   :  { %v1453_v10 = vadd.f32 %v1452_v62, %v1420_v1 }
 0xa84   :  { %v1478_v16 = vadd.f32 %v1477_v19, %v1453_v10 }
 0xa86   :  { %5442 = vtanh.f32 %v1478_v16  ;;  %v1480_v44 = vmul.f32 0.5, %v1478_v16 }
 0xa88   :  { %5444 = vtanh.f32 %v1480_v44 }
 0xa8c   :  { %v5443_v43 = vpop.eup %5442 }
 0xa8d   :  { %1487 = vrot.lane.b32.xlu1 %v5443_v43, %s5623_s0 }
 0xa8e   :  { %v5445_v34 = vpop.eup %5444 }
 0xa8f   :  { %v1482_v35 = vadd.f32 1.0, %v5445_v34 }
 0xa91   :  { %v1483_v14 = vmul.f32 0.5, %v1482_v35 }
 0xa93   :  { %v1485_v63 = vmul.f32 %v1483_v14, %v6110_v7 }
 0xaff   :  { %v1488_v23 = vpop.permute.xlu1 %1487 }
 0xb00   :  { %v1490_v11 = vmul.f32 %v1488_v23, %v1483_v14 }
 0xb02   :  { %1492 = vrot.lane.b32.xlu2 %v1490_v11, %s5624_s15 }
 0xb5c   :  { %v1493_v9 = vpop.permute.xlu2 %1492 }
 0xb5d   :  { %v6150_v51 = vadd.f32 %v1493_v9, %v1485_v63 }
 0xb5f   :  { %5446 = vtanh.f32 %v6150_v51 }
 0xb65   :  { %v5447_v38 = vpop.eup %5446 }
 0xb66   :  { %1498 = vrot.lane.b32.xlu0 %v5447_v38, %s5623_s0 }
 0xbd8   :  { %v1499_v36 = vpop.permute.xlu0 %1498 }
 0xbd9   :  { %v1501_v32 = vmul.f32 %v1499_v36, %v1483_v14 }
 0xbdb   :  { %1503 = vrot.lane.b32.xlu1 %v1501_v32, %s5624_s15 }
 0xc4d   :  { %v1504_v37 = vpop.permute.xlu1 %1503 }
 0xc4e   :  { %v1505_v57 = vsel %vm443_vm2, %v1504_v37, 0 }
 0xc4f   :  { %v1527_v3 = vand.u32 4294901760, %v1505_v57 }
 0xc51   :  { %v1528_v59 = vsub.f32 %v1505_v57, %v1527_v3  ;;  %1573 = vmatmul.f32.vlgmr.msrb.gmra.mxu3 %v1527_v3 }
 0xc52   :  { %1832 = vmatpush.msrb.mxu3 %v5743_v45 }
 0xc53   :  { %v1529_v7 = vand.u32 4294901760, %v1528_v59  ;;  %1603 = vmatmul.f32.vlgmr.msra.gmra.mxu0 %v1528_v59 }
 0xc54   :  { %1834 = vmatpush.msrb.mxu3 %v5786_v4  ;;  %1861 = vmatpush.msra.mxu0 %v5758_v54 }
 0xc55   :  { %v1530_v40 = vsub.f32 %v1528_v59, %v1529_v7  ;;  %1630 = vmatmul.f32.vlgmr.msra.gmra.mxu1 %v1529_v7 }
 0xc56   :  { %1836 = vmatpush.msrb.mxu3 %v5809_v15  ;;  %1892 = vmatpush.msra.mxu1 %v5743_v45 }
 0xc57   :  { %v1531_v41 = vand.u32 4294901760, %v1530_v40  ;;  %1865 = vmatpush.msra.mxu0 %v5795_v8 }
 0xc58   :  { %1838 = vmatpush.msrb.mxu3 %v5833_v24  ;;  %1894 = vmatpush.msra.mxu1 %v5786_v4 }
 0xc59   :  { %1532 = vmatmul.f32.vlgmr.msrb.gmra.mxu2 %v1531_v41  ;;  %1688 = vmatmul.f32.vlgmr.msra.gmra.mxu3 %v1527_v3 }
 0xc5a   :  { %1803 = vmatpush.msrb.mxu2 %v5749_v47  ;;  %1896 = vmatpush.msra.mxu1 %v5809_v15 }
 0xc5b   :  { %1869 = vmatpush.msra.mxu0 %v5818_v20  ;;  %1977 = vmatpush.msra.mxu3 %v5775_v60  ;;  %v144_v60 = vadd.f32 %v5957_v52, %v5917_v18 }
 0xc5c   :  { %1806 = vmatpush.msrb.mxu2 %v5791_v5  ;;  %1898 = vmatpush.msra.mxu1 %v5833_v24 }
 0xc5d   :  { %1873 = vmatpush.msra.mxu0 %v5843_v21  ;;  %1983 = vmatpush.msra.mxu3 %v5801_v12  ;;  %v206_v12 = vadd.f32 %v5919_v22, %v144_v60 }
 0xc5e   :  { %1809 = vmatpush.msrb.mxu2 %v5814_v17 }
 0xc5f   :  { %1989 = vmatpush.msra.mxu3 %v5827_v13  ;;  %v263_v13 = vadd.f32 %v5951_v49, %v206_v12 }
 0xc60   :  { %1812 = vmatpush.msrb.mxu2 %v5838_v25 }
 0xc61   :  { %1663 = vmatmul.f32.vlgmr.msra.gmra.mxu2 %v1527_v3  ;;  %1995 = vmatpush.msra.mxu3 %v5854_v27  ;;  %v327_v53 = vadd.f32 %v5953_v50, %v263_v13 }
 0xc62   :  { %1944 = vmatpush.msra.mxu2 %v5743_v45 }
 0xc63   :  { %v383_v46 = vadd.f32 %v6052_v58, %v327_v53 }
 0xc64   :  { %1946 = vmatpush.msra.mxu2 %v5786_v4 }
 0xc65   :  { %v433_v27 = vadd.f32 %v6055_v61, %v383_v46 }
 0xc66   :  { %1948 = vmatpush.msra.mxu2 %v5809_v15 }
 0xc68   :  { %1950 = vmatpush.msra.mxu2 %v5833_v24 }
 0xcd0   :  { %v1604_v1 = vpop.f32.mrf.mxu0 }
 0xcd2   :  { %v1631_v10 = vpop.f32.mrf.mxu1 }
 0xcd4   :  { %v1574_v33 = vpop.f32.mrf.mxu3 }
 0xcdc   :  { %v1533_v0 = vpop.f32.mrf.mxu2  ;;  %v1689_v43 = vpop.f32.mrf.mxu3 }
 0xcdd   :  { %v1534_v39 = vadd.f32 %v1533_v0, %v433_v27 }
 0xcdf   :  { %v1575_v42 = vadd.f32 %v1574_v33, %v1534_v39 }
 0xce1   :  { %v1605_v62 = vadd.f32 %v1604_v1, %v1575_v42 }
 0xce3   :  { %v1632_v19 = vadd.f32 %v1631_v10, %v1605_v62 }
 0xce4   :  { %v1664_v16 = vpop.f32.mrf.mxu2 }
 0xce5   :  { %v1665_v18 = vadd.f32 %v1664_v16, %v1632_v19 }
 0xce7   :  { %v1690_v22 = vadd.f32 %v1689_v43, %v1665_v18  ;;  %v5516_v43 = vld [vmem:[#allocation3 + $0x28] ss:$0 sm:$0xff] }
 0xce9   :  { %5448 = vtanh.f32 %v1690_v22  ;;  %v1692_v50 = vmul.f32 0.5, %v1690_v22  ;;  %v160_v22 = vadd.f32 %v5516_v43, %v5925_v30 }
 0xceb   :  { %5450 = vtanh.f32 %v1692_v50  ;;  %v6667_v50 = vld [vmem:[#allocation13_spill] sm:$0xff] }
 0xcef   :  { %v5449_v49 = vpop.eup %5448 }
 0xcf0   :  { %1699 = vrot.lane.b32.xlu2 %v5449_v49, %s5623_s0  ;;  %v214_v49 = vadd.f32 %v5927_v31, %v160_v22 }
 0xcf1   :  { %v5451_v58 = vpop.eup %5450 }
 0xcf2   :  { %v1694_v61 = vadd.f32 1.0, %v5451_v58  ;;  %v273_v58 = vadd.f32 %v6667_v50, %v214_v49  ;;  %v2334_v50 = vld [vmem:[#allocation3 + $0x58] sm:$0xff] }
 0xcf4   :  { %v1695_v44 = vmul.f32 0.5, %v1694_v61  ;;  %v6668_v61 = vld [vmem:[#allocation14_spill] sm:$0xff] }
 0xcf6   :  { %v1697_v14 = vmul.f32 %v1695_v44, %v6150_v51 }
 0xd4a   :  { %v1700_v34 = vpop.permute.xlu2 %1699 }
 0xd4b   :  { %v1702_v35 = vmul.f32 %v1700_v34, %v1695_v44 }
 0xd4d   :  { %1704 = vrot.lane.b32.xlu0 %v1702_v35, %s5624_s15 }
 0xdbf   :  { %v1705_v23 = vpop.permute.xlu0 %1704 }
 0xdc0   :  { %v6190_v11 = vadd.f32 %v1705_v23, %v1697_v14 }
 0xdc2   :  { %5452 = vtanh.f32 %v6190_v11 }
 0xdc8   :  { %v5453_v63 = vpop.eup %5452 }
 0xdc9   :  { %1710 = vrot.lane.b32.xlu1 %v5453_v63, %s5623_s0 }
 0xe3b   :  { %v1711_v9 = vpop.permute.xlu1 %1710 }
 0xe3c   :  { %v1713_v38 = vmul.f32 %v1711_v9, %v1695_v44  ;;  %v339_v44 = vadd.f32 %v6668_v61, %v273_v58 }
 0xe3e   :  { %1715 = vrot.lane.b32.xlu2 %v1713_v38, %s5624_s15  ;;  %v391_v34 = vadd.f32 %v6063_v48, %v339_v44  ;;  %v2358_v44 = vand.u32 4294901760, %v2334_v50 }
 0xe40   :  { %v441_v35 = vadd.f32 %v6065_v26, %v391_v34 }
 0xe98   :  { %v1716_v36 = vpop.permute.xlu2 %1715 }
 0xe99   :  { %v1717_v32 = vsel %vm443_vm2, %v1716_v36, 0 }
 0xe9a   :  { %v1739_v37 = vand.u32 4294901760, %v1717_v32 }
 0xe9c   :  { %v1740_v57 = vsub.f32 %v1717_v32, %v1739_v37  ;;  %1785 = vmatmul.f32.vlgmr.msrb.gmra.mxu1 %v1739_v37 }
 0xe9d   :  { %2044 = vmatpush.msrb.mxu1 %v5743_v45 }
 0xe9e   :  { %v1741_v51 = vand.u32 4294901760, %v1740_v57  ;;  %1815 = vmatmul.f32.vlgmr.msrb.gmra.mxu2 %v1740_v57 }
 0xe9f   :  { %2046 = vmatpush.msrb.mxu1 %v5786_v4  ;;  %2073 = vmatpush.msrb.mxu2 %v5758_v54 }
 0xea0   :  { %v1742_v3 = vsub.f32 %v1740_v57, %v1741_v51  ;;  %1842 = vmatmul.f32.vlgmr.msrb.gmra.mxu3 %v1741_v51 }
 0xea1   :  { %2048 = vmatpush.msrb.mxu1 %v5809_v15  ;;  %2104 = vmatpush.msrb.mxu3 %v5743_v45  ;;  %v152_v45 = vadd.f32 %v5957_v52, %v5921_v28 }
 0xea2   :  { %v1743_v59 = vand.u32 4294901760, %v1742_v3  ;;  %2077 = vmatpush.msrb.mxu2 %v5795_v8 }
 0xea3   :  { %2050 = vmatpush.msrb.mxu1 %v5833_v24  ;;  %2106 = vmatpush.msrb.mxu3 %v5786_v4 }
 0xea4   :  { %1744 = vmatmul.f32.vlgmr.msrb.gmra.mxu0 %v1743_v59  ;;  %1900 = vmatmul.f32.vlgmr.msra.gmra.mxu1 %v1739_v37 }
 0xea5   :  { %2015 = vmatpush.msrb.mxu0 %v5749_v47  ;;  %2108 = vmatpush.msrb.mxu3 %v5809_v15  ;;  %v210_v47 = vadd.f32 %v5923_v29, %v152_v45 }
 0xea6   :  { %2081 = vmatpush.msrb.mxu2 %v5818_v20 }
 0xea7   :  { %2018 = vmatpush.msrb.mxu0 %v5791_v5  ;;  %2110 = vmatpush.msrb.mxu3 %v5833_v24  ;;  %v268_v54 = vadd.f32 %v5960_v55, %v210_v47 }
 0xea8   :  { %2085 = vmatpush.msrb.mxu2 %v5843_v21 }
 0xea9   :  { %2021 = vmatpush.msrb.mxu0 %v5814_v17  ;;  %v333_v4 = vadd.f32 %v5962_v56, %v268_v54 }
 0xeab   :  { %2024 = vmatpush.msrb.mxu0 %v5838_v25  ;;  %v387_v5 = vadd.f32 %v6059_v2, %v333_v4 }
 0xeac   :  { %1875 = vmatmul.f32.vlgmr.msra.gmra.mxu0 %v1739_v37 }
 0xead   :  { %v437_v8 = vadd.f32 %v6061_v6, %v387_v5 }
 0xf19   :  { %v1786_v15 = vpop.f32.mrf.mxu1 }
 0xf21   :  { %v1745_v20 = vpop.f32.mrf.mxu0  ;;  %v1816_v21 = vpop.f32.mrf.mxu2 }
 0xf22   :  { %v1746_v24 = vadd.f32 %v1745_v20, %v437_v8  ;;  %v1901_v52 = vpop.f32.mrf.mxu1  ;;  %v2140_v20 = vld [vmem:[#allocation3 + $0x40] sm:$0xff] }
 0xf23   :  { %v1843_v7 = vpop.f32.mrf.mxu3 }
 0xf24   :  { %v1787_v17 = vadd.f32 %v1786_v15, %v1746_v24  ;;  %v2141_v15 = vld [vmem:[#allocation3 + $0x48] sm:$0xff] }
 0xf25   :  { %v2161_v24 = vand.u32 4294901760, %v2141_v15 }
 0xf26   :  { %v1817_v25 = vadd.f32 %v1816_v21, %v1787_v17  ;;  %v2163_v17 = vand.u32 4294901760, %v2140_v20 }
 0xf27   :  { %v2191_v21 = vsub.f32 %v2141_v15, %v2161_v24  ;;  %2162 = vmatpush.msra.mxu0 %v2161_v24 }
 0xf28   :  { %v1844_v40 = vadd.f32 %v1843_v7, %v1817_v25  ;;  %v2197_v25 = vsub.f32 %v2140_v20, %v2163_v17 }
 0xf29   :  { %v1876_v41 = vpop.f32.mrf.mxu0  ;;  %v2192_v7 = vand.u32 4294901760, %v2191_v21  ;;  %2164 = vmatpush.msra.mxu0 %v2163_v17 }
 0xf2a   :  { %v1877_v28 = vadd.f32 %v1876_v41, %v1844_v40  ;;  %v2198_v40 = vand.u32 4294901760, %v2197_v25 }
 0xf2b   :  { %v2193_v41 = vsub.f32 %v2191_v21, %v2192_v7 }
 0xf2c   :  { %v1902_v29 = vadd.f32 %v1901_v52, %v1877_v28  ;;  %v2199_v28 = vsub.f32 %v2197_v25, %v2198_v40 }
 0xf2d   :  { %v2194_v52 = vand.u32 4294901760, %v2193_v41 }
 0xf2e   :  { %5454 = vtanh.f32 %v1902_v29  ;;  %v1904_v56 = vmul.f32 0.5, %v1902_v29  ;;  %v2200_v29 = vand.u32 4294901760, %v2199_v28 }
 0xf2f   :  { %2195 = vmatpush.msra.mxu1 %v2194_v52 }
 0xf30   :  { %5456 = vtanh.f32 %v1904_v56 }
 0xf31   :  { %2201 = vmatpush.msra.mxu1 %v2200_v29 }
 0xf34   :  { %v5455_v55 = vpop.eup %5454 }
 0xf35   :  { %1911 = vrot.lane.b32.xlu0 %v5455_v55, %s5623_s0 }
 0xf36   :  { %v5457_v2 = vpop.eup %5456 }
 0xf37   :  { %v1906_v6 = vadd.f32 1.0, %v5457_v2  ;;  %v2139_v2 = vld [vmem:[#allocation3 + $0x38] sm:$0xff] }
 0xf39   :  { %v1907_v60 = vmul.f32 0.5, %v1906_v6  ;;  %v2165_v6 = vand.u32 4294901760, %v2139_v2 }
 0xf3b   :  { %v1909_v53 = vmul.f32 %v1907_v60, %v6190_v11  ;;  %2166 = vmatpush.msra.mxu0 %v2165_v6 }
 0xfa7   :  { %v1912_v12 = vpop.permute.xlu0 %1911 }
 0xfa8   :  { %v1914_v13 = vmul.f32 %v1912_v12, %v1907_v60  ;;  %v2203_v12 = vsub.f32 %v2139_v2, %v2165_v6 }
 0xfaa   :  { %1916 = vrot.lane.b32.xlu1 %v1914_v13, %s5624_s15 }
0x101c   :  { %v1917_v46 = vpop.permute.xlu1 %1916 }
0x101d   :  { %v1919_v27 = vadd.f32 %v1917_v46, %v1909_v53  ;;  %v2204_v53 = vand.u32 4294901760, %v2203_v12 }
0x101f   :  { %5458 = vtanh.f32 %v1919_v27 }
0x1025   :  { %v5459_v33 = vpop.eup %5458 }
0x1026   :  { %1922 = vrot.lane.b32.xlu2 %v5459_v33, %s5623_s0 }
0x1080   :  { %v1923_v0 = vpop.permute.xlu2 %1922 }
0x1081   :  { %v1925_v39 = vmul.f32 %v1923_v0, %v1907_v60  ;;  %v2138_v60 = vld [vmem:[#allocation3 + $0x30] sm:$0xff] }
0x1082   :  { %v2167_v13 = vand.u32 4294901760, %v2138_v60  ;;  %v2337_v0 = vld [vmem:[#allocation3 + $0x70] sm:$0xff] }
0x1083   :  { %1927 = vrot.lane.b32.xlu0 %v1925_v39, %s5624_s15 }
0x1084   :  { %v2209_v46 = vsub.f32 %v2138_v60, %v2167_v13  ;;  %2168 = vmatpush.msra.mxu0 %v2167_v13 }
0x1086   :  { %v2210_v33 = vand.u32 4294901760, %v2209_v46 }
0x10f5   :  { %v1928_v42 = vpop.permute.xlu0 %1927 }
0x10f6   :  { %v1929_v1 = vsel %vm443_vm2, %v1928_v42, 0  ;;  %v2211_v42 = vsub.f32 %v2209_v46, %v2210_v33 }
0x10f7   :  { %v1951_v62 = vand.u32 4294901760, %v1929_v1 }
0x10f9   :  { %v1952_v10 = vsub.f32 %v1929_v1, %v1951_v62  ;;  %1997 = vmatmul.f32.vlgmr.msra.gmra.mxu3 %v1951_v62  ;;  %v2352_v1 = vand.u32 4294901760, %v2337_v0 }
0x10fa   :  { %2262 = vmatpush.msra.mxu3 %v2161_v24 }
0x10fb   :  { %v1953_v19 = vand.u32 4294901760, %v1952_v10  ;;  %2027 = vmatmul.f32.vlgmr.msrb.gmra.mxu0 %v1952_v10 }
0x10fc   :  { %2264 = vmatpush.msra.mxu3 %v2163_v17  ;;  %2291 = vmatpush.msrb.mxu0 %v2192_v7 }
0x10fd   :  { %v1954_v16 = vsub.f32 %v1952_v10, %v1953_v19  ;;  %2054 = vmatmul.f32.vlgmr.msrb.gmra.mxu1 %v1953_v19  ;;  %v2212_v10 = vand.u32 4294901760, %v2211_v42  ;;  %v2382_v19 = vsub.f32 %v2337_v0, %v2352_v1 }
0x10fe   :  { %2266 = vmatpush.msra.mxu3 %v2165_v6  ;;  %2295 = vmatpush.msrb.mxu0 %v2198_v40 }
0x10ff   :  { %v1955_v18 = vand.u32 4294901760, %v1954_v16  ;;  %v2383_v43 = vand.u32 4294901760, %v2382_v19 }
0x1100   :  { %2268 = vmatpush.msra.mxu3 %v2167_v13  ;;  %2299 = vmatpush.msrb.mxu0 %v2204_v53 }
0x1101   :  { %1956 = vmatmul.f32.vlgmr.msra.gmra.mxu2 %v1955_v18  ;;  %2112 = vmatmul.f32.vlgmr.msrb.gmra.mxu3 %v1951_v62  ;;  %v2335_v18 = vld [vmem:[#allocation3 + $0x60] sm:$0xff]  ;;  %v2384_v58 = vsub.f32 %v2382_v19, %v2383_v43 }
0x1102   :  { %2233 = vmatpush.msra.mxu2 %v2191_v21  ;;  %v2356_v22 = vand.u32 4294901760, %v2335_v18  ;;  %2303 = vmatpush.msrb.mxu0 %v2210_v33 }
0x1104   :  { %2236 = vmatpush.msra.mxu2 %v2197_v25  ;;  %v2394_v34 = vsub.f32 %v2335_v18, %v2356_v22 }
0x1106   :  { %2239 = vmatpush.msra.mxu2 %v2203_v12 }
0x1108   :  { %2242 = vmatpush.msra.mxu2 %v2209_v46 }
0x1109   :  { %2087 = vmatmul.f32.vlgmr.msrb.gmra.mxu2 %v1951_v62  ;;  %v2336_v62 = vld [vmem:[#allocation3 + $0x68] sm:$0xff] }
0x110a   :  { %2353 = vmatpush.msrb.mxu2 %v2352_v1  ;;  %v2354_v16 = vand.u32 4294901760, %v2336_v62 }
0x110c   :  { %2355 = vmatpush.msrb.mxu2 %v2354_v16  ;;  %v2388_v49 = vsub.f32 %v2336_v62, %v2354_v16 }
0x110e   :  { %2357 = vmatpush.msrb.mxu2 %v2356_v22  ;;  %v2389_v61 = vand.u32 4294901760, %v2388_v49 }
0x1110   :  { %2359 = vmatpush.msrb.mxu2 %v2358_v44 }
0x1178   :  { %v2028_v9 = vpop.f32.mrf.mxu0 }
0x117a   :  { %v2055_v36 = vpop.f32.mrf.mxu1 }
0x117c   :  { %v1998_v14 = vpop.f32.mrf.mxu3 }
0x1184   :  { %v1957_v23 = vpop.f32.mrf.mxu2  ;;  %v2113_v57 = vpop.f32.mrf.mxu3 }
0x1185   :  { %v1958_v11 = vadd.f32 %v1957_v23, %v441_v35  ;;  %v2385_v35 = vand.u32 4294901760, %v2384_v58  ;;  %v2395_v23 = vand.u32 4294901760, %v2394_v34 }
0x1187   :  { %v1999_v63 = vadd.f32 %v1998_v14, %v1958_v11  ;;  %v2390_v14 = vsub.f32 %v2388_v49, %v2389_v61  ;;  %v2400_v11 = vsub.f32 %v2334_v50, %v2358_v44  ;;  %2386 = vmatpush.msrb.mxu3 %v2385_v35 }
0x1189   :  { %v2029_v38 = vadd.f32 %v2028_v9, %v1999_v63  ;;  %v2391_v63 = vand.u32 4294901760, %v2390_v14  ;;  %v2396_v9 = vsub.f32 %v2394_v34, %v2395_v23 }
0x118b   :  { %v2056_v32 = vadd.f32 %v2055_v36, %v2029_v38  ;;  %v2401_v38 = vand.u32 4294901760, %v2400_v11  ;;  %2392 = vmatpush.msrb.mxu3 %v2391_v63  ;;  %v2397_v36 = vand.u32 4294901760, %v2396_v9  ;;  %v2861_v9 = vld [vmem:[#allocation3 + $0xb8] sm:$0xff] }
0x118c   :  { %v2088_v37 = vpop.f32.mrf.mxu2 }
0x118d   :  { %v2089_v30 = vadd.f32 %v2088_v37, %v2056_v32  ;;  %v2402_v32 = vsub.f32 %v2400_v11, %v2401_v38  ;;  %2398 = vmatpush.msrb.mxu3 %v2397_v36  ;;  %v2860_v36 = vld [vmem:[#allocation3 + $0xb0] sm:$0xff] }
0x118f   :  { %v2114_v31 = vadd.f32 %v2113_v57, %v2089_v30  ;;  %v2403_v37 = vand.u32 4294901760, %v2402_v32  ;;  %v43_v32 = vld [vmem:[%s6660_s1] sm:$0xff]  ;;  %s5625_s1 = smov [#allocation7]  }
0x1190   :  { %s5367_s18 = sshll.u32 %s5625_s1, 4  ;;  %s5368_s18 = int_to_ptr.vmem [resolvable:$true] %s5367_s18 }
0x1191   :  { %5460 = vtanh.f32 %v2114_v31  ;;  %v2116_v3 = vmul.f32 0.5, %v2114_v31  ;;  %2404 = vmatpush.msrb.mxu3 %v2403_v37 }
0x1193   :  { %5462 = vtanh.f32 %v2116_v3 }
0x1197   :  { %v5461_v51 = vpop.eup %5460 }
0x1198   :  { %2123 = vrot.lane.b32.xlu1 %v5461_v51, %s5623_s0 }
0x1199   :  { %v5463_v48 = vpop.eup %5462 }
0x119a   :  { %v2118_v26 = vadd.f32 1.0, %v5463_v48 }
0x119c   :  { %v2119_v59 = vmul.f32 0.5, %v2118_v26 }
0x119e   :  { %v2121_v54 = vmul.f32 %v2119_v59, %v1919_v27  ;;  %v2205_v27 = vsub.f32 %v2203_v12, %v2204_v53  ;;  %v2698_v53 = vld [vmem:[#allocation3 + $0xa0] sm:$0xff] }
0x119f   :  { %v2715_v33 = vand.u32 4294901760, %v2698_v53 }
0x11a0   :  { %v2206_v39 = vand.u32 4294901760, %v2205_v27 }
0x11a1   :  { %v2743_v42 = vsub.f32 %v2698_v53, %v2715_v33 }
0x11a2   :  { %2207 = vmatpush.msra.mxu1 %v2206_v39  ;;  %v2697_v39 = vld [vmem:[#allocation3 + $0x98] sm:$0xff] }
0x11a4   :  { %2213 = vmatpush.msra.mxu1 %v2212_v10  ;;  %v2744_v10 = vand.u32 4294901760, %v2743_v42 }
0x11a6   :  { %2322 = vmatpush.msrb.mxu1 %v2161_v24 }
0x11a8   :  { %2324 = vmatpush.msrb.mxu1 %v2163_v17 }
0x11aa   :  { %2326 = vmatpush.msrb.mxu1 %v2165_v6 }
0x11ac   :  { %2328 = vmatpush.msrb.mxu1 %v2167_v13 }
0x120a   :  { %v2124_v45 = vpop.permute.xlu1 %2123 }
0x120b   :  { %v2126_v47 = vmul.f32 %v2124_v45, %v2119_v59  ;;  %v5411_v45 = vld [vmem:[#allocation3 + $0x50] ss:$0 sm:$0xff] }
0x120d   :  { %2128 = vrot.lane.b32.xlu2 %v2126_v47, %s5624_s15  ;;  %v2531_v47 = vld [vmem:[#allocation3 + $0x88] sm:$0xff] }
0x1267   :  { %v2129_v4 = vpop.permute.xlu2 %2128 }
0x1268   :  { %v2131_v5 = vadd.f32 %v2129_v4, %v2121_v54  ;;  %v2552_v54 = vand.u32 4294901760, %v2531_v47 }
0x126a   :  { %5464 = vtanh.f32 %v2131_v5  ;;  %v2580_v20 = vsub.f32 %v2531_v47, %v2552_v54 }
0x126c   :  { %v2581_v25 = vand.u32 4294901760, %v2580_v20 }
0x126e   :  { %v2582_v41 = vsub.f32 %v2580_v20, %v2581_v25 }
0x1270   :  { %v5465_v8 = vpop.eup %5464 }
0x1271   :  { %2134 = vrot.lane.b32.xlu0 %v5465_v8, %s5623_s0  ;;  %v2530_v8 = vld [vmem:[#allocation3 + $0x80] sm:$0xff] }
0x1272   :  { %v2554_v24 = vand.u32 4294901760, %v2530_v8 }
0x1274   :  { %v2586_v7 = vsub.f32 %v2530_v8, %v2554_v24 }
0x1276   :  { %v2587_v28 = vand.u32 4294901760, %v2586_v7 }
0x1278   :  { %v2588_v2 = vsub.f32 %v2586_v7, %v2587_v28 }
0x127a   :  { %v2589_v13 = vand.u32 4294901760, %v2588_v2 }
0x12e3   :  { %v2135_v55 = vpop.permute.xlu0 %2134 }
0x12e4   :  { %v2137_v56 = vmul.f32 %v2135_v55, %v2119_v59  ;;  %v5412_v55 = vld [vmem:[#allocation3 + $0x78] ss:$0 sm:$0xff] }
0x12e6   :  { %2145 = vrot.lane.b32.xlu1 %v2137_v56, %s5624_s15  ;;  %v2583_v56 = vand.u32 4294901760, %v2582_v41 }
0x1358   :  { %v2146_v30 = vpop.permute.xlu1 %2145 }
0x1359   :  { %v2147_v57 = vsel %vm443_vm2, %v2146_v30, 0  ;;  %v2880_v30 = vand.u32 4294901760, %v2860_v36 }
0x135a   :  { %v2169_v31 = vand.u32 4294901760, %v2147_v57 }
0x135c   :  { %v2170_v51 = vsub.f32 %v2147_v57, %v2169_v31  ;;  %2215 = vmatmul.f32.vlgmr.msra.gmra.mxu1 %v2169_v31 }
0x135d   :  { %2453 = vmatpush.msra.mxu1 %v2352_v1 }
0x135e   :  { %v2171_v3 = vand.u32 4294901760, %v2170_v51  ;;  %2245 = vmatmul.f32.vlgmr.msra.gmra.mxu2 %v2170_v51 }
0x135f   :  { %2455 = vmatpush.msra.mxu1 %v2354_v16  ;;  %2482 = vmatpush.msra.mxu2 %v2383_v43  ;;  %v2745_v43 = vsub.f32 %v2743_v42, %v2744_v10 }
0x1360   :  { %2272 = vmatmul.f32.vlgmr.msra.gmra.mxu3 %v2171_v3  ;;  %v2172_v48 = vsub.f32 %v2170_v51, %v2171_v3 }
0x1361   :  { %2457 = vmatpush.msra.mxu1 %v2356_v22  ;;  %2486 = vmatpush.msra.mxu2 %v2389_v61  ;;  %v2746_v58 = vand.u32 4294901760, %v2745_v43 }
0x1362   :  { %v2173_v26 = vand.u32 4294901760, %v2172_v48  ;;  %2513 = vmatpush.msra.mxu3 %v2352_v1  ;;  %v2717_v1 = vand.u32 4294901760, %v2697_v39 }
0x1363   :  { %2459 = vmatpush.msra.mxu1 %v2358_v44  ;;  %2490 = vmatpush.msra.mxu2 %v2395_v23 }
0x1364   :  { %2174 = vmatmul.f32.vlgmr.msra.gmra.mxu0 %v2173_v26  ;;  %2330 = vmatmul.f32.vlgmr.msrb.gmra.mxu1 %v2169_v31 }
0x1365   :  { %2515 = vmatpush.msra.mxu3 %v2354_v16  ;;  %2424 = vmatpush.msra.mxu0 %v2382_v19  ;;  %v2749_v19 = vsub.f32 %v2697_v39, %v2717_v1 }
0x1366   :  { %2365 = vmatmul.f32.vlgmr.msrb.gmra.mxu2 %v2173_v26  ;;  %2584 = vmatpush.msrb.mxu1 %v2583_v56  ;;  %v3026_v56 = vld [vmem:[#allocation3 + $0xe8] sm:$0xff] }
0x1367   :  { %2494 = vmatpush.msra.mxu2 %v2401_v38  ;;  %2517 = vmatpush.msra.mxu3 %v2356_v22  ;;  %v2750_v22 = vand.u32 4294901760, %v2749_v19  ;;  %v2878_v38 = vand.u32 4294901760, %v2861_v9 }
0x1368   :  { %2406 = vmatmul.f32.vlgmr.msrb.gmra.mxu3 %v2169_v31  ;;  %2427 = vmatpush.msra.mxu0 %v2388_v49 }
0x1369   :  { %2519 = vmatpush.msra.mxu3 %v2358_v44  ;;  %2612 = vmatpush.msrb.mxu2 %v2580_v20  ;;  %v2751_v61 = vsub.f32 %v2749_v19, %v2750_v22 }
0x136a   :  { %2430 = vmatpush.msra.mxu0 %v2394_v34  ;;  %2590 = vmatpush.msrb.mxu1 %v2589_v13  ;;  %v3025_v13 = vld [vmem:[#allocation3 + $0xe0] sm:$0xff] }
0x136b   :  { %2637 = vmatpush.msrb.mxu3 %v2552_v54  ;;  %2615 = vmatpush.msrb.mxu2 %v2586_v7  ;;  %v2752_v35 = vand.u32 4294901760, %v2751_v61 }
0x136c   :  { %2305 = vmatmul.f32.vlgmr.msrb.gmra.mxu0 %v2169_v31  ;;  %2463 = vmatmul.f32.vlgmr.msra.gmra.mxu1 %v2171_v3  ;;  %v2912_v3 = vsub.f32 %v2860_v36, %v2880_v30 }
0x136d   :  { %2433 = vmatpush.msra.mxu0 %v2400_v11  ;;  %2639 = vmatpush.msrb.mxu3 %v2554_v24 }
0x136e   :  { %2496 = vmatmul.f32.vlgmr.msra.gmra.mxu2 %v2169_v31  ;;  %2689 = vmatpush.msra.mxu1 %v2552_v54  ;;  %v2913_v47 = vand.u32 4294901760, %v2912_v3 }
0x136f   :  { %2553 = vmatpush.msrb.mxu0 %v2552_v54  ;;  %2716 = vmatpush.msra.mxu2 %v2715_v33 }
0x1370   :  { %2521 = vmatmul.f32.vlgmr.msra.gmra.mxu3 %v2169_v31  ;;  %2691 = vmatpush.msra.mxu1 %v2554_v24  ;;  %v2906_v31 = vsub.f32 %v2861_v9, %v2878_v38  ;;  %v2914_v8 = vsub.f32 %v2912_v3, %v2913_v47 }
0x1371   :  { %2555 = vmatpush.msrb.mxu0 %v2554_v24  ;;  %2718 = vmatpush.msra.mxu2 %v2717_v1 }
0x1372   :  { %2747 = vmatpush.msra.mxu3 %v2746_v58  ;;  %v2907_v26 = vand.u32 4294901760, %v2906_v31  ;;  %v2915_v24 = vand.u32 4294901760, %v2914_v8 }
0x1374   :  { %2436 = vmatmul.f32.vlgmr.msra.gmra.mxu0 %v2170_v51  ;;  %2753 = vmatpush.msra.mxu3 %v2752_v35  ;;  %v2908_v54 = vsub.f32 %v2906_v31, %v2907_v26 }
0x1375   :  { %2664 = vmatpush.msra.mxu0 %v2581_v25 }
0x1377   :  { %2668 = vmatpush.msra.mxu0 %v2587_v28 }
0x13d9   :  { %v2216_v59 = vpop.f32.mrf.mxu1 }
0x13e1   :  { %v2175_v4 = vpop.f32.mrf.mxu0  ;;  %v2246_v5 = vpop.f32.mrf.mxu2 }
0x13e2   :  { %v2176_v15 = vadd.f32 %v5411_v45, %v2175_v4  ;;  %v2331_v52 = vpop.f32.mrf.mxu1 }
0x13e3   :  { %v2273_v17 = vpop.f32.mrf.mxu3 }
0x13e4   :  { %v2217_v21 = vadd.f32 %v2216_v59, %v2176_v15  ;;  %v2909_v15 = vand.u32 4294901760, %v2908_v54 }
0x13e6   :  { %v2247_v40 = vadd.f32 %v2246_v5, %v2217_v21  ;;  %v3027_v21 = vld [vmem:[#allocation3 + $0xc8] sm:$0xf] }
0x13e7   :  { %v3034_v25 = vsel %vm76_vm0, %v3027_v21, 0 }
0x13e8   :  { %v2274_v29 = vadd.f32 %v2273_v17, %v2247_v40  ;;  %v3051_v7 = vand.u32 4294901760, %v3034_v25 }
0x13e9   :  { %v2306_v6 = vpop.f32.mrf.mxu0  ;;  %v2366_v60 = vpop.f32.mrf.mxu2 }
0x13ea   :  { %v2307_v12 = vadd.f32 %v2306_v6, %v2274_v29  ;;  %v2367_v27 = vadd.f32 %v5412_v55, %v2366_v60  ;;  %v2464_v49 = vpop.f32.mrf.mxu1  ;;  %v3078_v28 = vsub.f32 %v3034_v25, %v3051_v7  ;;  %v6243_v60 = vand.u32 4294901760, %v3026_v56 }
0x13eb   :  { %v2407_v0 = vpop.f32.mrf.mxu3 }
0x13ec   :  { %v2332_v46 = vadd.f32 %v2331_v52, %v2307_v12  ;;  %v2408_v62 = vadd.f32 %v2407_v0, %v2367_v27  ;;  %v5413_v52 = vld [vmem:[#allocation3 + $0x90] ss:$0 sm:$0xff]  ;;  %v3079_v55 = vand.u32 4294901760, %v3078_v28  ;;  %v6249_v27 = vsub.f32 %v3026_v56, %v6243_v60  ;;  %v3024_v0 = vld [vmem:[#allocation3 + $0xd8] sm:$0xff] }
0x13ee   :  { %5347 = vst.msk [vmem:[#allocation7] sm:$0xff] %vm2534_vm3, %v2332_v46  ;;  %v3080_v6 = vsub.f32 %v3078_v28, %v3079_v55 }
0x13ef   :  { %5372 = dma.vmem_to_hbm [thread:$0]  %s5368_s18, 128, %s5370_s21, [#allocation8]  }
0x13f0   :  { %v3081_v53 = vand.u32 4294901760, %v3080_v6 }
0x13f1   :  { %v2437_v16 = vpop.f32.mrf.mxu0  ;;  %v2497_v44 = vpop.f32.mrf.mxu2 }
0x13f2   :  { %v2438_v18 = vadd.f32 %v2437_v16, %v2408_v62  ;;  %v6255_v62 = vand.u32 4294901760, %v3024_v0  ;;  %v3023_v16 = vld [vmem:[#allocation3 + $0xd0] sm:$0xff] }
0x13f3   :  { %v2522_v14 = vpop.f32.mrf.mxu3 }
0x13f4   :  { %v2465_v50 = vadd.f32 %v2464_v49, %v2438_v18  ;;  %v6266_v49 = vand.u32 4294901760, %v3023_v16 }
0x13f6   :  { %v2498_v34 = vadd.f32 %v2497_v44, %v2465_v50  ;;  %v6269_v50 = vsub.f32 %v3024_v0, %v6255_v62  ;;  %v6280_v35 = vsub.f32 %v3023_v16, %v6266_v49 }
0x13f8   :  { %v2523_v23 = vadd.f32 %v2522_v14, %v2498_v34  ;;  %v6277_v34 = vand.u32 4294901760, %v6269_v50  ;;  %v6288_v9 = vand.u32 4294901760, %v6280_v35 }
0x13fa   :  { %v2525_v11 = vmul.f32 0.5, %v2523_v23  ;;  %5348 = vst.msk [vmem:[#allocation9] sm:$0xff] %vm2534_vm3, %v2523_v23 }
0x13fb   :  { %5383 = dma.vmem_to_hbm [thread:$0]  %s5379_s25, 128, %s5381_s27, [#allocation8]  }
0x13fc   :  { %v2526_v63 = vmul.f32 1.442695, %v2525_v11 }
0x13fe   :  { %5466 = vpow2.f32 %v2526_v63  ;;  %v3241_v63 = vsub.f32 %v6269_v50, %v6277_v34 }
0x1404   :  { %v5467_v37 = vpop.eup %5466 }
0x1405   :  { %v2528_v57 = vmul.f32 %v5467_v37, %v43_v32  ;;  %v6291_v32 = vand.u32 4294901760, %v3241_v63  ;;  %v3247_v37 = vsub.f32 %v6280_v35, %v6288_v9 }
0x1407   :  { %v2529_v51 = vadd.f32 %v2528_v57, %v2332_v46  ;;  %v6246_v46 = vand.u32 4294901760, %v3025_v13 }
0x1409   :  { %v2536_v48 = vsel %vm2534_vm3, %v2529_v51, 0  ;;  %v6296_v51 = vand.u32 4294901760, %v3247_v37 }
0x140a   :  { %v2556_v59 = vand.u32 4294901760, %v2536_v48 }
0x140c   :  { %2592 = vmatmul.f32.vlgmr.msrb.gmra.mxu1 %v2556_v59  ;;  %v2557_v45 = vsub.f32 %v2536_v48, %v2556_v59 }
0x140d   :  { %2800 = vmatpush.msrb.mxu1 %v2715_v33 }
0x140e   :  { %2618 = vmatmul.f32.vlgmr.msrb.gmra.mxu2 %v2557_v45  ;;  %v2558_v4 = vand.u32 4294901760, %v2557_v45 }
0x140f   :  { %2827 = vmatpush.msrb.mxu2 %v2744_v10  ;;  %2802 = vmatpush.msrb.mxu1 %v2717_v1  ;;  %v6258_v10 = vsub.f32 %v3025_v13, %v6246_v46 }
0x1410   :  { %2643 = vmatmul.f32.vlgmr.msrb.gmra.mxu3 %v2558_v4  ;;  %v2559_v5 = vsub.f32 %v2557_v45, %v2558_v4 }
0x1411   :  { %2852 = vmatpush.msrb.mxu3 %v2715_v33  ;;  %2831 = vmatpush.msrb.mxu2 %v2750_v22  ;;  %v5414_v33 = vld [vmem:[#allocation3 + $0xa8] ss:$0 sm:$0xff]  ;;  %v6264_v22 = vand.u32 4294901760, %v6258_v10 }
0x1412   :  { %v2560_v20 = vand.u32 4294901760, %v2559_v5 }
0x1413   :  { %2854 = vmatpush.msrb.mxu3 %v2717_v1  ;;  %v6253_v1 = vand.u32 4294901760, %v6249_v27  ;;  %v3235_v44 = vsub.f32 %v6258_v10, %v6264_v22 }
0x1414   :  { %2561 = vmatmul.f32.vlgmr.msrb.gmra.mxu0 %v2560_v20  ;;  %2693 = vmatmul.f32.vlgmr.msra.gmra.mxu1 %v2556_v59 }
0x1415   :  { %2775 = vmatpush.msrb.mxu0 %v2743_v42  ;;  %2910 = vmatpush.msra.mxu1 %v2909_v15  ;;  %v3229_v43 = vsub.f32 %v6249_v27, %v6253_v1  ;;  %v6283_v11 = vand.u32 4294901760, %v3235_v44 }
0x1416   :  { %2724 = vmatmul.f32.vlgmr.msra.gmra.mxu2 %v2560_v20 }
0x1417   :  { %2778 = vmatpush.msrb.mxu0 %v2749_v19  ;;  %2938 = vmatpush.msra.mxu2 %v2906_v31  ;;  %v6271_v61 = vand.u32 4294901760, %v3229_v43 }
0x1418   :  { %2755 = vmatmul.f32.vlgmr.msra.gmra.mxu3 %v2556_v59  ;;  %2916 = vmatpush.msra.mxu1 %v2915_v24 }
0x1419   :  { %2963 = vmatpush.msra.mxu3 %v2878_v38  ;;  %2941 = vmatpush.msra.mxu2 %v2912_v3 }
0x141b   :  { %2965 = vmatpush.msra.mxu3 %v2880_v30 }
0x141c   :  { %2670 = vmatmul.f32.vlgmr.msra.gmra.mxu0 %v2556_v59  ;;  %2806 = vmatmul.f32.vlgmr.msrb.gmra.mxu1 %v2558_v4 }
0x141d   :  { %2879 = vmatpush.msra.mxu0 %v2878_v38  ;;  %3015 = vmatpush.msrb.mxu1 %v2878_v38 }
0x141e   :  { %2833 = vmatmul.f32.vlgmr.msrb.gmra.mxu2 %v2556_v59 }
0x141f   :  { %2881 = vmatpush.msra.mxu0 %v2880_v30  ;;  %3017 = vmatpush.msrb.mxu1 %v2880_v30 }
0x1420   :  { %2856 = vmatmul.f32.vlgmr.msrb.gmra.mxu3 %v2556_v59  ;;  %3052 = vmatpush.msrb.mxu2 %v3051_v7 }
0x1421   :  { %3082 = vmatpush.msrb.mxu3 %v3081_v53 }
0x1424   :  { %2781 = vmatmul.f32.vlgmr.msrb.gmra.mxu0 %v2557_v45  ;;  %2918 = vmatmul.f32.vlgmr.msra.gmra.mxu1 %v2556_v59 }
0x1425   :  { %2990 = vmatpush.msrb.mxu0 %v2907_v26  ;;  %3128 = vmatpush.msra.mxu1 %v3051_v7 }
0x1426   :  { %2944 = vmatmul.f32.vlgmr.msra.gmra.mxu2 %v2557_v45  ;;  %v5415_v45 = vld [vmem:[#allocation3 + $0xc0] ss:$0 sm:$0xff] }
0x1427   :  { %2994 = vmatpush.msrb.mxu0 %v2913_v47  ;;  %3154 = vmatpush.msra.mxu2 %v3079_v55 }
0x1428   :  { %2969 = vmatmul.f32.vlgmr.msra.gmra.mxu3 %v2558_v4 }
0x1429   :  { %3176 = vmatpush.msra.mxu3 %v3051_v7 }
0x142c   :  { %2887 = vmatmul.f32.vlgmr.msra.gmra.mxu0 %v2560_v20  ;;  %3019 = vmatmul.f32.vlgmr.msrb.gmra.mxu1 %v2556_v59 }
0x142d   :  { %3105 = vmatpush.msra.mxu0 %v3078_v28  ;;  %3231 = vmatpush.msrb.mxu1 %v6271_v61 }
0x142f   :  { %3237 = vmatpush.msrb.mxu1 %v6283_v11 }
0x1431   :  { %3243 = vmatpush.msrb.mxu1 %v6291_v32 }
0x1433   :  { %3249 = vmatpush.msrb.mxu1 %v6296_v51 }
0x1434   :  { %2996 = vmatmul.f32.vlgmr.msrb.gmra.mxu0 %v2556_v59 }
0x1435   :  { %3198 = vmatpush.msrb.mxu0 %v6243_v60 }
0x1437   :  { %3200 = vmatpush.msrb.mxu0 %v6246_v46 }
0x1439   :  { %3202 = vmatpush.msrb.mxu0 %v6255_v62 }
0x143b   :  { %3204 = vmatpush.msrb.mxu0 %v6266_v49 }
0x1489   :  { %v2593_v17 = vpop.f32.mrf.mxu1 }
0x1491   :  { %v2562_v40 = vpop.f32.mrf.mxu0  ;;  %v2619_v41 = vpop.f32.mrf.mxu2 }
0x1492   :  { %v2694_v2 = vpop.f32.mrf.mxu1  ;;  %v2563_v12 = vadd.f32 %v5413_v52, %v2562_v40 }
0x1493   :  { %v2644_v29 = vpop.f32.mrf.mxu3 }
0x1494   :  { %v2594_v19 = vadd.f32 %v2593_v17, %v2563_v12 }
0x1496   :  { %v2620_v14 = vadd.f32 %v2619_v41, %v2594_v19 }
0x1498   :  { %v2645_v30 = vadd.f32 %v2644_v29, %v2620_v14 }
0x1499   :  { %v2671_v39 = vpop.f32.mrf.mxu0  ;;  %v2725_v42 = vpop.f32.mrf.mxu2 }
0x149a   :  { %v2726_v58 = vadd.f32 %v5414_v33, %v2725_v42  ;;  %v2807_v23 = vpop.f32.mrf.mxu1  ;;  %v2672_v26 = vadd.f32 %v2671_v39, %v2645_v30  ;;  %v5416_v39 = vld [vmem:[#allocation3 + $0xf0] ss:$0 sm:$0xff] }
0x149b   :  { %v2756_v18 = vpop.f32.mrf.mxu3 }
0x149c   :  { %v2757_v38 = vadd.f32 %v2756_v18, %v2726_v58  ;;  %v2695_v5 = vadd.f32 %v2694_v2, %v2672_v26 }
0x149e   :  { %v3183_v24 = vsel %vm443_vm2, %v2695_v5, 0 }
0x149f   :  { %v3205_v7 = vand.u32 4294901760, %v3183_v24 }
0x14a1   :  { %v2782_v36 = vpop.f32.mrf.mxu0  ;;  %v2834_v31 = vpop.f32.mrf.mxu2  ;;  %v3206_v29 = vsub.f32 %v3183_v24, %v3205_v7 }
0x14a2   :  { %v2783_v57 = vadd.f32 %v2782_v36, %v2757_v38  ;;  %v2919_v54 = vpop.f32.mrf.mxu1 }
0x14a3   :  { %v2857_v48 = vpop.f32.mrf.mxu3  ;;  %v3207_v2 = vand.u32 4294901760, %v3206_v29 }
0x14a4   :  { %v2808_v3 = vadd.f32 %v2807_v23, %v2783_v57 }
0x14a5   :  { %v3208_v13 = vsub.f32 %v3206_v29, %v3207_v2 }
0x14a6   :  { %v2835_v59 = vadd.f32 %v2834_v31, %v2808_v3 }
0x14a7   :  { %v3209_v0 = vand.u32 4294901760, %v3208_v13 }
0x14a8   :  { %v2858_v47 = vadd.f32 %v2857_v48, %v2835_v59 }
0x14a9   :  { %v2888_v4 = vpop.f32.mrf.mxu0  ;;  %v2945_v20 = vpop.f32.mrf.mxu2 }
0x14aa   :  { %v2889_v8 = vadd.f32 %v5415_v45, %v2888_v4  ;;  %3376 = vrot.lane.b32.xlu0 %v2858_v47, %s5624_s15  ;;  %v3020_v28 = vpop.f32.mrf.mxu1 }
0x14ab   :  { %v2970_v21 = vpop.f32.mrf.mxu3 }
0x14ac   :  { %v2920_v15 = vadd.f32 %v2919_v54, %v2889_v8 }
0x14ae   :  { %v2946_v17 = vadd.f32 %v2945_v20, %v2920_v15 }
0x14b0   :  { %v2971_v25 = vadd.f32 %v2970_v21, %v2946_v17 }
0x14b1   :  { %v2997_v40 = vpop.f32.mrf.mxu0 }
0x14b2   :  { %v2998_v41 = vadd.f32 %v2997_v40, %v2971_v25 }
0x14b4   :  { %v3021_v52 = vadd.f32 %v3020_v28, %v2998_v41 }
0x14b6   :  { %v3031_v55 = vsel %vm51_vm1, %v3021_v52, 0 }
0x14b7   :  { %v3053_v56 = vand.u32 4294901760, %v3031_v55 }
0x14b9   :  { %v3054_v6 = vsub.f32 %v3031_v55, %v3053_v56  ;;  %3084 = vmatmul.f32.vlgmr.msrb.gmra.mxu3 %v3053_v56 }
0x14ba   :  { %3298 = vmatpush.msrb.mxu3 %v6243_v60 }
0x14bb   :  { %v3055_v12 = vand.u32 4294901760, %v3054_v6  ;;  %3108 = vmatmul.f32.vlgmr.msra.gmra.mxu0 %v3054_v6 }
0x14bc   :  { %3300 = vmatpush.msrb.mxu3 %v6246_v46  ;;  %3327 = vmatpush.msra.mxu0 %v6253_v1 }
0x14bd   :  { %v3056_v53 = vsub.f32 %v3054_v6, %v3055_v12  ;;  %3132 = vmatmul.f32.vlgmr.msra.gmra.mxu1 %v3055_v12 }
0x14be   :  { %3302 = vmatpush.msrb.mxu3 %v6255_v62  ;;  %3331 = vmatpush.msra.mxu0 %v6264_v22 }
0x14bf   :  { %v3057_v33 = vand.u32 4294901760, %v3056_v53  ;;  %3358 = vmatpush.msra.mxu1 %v6243_v60 }
0x14c0   :  { %3304 = vmatpush.msrb.mxu3 %v6266_v49  ;;  %3335 = vmatpush.msra.mxu0 %v6277_v34 }
0x14c1   :  { %3058 = vmatmul.f32.vlgmr.msrb.gmra.mxu2 %v3057_v33  ;;  %3178 = vmatmul.f32.vlgmr.msra.gmra.mxu3 %v3053_v56 }
0x14c2   :  { %3360 = vmatpush.msra.mxu1 %v6246_v46  ;;  %3269 = vmatpush.msrb.mxu2 %v6249_v27 }
0x14c3   :  { %3210 = vmatmul.f32.vlgmr.msrb.gmra.mxu0 %v3209_v0  ;;  %3449 = vmatpush.msra.mxu3 %v6271_v61 }
0x14c4   :  { %3339 = vmatpush.msra.mxu0 %v6288_v9  ;;  %3362 = vmatpush.msra.mxu1 %v6255_v62 }
0x14c5   :  { %3251 = vmatmul.f32.vlgmr.msrb.gmra.mxu1 %v3205_v7  ;;  %3272 = vmatpush.msrb.mxu2 %v6258_v10 }
0x14c6   :  { %3364 = vmatpush.msra.mxu1 %v6266_v49  ;;  %3455 = vmatpush.msra.mxu3 %v6283_v11 }
0x14c7   :  { %3275 = vmatpush.msrb.mxu2 %v6269_v50  ;;  %3487 = vmatpush.msrb.mxu0 %v6249_v27 }
0x14c8   :  { %3461 = vmatpush.msra.mxu3 %v6291_v32  ;;  %3516 = vmatpush.msrb.mxu1 %v6243_v60 }
0x14c9   :  { %3156 = vmatmul.f32.vlgmr.msra.gmra.mxu2 %v3053_v56  ;;  %3308 = vmatmul.f32.vlgmr.msrb.gmra.mxu3 %v3207_v2 }
0x14ca   :  { %3278 = vmatpush.msrb.mxu2 %v6280_v35  ;;  %3490 = vmatpush.msrb.mxu0 %v6258_v10 }
0x14cb   :  { %3341 = vmatmul.f32.vlgmr.msra.gmra.mxu0 %v3205_v7  ;;  %3467 = vmatpush.msra.mxu3 %v6296_v51 }
0x14cc   :  { %3493 = vmatpush.msrb.mxu0 %v6269_v50  ;;  %3518 = vmatpush.msrb.mxu1 %v6246_v46 }
0x14cd   :  { %3366 = vmatmul.f32.vlgmr.msra.gmra.mxu1 %v3205_v7  ;;  %3416 = vmatpush.msra.mxu2 %v6243_v60 }
0x14ce   :  { %3496 = vmatpush.msrb.mxu0 %v6280_v35  ;;  %3520 = vmatpush.msrb.mxu1 %v6255_v62 }
0x14cf   :  { %3576 = vmatpush.msrb.mxu3 %v6243_v60  ;;  %3418 = vmatpush.msra.mxu2 %v6246_v46 }
0x14d0   :  { %3522 = vmatpush.msrb.mxu1 %v6266_v49  ;;  %3630 = vmatpush.msra.mxu0 %v6243_v60 }
0x14d1   :  { %3281 = vmatmul.f32.vlgmr.msrb.gmra.mxu2 %v3206_v29  ;;  %3578 = vmatpush.msrb.mxu3 %v6246_v46 }
0x14d2   :  { %3420 = vmatpush.msra.mxu2 %v6255_v62  ;;  %3663 = vmatpush.msra.mxu1 %v6271_v61 }
0x14d3   :  { %3580 = vmatpush.msrb.mxu3 %v6255_v62  ;;  %3632 = vmatpush.msra.mxu0 %v6246_v46 }
0x14d4   :  { %3422 = vmatpush.msra.mxu2 %v6266_v49  ;;  %3669 = vmatpush.msra.mxu1 %v6283_v11 }
0x14d5   :  { %3582 = vmatpush.msrb.mxu3 %v6266_v49  ;;  %3634 = vmatpush.msra.mxu0 %v6255_v62 }
0x14d6   :  { %3545 = vmatpush.msrb.mxu2 %v6253_v1  ;;  %3675 = vmatpush.msra.mxu1 %v6291_v32 }
0x14d7   :  { %3636 = vmatpush.msra.mxu0 %v6266_v49 }
0x14d8   :  { %3549 = vmatpush.msrb.mxu2 %v6264_v22  ;;  %3681 = vmatpush.msra.mxu1 %v6296_v51 }
0x14da   :  { %3553 = vmatpush.msrb.mxu2 %v6277_v34 }
0x14dc   :  { %3557 = vmatpush.msrb.mxu2 %v6288_v9 }
0x151c   :  { %v3377_v25 = vpop.permute.xlu0 %3376 }
0x1538   :  { %v3109_v19 = vpop.f32.mrf.mxu0 }
0x153a   :  { %v3133_v43 = vpop.f32.mrf.mxu1 }
0x153c   :  { %v3085_v42 = vpop.f32.mrf.mxu3 }
0x1540   :  { %v3211_v36 = vpop.f32.mrf.mxu0 }
0x1542   :  { %v3252_v30 = vpop.f32.mrf.mxu1 }
0x1544   :  { %v3059_v16 = vpop.f32.mrf.mxu2  ;;  %v3179_v23 = vpop.f32.mrf.mxu3 }
0x1545   :  { %v3060_v18 = vadd.f32 %v5416_v39, %v3059_v16 }
0x1547   :  { %v3086_v58 = vadd.f32 %v3085_v42, %v3060_v18 }
0x1548   :  { %v3342_v45 = vpop.f32.mrf.mxu0 }
0x1549   :  { %v3110_v44 = vadd.f32 %v3109_v19, %v3086_v58 }
0x154a   :  { %v3367_v54 = vpop.f32.mrf.mxu1 }
0x154b   :  { %v3134_v14 = vadd.f32 %v3133_v43, %v3110_v44 }
0x154c   :  { %v3157_v63 = vpop.f32.mrf.mxu2  ;;  %v3309_v26 = vpop.f32.mrf.mxu3 }
0x154d   :  { %v3158_v38 = vadd.f32 %v3157_v63, %v3134_v14 }
0x154f   :  { %v6350_v37 = vadd.f32 %v3179_v23, %v3158_v38 }
0x1551   :  { %v3212_v57 = vadd.f32 %v3211_v36, %v6350_v37 }
0x1553   :  { %v3253_v31 = vadd.f32 %v3252_v30, %v3212_v57 }
0x1554   :  { %v3282_v3 = vpop.f32.mrf.mxu2 }
0x1555   :  { %v3283_v48 = vadd.f32 %v3282_v3, %v3253_v31 }
0x1557   :  { %v3310_v59 = vadd.f32 %v3309_v26, %v3283_v48 }
0x1559   :  { %v3343_v47 = vadd.f32 %v3342_v45, %v3310_v59 }
0x155b   :  { %v3368_v4 = vadd.f32 %v3367_v54, %v3343_v47 }
0x155d   :  { %5468 = vtanh.f32 %v3368_v4  ;;  %v3370_v8 = vmul.f32 0.5, %v3368_v4 }
0x155f   :  { %5470 = vtanh.f32 %v3370_v8 }
0x1563   :  { %v5469_v5 = vpop.eup %5468 }
0x1564   :  { %3381 = vrot.lane.b32.xlu2 %v5469_v5, %s5623_s0 }
0x1565   :  { %v5471_v15 = vpop.eup %5470 }
0x1566   :  { %v3372_v20 = vadd.f32 1.0, %v5471_v15 }
0x1568   :  { %v3373_v24 = vmul.f32 0.5, %v3372_v20 }
0x156a   :  { %v3379_v7 = vmul.f32 %v3377_v25, %v3373_v24 }
0x15be   :  { %v3382_v17 = vpop.permute.xlu2 %3381 }
0x15bf   :  { %v3384_v21 = vmul.f32 %v3382_v17, %v3373_v24 }
0x15c1   :  { %3386 = vrot.lane.b32.xlu1 %v3384_v21, %s5624_s15 }
0x1633   :  { %v3387_v40 = vpop.permute.xlu1 %3386 }
0x1634   :  { %v6355_v41 = vadd.f32 %v3387_v40, %v3379_v7 }
0x1636   :  { %5472 = vtanh.f32 %v6355_v41 }
0x163c   :  { %v5473_v28 = vpop.eup %5472 }
0x163d   :  { %3392 = vrot.lane.b32.xlu2 %v5473_v28, %s5623_s0 }
0x1697   :  { %v3393_v52 = vpop.permute.xlu2 %3392 }
0x1698   :  { %v3395_v29 = vmul.f32 %v3393_v52, %v3373_v24 }
0x169a   :  { %3397 = vrot.lane.b32.xlu0 %v3395_v29, %s5624_s15 }
0x170c   :  { %v3398_v55 = vpop.permute.xlu0 %3397 }
0x170d   :  { %3400 = vst.msk [vmem:[#allocation2] sm:$0xff] %vm443_vm2, %v3398_v55  ;;  %v3401_v56 = vsel %vm443_vm2, %v3398_v55, 0 }
0x170e   :  { %v3423_v2 = vand.u32 4294901760, %v3401_v56 }
0x1710   :  { %v3424_v6 = vsub.f32 %v3401_v56, %v3423_v2  ;;  %3469 = vmatmul.f32.vlgmr.msra.gmra.mxu3 %v3423_v2 }
0x1711   :  { %3730 = vmatpush.msra.mxu3 %v6243_v60 }
0x1712   :  { %v3425_v12 = vand.u32 4294901760, %v3424_v6  ;;  %3499 = vmatmul.f32.vlgmr.msrb.gmra.mxu0 %v3424_v6 }
0x1713   :  { %3732 = vmatpush.msra.mxu3 %v6246_v46  ;;  %3759 = vmatpush.msrb.mxu0 %v6253_v1 }
0x1714   :  { %v3426_v13 = vsub.f32 %v3424_v6, %v3425_v12  ;;  %3526 = vmatmul.f32.vlgmr.msrb.gmra.mxu1 %v3425_v12 }
0x1715   :  { %3734 = vmatpush.msra.mxu3 %v6255_v62  ;;  %3790 = vmatpush.msrb.mxu1 %v6243_v60 }
0x1716   :  { %v3427_v53 = vand.u32 4294901760, %v3426_v13  ;;  %3763 = vmatpush.msrb.mxu0 %v6264_v22 }
0x1717   :  { %3736 = vmatpush.msra.mxu3 %v6266_v49  ;;  %3792 = vmatpush.msrb.mxu1 %v6246_v46 }
0x1718   :  { %3428 = vmatmul.f32.vlgmr.msra.gmra.mxu2 %v3427_v53  ;;  %3584 = vmatmul.f32.vlgmr.msrb.gmra.mxu3 %v3423_v2 }
0x1719   :  { %3701 = vmatpush.msra.mxu2 %v6249_v27  ;;  %3794 = vmatpush.msrb.mxu1 %v6255_v62 }
0x171a   :  { %3767 = vmatpush.msrb.mxu0 %v6277_v34  ;;  %3877 = vmatpush.msrb.mxu3 %v6271_v61 }
0x171b   :  { %3704 = vmatpush.msra.mxu2 %v6258_v10  ;;  %3796 = vmatpush.msrb.mxu1 %v6266_v49 }
0x171c   :  { %3771 = vmatpush.msrb.mxu0 %v6288_v9  ;;  %3883 = vmatpush.msrb.mxu3 %v6283_v11 }
0x171d   :  { %3707 = vmatpush.msra.mxu2 %v6269_v50 }
0x171e   :  { %3889 = vmatpush.msrb.mxu3 %v6291_v32 }
0x171f   :  { %3710 = vmatpush.msra.mxu2 %v6280_v35 }
0x1720   :  { %3559 = vmatmul.f32.vlgmr.msrb.gmra.mxu2 %v3423_v2  ;;  %3895 = vmatpush.msrb.mxu3 %v6296_v51 }
0x1721   :  { %3844 = vmatpush.msrb.mxu2 %v6243_v60 }
0x1723   :  { %3846 = vmatpush.msrb.mxu2 %v6246_v46 }
0x1725   :  { %3848 = vmatpush.msrb.mxu2 %v6255_v62 }
0x1727   :  { %3850 = vmatpush.msrb.mxu2 %v6266_v49 }
0x178f   :  { %v3500_v19 = vpop.f32.mrf.mxu0 }
0x1791   :  { %v3527_v18 = vpop.f32.mrf.mxu1 }
0x1793   :  { %v3470_v33 = vpop.f32.mrf.mxu3 }
0x179b   :  { %v3429_v0 = vpop.f32.mrf.mxu2  ;;  %v3585_v14 = vpop.f32.mrf.mxu3 }
0x179c   :  { %v3430_v39 = vadd.f32 %v3429_v0, %v6350_v37 }
0x179e   :  { %v3471_v42 = vadd.f32 %v3470_v33, %v3430_v39 }
0x17a0   :  { %v3501_v16 = vadd.f32 %v3500_v19, %v3471_v42 }
0x17a2   :  { %v3528_v43 = vadd.f32 %v3527_v18, %v3501_v16 }
0x17a3   :  { %v3560_v58 = vpop.f32.mrf.mxu2 }
0x17a4   :  { %v3561_v44 = vadd.f32 %v3560_v58, %v3528_v43 }
0x17a6   :  { %v3586_v23 = vadd.f32 %v3585_v14, %v3561_v44 }
0x17a8   :  { %5474 = vtanh.f32 %v3586_v23  ;;  %v3588_v38 = vmul.f32 0.5, %v3586_v23 }
0x17aa   :  { %5476 = vtanh.f32 %v3588_v38 }
0x17ae   :  { %v5475_v63 = vpop.eup %5474 }
0x17af   :  { %3595 = vrot.lane.b32.xlu1 %v5475_v63, %s5623_s0 }
0x17b0   :  { %v5477_v36 = vpop.eup %5476 }
0x17b1   :  { %v3590_v30 = vadd.f32 1.0, %v5477_v36 }
0x17b3   :  { %v3591_v57 = vmul.f32 0.5, %v3590_v30 }
0x17b5   :  { %v3593_v48 = vmul.f32 %v3591_v57, %v6355_v41 }
0x1821   :  { %v3596_v31 = vpop.permute.xlu1 %3595 }
0x1822   :  { %v3598_v3 = vmul.f32 %v3596_v31, %v3591_v57 }
0x1824   :  { %3600 = vrot.lane.b32.xlu2 %v3598_v3, %s5624_s15 }
0x187e   :  { %v3601_v26 = vpop.permute.xlu2 %3600 }
0x187f   :  { %v6390_v59 = vadd.f32 %v3601_v26, %v3593_v48 }
0x1881   :  { %5478 = vtanh.f32 %v6390_v59 }
0x1887   :  { %v5479_v45 = vpop.eup %5478 }
0x1888   :  { %3606 = vrot.lane.b32.xlu0 %v5479_v45, %s5623_s0 }
0x18fa   :  { %v3607_v47 = vpop.permute.xlu0 %3606 }
0x18fb   :  { %v3609_v54 = vmul.f32 %v3607_v47, %v3591_v57 }
0x18fd   :  { %3611 = vrot.lane.b32.xlu1 %v3609_v54, %s5624_s15 }
0x196f   :  { %v3612_v4 = vpop.permute.xlu1 %3611 }
0x1970   :  { %3614 = vst.msk [vmem:[#allocation2 + $0x8] sm:$0xff] %vm443_vm2, %v3612_v4  ;;  %v3615_v5 = vsel %vm443_vm2, %v3612_v4, 0 }
0x1971   :  { %v3637_v8 = vand.u32 4294901760, %v3615_v5 }
0x1973   :  { %v3638_v15 = vsub.f32 %v3615_v5, %v3637_v8  ;;  %3683 = vmatmul.f32.vlgmr.msra.gmra.mxu1 %v3637_v8 }
0x1974   :  { %3944 = vmatpush.msra.mxu1 %v6243_v60 }
0x1975   :  { %v3639_v20 = vand.u32 4294901760, %v3638_v15  ;;  %3713 = vmatmul.f32.vlgmr.msra.gmra.mxu2 %v3638_v15 }
0x1976   :  { %3946 = vmatpush.msra.mxu1 %v6246_v46  ;;  %3973 = vmatpush.msra.mxu2 %v6253_v1 }
0x1977   :  { %v3640_v24 = vsub.f32 %v3638_v15, %v3639_v20  ;;  %3740 = vmatmul.f32.vlgmr.msra.gmra.mxu3 %v3639_v20 }
0x1978   :  { %3948 = vmatpush.msra.mxu1 %v6255_v62  ;;  %4004 = vmatpush.msra.mxu3 %v6243_v60 }
0x1979   :  { %v3641_v17 = vand.u32 4294901760, %v3640_v24  ;;  %3977 = vmatpush.msra.mxu2 %v6264_v22 }
0x197a   :  { %3950 = vmatpush.msra.mxu1 %v6266_v49  ;;  %4006 = vmatpush.msra.mxu3 %v6246_v46 }
0x197b   :  { %3642 = vmatmul.f32.vlgmr.msra.gmra.mxu0 %v3641_v17  ;;  %3798 = vmatmul.f32.vlgmr.msrb.gmra.mxu1 %v3637_v8 }
0x197c   :  { %3915 = vmatpush.msra.mxu0 %v6249_v27  ;;  %4008 = vmatpush.msra.mxu3 %v6255_v62 }
0x197d   :  { %3981 = vmatpush.msra.mxu2 %v6277_v34  ;;  %4091 = vmatpush.msrb.mxu1 %v6271_v61 }
0x197e   :  { %3918 = vmatpush.msra.mxu0 %v6258_v10  ;;  %4010 = vmatpush.msra.mxu3 %v6266_v49 }
0x197f   :  { %3985 = vmatpush.msra.mxu2 %v6288_v9  ;;  %4097 = vmatpush.msrb.mxu1 %v6283_v11 }
0x1980   :  { %3921 = vmatpush.msra.mxu0 %v6269_v50 }
0x1981   :  { %4103 = vmatpush.msrb.mxu1 %v6291_v32 }
0x1982   :  { %3924 = vmatpush.msra.mxu0 %v6280_v35 }
0x1983   :  { %3773 = vmatmul.f32.vlgmr.msrb.gmra.mxu0 %v3637_v8  ;;  %4109 = vmatpush.msrb.mxu1 %v6296_v51 }
0x1984   :  { %4058 = vmatpush.msrb.mxu0 %v6243_v60 }
0x1986   :  { %4060 = vmatpush.msrb.mxu0 %v6246_v46 }
0x1988   :  { %4062 = vmatpush.msrb.mxu0 %v6255_v62 }
0x198a   :  { %4064 = vmatpush.msrb.mxu0 %v6266_v49 }
0x19f0   :  { %v3684_v21 = vpop.f32.mrf.mxu1 }
0x19f8   :  { %v3643_v25 = vpop.f32.mrf.mxu0  ;;  %v3714_v41 = vpop.f32.mrf.mxu2 }
0x19f9   :  { %v3644_v7 = vadd.f32 %v3643_v25, %v6350_v37  ;;  %v3799_v2 = vpop.f32.mrf.mxu1 }
0x19fa   :  { %v3741_v52 = vpop.f32.mrf.mxu3 }
0x19fb   :  { %v3685_v40 = vadd.f32 %v3684_v21, %v3644_v7 }
0x19fd   :  { %v3715_v28 = vadd.f32 %v3714_v41, %v3685_v40 }
0x19ff   :  { %v3742_v29 = vadd.f32 %v3741_v52, %v3715_v28 }
0x1a00   :  { %v3774_v55 = vpop.f32.mrf.mxu0 }
0x1a01   :  { %v3775_v56 = vadd.f32 %v3774_v55, %v3742_v29 }
0x1a03   :  { %v3800_v6 = vadd.f32 %v3799_v2, %v3775_v56 }
0x1a05   :  { %5480 = vtanh.f32 %v3800_v6  ;;  %v3802_v13 = vmul.f32 0.5, %v3800_v6 }
0x1a07   :  { %5482 = vtanh.f32 %v3802_v13 }
0x1a0b   :  { %v5481_v12 = vpop.eup %5480 }
0x1a0c   :  { %3809 = vrot.lane.b32.xlu2 %v5481_v12, %s5623_s0 }
0x1a0d   :  { %v5483_v53 = vpop.eup %5482 }
0x1a0e   :  { %v3804_v33 = vadd.f32 1.0, %v5483_v53 }
0x1a10   :  { %v3805_v0 = vmul.f32 0.5, %v3804_v33 }
0x1a12   :  { %v3807_v19 = vmul.f32 %v3805_v0, %v6390_v59 }
0x1a66   :  { %v3810_v39 = vpop.permute.xlu2 %3809 }
0x1a67   :  { %v3812_v42 = vmul.f32 %v3810_v39, %v3805_v0 }
0x1a69   :  { %3814 = vrot.lane.b32.xlu0 %v3812_v42, %s5624_s15 }
0x1adb   :  { %v3815_v16 = vpop.permute.xlu0 %3814 }
0x1adc   :  { %v6425_v18 = vadd.f32 %v3815_v16, %v3807_v19 }
0x1ade   :  { %5484 = vtanh.f32 %v6425_v18 }
0x1ae4   :  { %v5485_v43 = vpop.eup %5484 }
0x1ae5   :  { %3820 = vrot.lane.b32.xlu1 %v5485_v43, %s5623_s0 }
0x1b57   :  { %v3821_v58 = vpop.permute.xlu1 %3820 }
0x1b58   :  { %v3823_v44 = vmul.f32 %v3821_v58, %v3805_v0 }
0x1b5a   :  { %3825 = vrot.lane.b32.xlu2 %v3823_v44, %s5624_s15 }
0x1bb4   :  { %v3826_v14 = vpop.permute.xlu2 %3825 }
0x1bb5   :  { %3828 = vst.msk [vmem:[#allocation2 + $0x10] sm:$0xff] %vm443_vm2, %v3826_v14  ;;  %v3829_v23 = vsel %vm443_vm2, %v3826_v14, 0 }
0x1bb6   :  { %v3851_v63 = vand.u32 4294901760, %v3829_v23 }
0x1bb8   :  { %v3852_v38 = vsub.f32 %v3829_v23, %v3851_v63  ;;  %3897 = vmatmul.f32.vlgmr.msrb.gmra.mxu3 %v3851_v63 }
0x1bb9   :  { %4158 = vmatpush.msrb.mxu3 %v6243_v60 }
0x1bba   :  { %v3853_v36 = vand.u32 4294901760, %v3852_v38  ;;  %3927 = vmatmul.f32.vlgmr.msra.gmra.mxu0 %v3852_v38 }
0x1bbb   :  { %4160 = vmatpush.msrb.mxu3 %v6246_v46  ;;  %4187 = vmatpush.msra.mxu0 %v6253_v1 }
0x1bbc   :  { %v3854_v30 = vsub.f32 %v3852_v38, %v3853_v36  ;;  %3954 = vmatmul.f32.vlgmr.msra.gmra.mxu1 %v3853_v36 }
0x1bbd   :  { %4162 = vmatpush.msrb.mxu3 %v6255_v62  ;;  %4218 = vmatpush.msra.mxu1 %v6243_v60 }
0x1bbe   :  { %v3855_v57 = vand.u32 4294901760, %v3854_v30  ;;  %4191 = vmatpush.msra.mxu0 %v6264_v22 }
0x1bbf   :  { %4164 = vmatpush.msrb.mxu3 %v6266_v49  ;;  %4220 = vmatpush.msra.mxu1 %v6246_v46 }
0x1bc0   :  { %3856 = vmatmul.f32.vlgmr.msrb.gmra.mxu2 %v3855_v57  ;;  %4012 = vmatmul.f32.vlgmr.msra.gmra.mxu3 %v3851_v63 }
0x1bc1   :  { %4129 = vmatpush.msrb.mxu2 %v6249_v27  ;;  %4222 = vmatpush.msra.mxu1 %v6255_v62 }
0x1bc2   :  { %4195 = vmatpush.msra.mxu0 %v6277_v34  ;;  %4305 = vmatpush.msra.mxu3 %v6271_v61 }
0x1bc3   :  { %4132 = vmatpush.msrb.mxu2 %v6258_v10  ;;  %4224 = vmatpush.msra.mxu1 %v6266_v49 }
0x1bc4   :  { %4199 = vmatpush.msra.mxu0 %v6288_v9  ;;  %4311 = vmatpush.msra.mxu3 %v6283_v11 }
0x1bc5   :  { %4135 = vmatpush.msrb.mxu2 %v6269_v50 }
0x1bc6   :  { %4317 = vmatpush.msra.mxu3 %v6291_v32 }
0x1bc7   :  { %4138 = vmatpush.msrb.mxu2 %v6280_v35 }
0x1bc8   :  { %3987 = vmatmul.f32.vlgmr.msra.gmra.mxu2 %v3851_v63  ;;  %4323 = vmatpush.msra.mxu3 %v6296_v51 }
0x1bc9   :  { %4272 = vmatpush.msra.mxu2 %v6243_v60 }
0x1bcb   :  { %4274 = vmatpush.msra.mxu2 %v6246_v46 }
0x1bcd   :  { %4276 = vmatpush.msra.mxu2 %v6255_v62 }
0x1bcf   :  { %4278 = vmatpush.msra.mxu2 %v6266_v49 }
0x1c37   :  { %v3928_v59 = vpop.f32.mrf.mxu0 }
0x1c39   :  { %v3955_v47 = vpop.f32.mrf.mxu1 }
0x1c3b   :  { %v3898_v31 = vpop.f32.mrf.mxu3 }
0x1c43   :  { %v3857_v3 = vpop.f32.mrf.mxu2  ;;  %v4013_v8 = vpop.f32.mrf.mxu3 }
0x1c44   :  { %v3858_v48 = vadd.f32 %v3857_v3, %v6350_v37 }
0x1c46   :  { %v3899_v26 = vadd.f32 %v3898_v31, %v3858_v48 }
0x1c48   :  { %v3929_v45 = vadd.f32 %v3928_v59, %v3899_v26 }
0x1c4a   :  { %v3956_v54 = vadd.f32 %v3955_v47, %v3929_v45 }
0x1c4b   :  { %v3988_v4 = vpop.f32.mrf.mxu2 }
0x1c4c   :  { %v3989_v5 = vadd.f32 %v3988_v4, %v3956_v54 }
0x1c4e   :  { %v4014_v15 = vadd.f32 %v4013_v8, %v3989_v5 }
0x1c50   :  { %5486 = vtanh.f32 %v4014_v15  ;;  %v4016_v24 = vmul.f32 0.5, %v4014_v15 }
0x1c52   :  { %5488 = vtanh.f32 %v4016_v24 }
0x1c56   :  { %v5487_v20 = vpop.eup %5486 }
0x1c57   :  { %4023 = vrot.lane.b32.xlu0 %v5487_v20, %s5623_s0 }
0x1c58   :  { %v5489_v17 = vpop.eup %5488 }
0x1c59   :  { %v4018_v21 = vadd.f32 1.0, %v5489_v17 }
0x1c5b   :  { %v4019_v25 = vmul.f32 0.5, %v4018_v21 }
0x1c5d   :  { %v4021_v41 = vmul.f32 %v4019_v25, %v6425_v18 }
0x1cc9   :  { %v4024_v7 = vpop.permute.xlu0 %4023 }
0x1cca   :  { %v4026_v40 = vmul.f32 %v4024_v7, %v4019_v25 }
0x1ccc   :  { %4028 = vrot.lane.b32.xlu1 %v4026_v40, %s5624_s15 }
0x1d3e   :  { %v4029_v28 = vpop.permute.xlu1 %4028 }
0x1d3f   :  { %v6460_v52 = vadd.f32 %v4029_v28, %v4021_v41 }
0x1d41   :  { %5490 = vtanh.f32 %v6460_v52 }
0x1d47   :  { %v5491_v29 = vpop.eup %5490 }
0x1d48   :  { %4034 = vrot.lane.b32.xlu2 %v5491_v29, %s5623_s0 }
0x1da2   :  { %v4035_v55 = vpop.permute.xlu2 %4034 }
0x1da3   :  { %v4037_v56 = vmul.f32 %v4035_v55, %v4019_v25 }
0x1da5   :  { %4039 = vrot.lane.b32.xlu0 %v4037_v56, %s5624_s15 }
0x1e17   :  { %v4040_v2 = vpop.permute.xlu0 %4039 }
0x1e18   :  { %4042 = vst.msk [vmem:[#allocation2 + $0x18] sm:$0xff] %vm443_vm2, %v4040_v2  ;;  %v4043_v6 = vsel %vm443_vm2, %v4040_v2, 0 }
0x1e19   :  { %v4065_v12 = vand.u32 4294901760, %v4043_v6 }
0x1e1b   :  { %v4066_v13 = vsub.f32 %v4043_v6, %v4065_v12  ;;  %4111 = vmatmul.f32.vlgmr.msrb.gmra.mxu1 %v4065_v12 }
0x1e1c   :  { %4372 = vmatpush.msrb.mxu1 %v6243_v60 }
0x1e1d   :  { %v4067_v53 = vand.u32 4294901760, %v4066_v13  ;;  %4141 = vmatmul.f32.vlgmr.msrb.gmra.mxu2 %v4066_v13 }
0x1e1e   :  { %4374 = vmatpush.msrb.mxu1 %v6246_v46  ;;  %4401 = vmatpush.msrb.mxu2 %v6253_v1 }
0x1e1f   :  { %v4068_v33 = vsub.f32 %v4066_v13, %v4067_v53  ;;  %4168 = vmatmul.f32.vlgmr.msrb.gmra.mxu3 %v4067_v53 }
0x1e20   :  { %4376 = vmatpush.msrb.mxu1 %v6255_v62  ;;  %4432 = vmatpush.msrb.mxu3 %v6243_v60 }
0x1e21   :  { %v4069_v0 = vand.u32 4294901760, %v4068_v33  ;;  %4405 = vmatpush.msrb.mxu2 %v6264_v22 }
0x1e22   :  { %4378 = vmatpush.msrb.mxu1 %v6266_v49  ;;  %4434 = vmatpush.msrb.mxu3 %v6246_v46 }
0x1e23   :  { %4070 = vmatmul.f32.vlgmr.msrb.gmra.mxu0 %v4069_v0  ;;  %4226 = vmatmul.f32.vlgmr.msra.gmra.mxu1 %v4065_v12 }
0x1e24   :  { %4343 = vmatpush.msrb.mxu0 %v6249_v27  ;;  %4436 = vmatpush.msrb.mxu3 %v6255_v62 }
0x1e25   :  { %4409 = vmatpush.msrb.mxu2 %v6277_v34  ;;  %4519 = vmatpush.msra.mxu1 %v6271_v61 }
0x1e26   :  { %4346 = vmatpush.msrb.mxu0 %v6258_v10  ;;  %4438 = vmatpush.msrb.mxu3 %v6266_v49 }
0x1e27   :  { %4413 = vmatpush.msrb.mxu2 %v6288_v9  ;;  %4525 = vmatpush.msra.mxu1 %v6283_v11 }
0x1e28   :  { %4349 = vmatpush.msrb.mxu0 %v6269_v50 }
0x1e29   :  { %4531 = vmatpush.msra.mxu1 %v6291_v32 }
0x1e2a   :  { %4352 = vmatpush.msrb.mxu0 %v6280_v35 }
0x1e2b   :  { %4201 = vmatmul.f32.vlgmr.msra.gmra.mxu0 %v4065_v12  ;;  %4537 = vmatpush.msra.mxu1 %v6296_v51 }
0x1e2c   :  { %4486 = vmatpush.msra.mxu0 %v6243_v60 }
0x1e2e   :  { %4488 = vmatpush.msra.mxu0 %v6246_v46 }
0x1e30   :  { %4490 = vmatpush.msra.mxu0 %v6255_v62 }
0x1e32   :  { %4492 = vmatpush.msra.mxu0 %v6266_v49 }
0x1e98   :  { %v4112_v39 = vpop.f32.mrf.mxu1 }
0x1ea0   :  { %v4071_v42 = vpop.f32.mrf.mxu0  ;;  %v4142_v18 = vpop.f32.mrf.mxu2 }
0x1ea1   :  { %v4072_v19 = vadd.f32 %v4071_v42, %v6350_v37  ;;  %v4227_v63 = vpop.f32.mrf.mxu1 }
0x1ea2   :  { %v4169_v58 = vpop.f32.mrf.mxu3 }
0x1ea3   :  { %v4113_v16 = vadd.f32 %v4112_v39, %v4072_v19 }
0x1ea5   :  { %v4143_v43 = vadd.f32 %v4142_v18, %v4113_v16 }
0x1ea7   :  { %v4170_v44 = vadd.f32 %v4169_v58, %v4143_v43 }
0x1ea8   :  { %v4202_v14 = vpop.f32.mrf.mxu0 }
0x1ea9   :  { %v4203_v23 = vadd.f32 %v4202_v14, %v4170_v44 }
0x1eab   :  { %v4228_v38 = vadd.f32 %v4227_v63, %v4203_v23 }
0x1ead   :  { %5492 = vtanh.f32 %v4228_v38  ;;  %v4230_v30 = vmul.f32 0.5, %v4228_v38 }
0x1eaf   :  { %5494 = vtanh.f32 %v4230_v30 }
0x1eb3   :  { %v5493_v36 = vpop.eup %5492 }
0x1eb4   :  { %4237 = vrot.lane.b32.xlu1 %v5493_v36, %s5623_s0 }
0x1eb5   :  { %v5495_v57 = vpop.eup %5494 }
0x1eb6   :  { %v4232_v31 = vadd.f32 1.0, %v5495_v57 }
0x1eb8   :  { %v4233_v3 = vmul.f32 0.5, %v4232_v31 }
0x1eba   :  { %v4235_v59 = vmul.f32 %v4233_v3, %v6460_v52 }
0x1f26   :  { %v4238_v48 = vpop.permute.xlu1 %4237 }
0x1f27   :  { %v4240_v26 = vmul.f32 %v4238_v48, %v4233_v3 }
0x1f29   :  { %4242 = vrot.lane.b32.xlu2 %v4240_v26, %s5624_s15 }
0x1f83   :  { %v4243_v45 = vpop.permute.xlu2 %4242 }
0x1f84   :  { %v6495_v47 = vadd.f32 %v4243_v45, %v4235_v59 }
0x1f86   :  { %5496 = vtanh.f32 %v6495_v47 }
0x1f8c   :  { %v5497_v54 = vpop.eup %5496 }
0x1f8d   :  { %4248 = vrot.lane.b32.xlu0 %v5497_v54, %s5623_s0 }
0x1fff   :  { %v4249_v4 = vpop.permute.xlu0 %4248 }
0x2000   :  { %v4251_v5 = vmul.f32 %v4249_v4, %v4233_v3 }
0x2002   :  { %4253 = vrot.lane.b32.xlu1 %v4251_v5, %s5624_s15 }
0x2074   :  { %v4254_v8 = vpop.permute.xlu1 %4253 }
0x2075   :  { %4256 = vst.msk [vmem:[#allocation2 + $0x20] sm:$0xff] %vm443_vm2, %v4254_v8  ;;  %v4257_v15 = vsel %vm443_vm2, %v4254_v8, 0 }
0x2076   :  { %v4279_v20 = vand.u32 4294901760, %v4257_v15 }
0x2078   :  { %v4280_v24 = vsub.f32 %v4257_v15, %v4279_v20  ;;  %4325 = vmatmul.f32.vlgmr.msra.gmra.mxu3 %v4279_v20  ;;  %v4910_v15 = vld [vmem:[#allocation3 + $0x110] sm:$0xff] }
0x2079   :  { %4586 = vmatpush.msra.mxu3 %v6243_v60 }
0x207a   :  { %v4281_v17 = vand.u32 4294901760, %v4280_v24  ;;  %4355 = vmatmul.f32.vlgmr.msrb.gmra.mxu0 %v4280_v24 }
0x207b   :  { %4588 = vmatpush.msra.mxu3 %v6246_v46  ;;  %4615 = vmatpush.msrb.mxu0 %v6253_v1 }
0x207c   :  { %v4282_v21 = vsub.f32 %v4280_v24, %v4281_v17  ;;  %4382 = vmatmul.f32.vlgmr.msrb.gmra.mxu1 %v4281_v17  ;;  %v4909_v24 = vld [vmem:[#allocation3 + $0x108] sm:$0xff] }
0x207d   :  { %4590 = vmatpush.msra.mxu3 %v6255_v62  ;;  %4646 = vmatpush.msrb.mxu1 %v6243_v60 }
0x207e   :  { %v4283_v25 = vand.u32 4294901760, %v4282_v21  ;;  %4619 = vmatpush.msrb.mxu0 %v6264_v22  ;;  %v4951_v21 = vand.u32 4294901760, %v4909_v24 }
0x207f   :  { %4592 = vmatpush.msra.mxu3 %v6266_v49  ;;  %4648 = vmatpush.msrb.mxu1 %v6246_v46 }
0x2080   :  { %4284 = vmatmul.f32.vlgmr.msra.gmra.mxu2 %v4283_v25  ;;  %4440 = vmatmul.f32.vlgmr.msrb.gmra.mxu3 %v4279_v20  ;;  %v4908_v25 = vld [vmem:[#allocation3 + $0x100] sm:$0xff] }
0x2081   :  { %4557 = vmatpush.msra.mxu2 %v6249_v27  ;;  %4650 = vmatpush.msrb.mxu1 %v6255_v62 }
0x2082   :  { %4623 = vmatpush.msrb.mxu0 %v6277_v34  ;;  %4733 = vmatpush.msrb.mxu3 %v6271_v61 }
0x2083   :  { %4560 = vmatpush.msra.mxu2 %v6258_v10  ;;  %4652 = vmatpush.msrb.mxu1 %v6266_v49 }
0x2084   :  { %4627 = vmatpush.msrb.mxu0 %v6288_v9  ;;  %4739 = vmatpush.msrb.mxu3 %v6283_v11 }
0x2085   :  { %4563 = vmatpush.msra.mxu2 %v6269_v50 }
0x2086   :  { %4745 = vmatpush.msrb.mxu3 %v6291_v32 }
0x2087   :  { %4566 = vmatpush.msra.mxu2 %v6280_v35 }
0x2088   :  { %4415 = vmatmul.f32.vlgmr.msrb.gmra.mxu2 %v4279_v20  ;;  %4751 = vmatpush.msrb.mxu3 %v6296_v51  ;;  %v4949_v20 = vand.u32 4294901760, %v4910_v15 }
0x2089   :  { %4700 = vmatpush.msrb.mxu2 %v6243_v60 }
0x208a   :  { %v6558_v17 = vsub.f32 %v4910_v15, %v4949_v20 }
0x208b   :  { %4702 = vmatpush.msrb.mxu2 %v6246_v46 }
0x208d   :  { %4704 = vmatpush.msrb.mxu2 %v6255_v62 }
0x208f   :  { %4706 = vmatpush.msrb.mxu2 %v6266_v49 }
0x20f7   :  { %v4356_v41 = vpop.f32.mrf.mxu0 }
0x20f9   :  { %v4383_v28 = vpop.f32.mrf.mxu1 }
0x20fb   :  { %v4326_v61 = vpop.f32.mrf.mxu3 }
0x2103   :  { %v4285_v7 = vpop.f32.mrf.mxu2  ;;  %v4441_v51 = vpop.f32.mrf.mxu3 }
0x2104   :  { %v4286_v11 = vadd.f32 %v4285_v7, %v6350_v37  ;;  %v4953_v7 = vand.u32 4294901760, %v4908_v25 }
0x2106   :  { %v4327_v40 = vadd.f32 %v4326_v61, %v4286_v11  ;;  %v5036_v61 = vand.u32 4294901760, %v6558_v17  ;;  %v5041_v11 = vsub.f32 %v4909_v24, %v4951_v21 }
0x2108   :  { %v4357_v32 = vadd.f32 %v4356_v41, %v4327_v40  ;;  %v4907_v40 = vld [vmem:[#allocation3 + $0xf8] sm:$0xff]  ;;  %v5037_v41 = vsub.f32 %v6558_v17, %v5036_v61 }
0x210a   :  { %v4384_v52 = vadd.f32 %v4383_v28, %v4357_v32  ;;  %v5042_v32 = vand.u32 4294901760, %v5041_v11  ;;  %v6562_v28 = vand.u32 4294901760, %v4907_v40 }
0x210b   :  { %v4416_v29 = vpop.f32.mrf.mxu2 }
0x210c   :  { %v4417_v55 = vadd.f32 %v4416_v29, %v4384_v52  ;;  %v5047_v52 = vsub.f32 %v4908_v25, %v4953_v7  ;;  %v5038_v29 = vand.u32 4294901760, %v5037_v41 }
0x210e   :  { %v4442_v56 = vadd.f32 %v4441_v51, %v4417_v55  ;;  %v5043_v55 = vsub.f32 %v5041_v11, %v5042_v32  ;;  %v5048_v51 = vand.u32 4294901760, %v5047_v52 }
0x2110   :  { %5498 = vtanh.f32 %v4442_v56  ;;  %v4444_v6 = vmul.f32 0.5, %v4442_v56  ;;  %v5053_v56 = vsub.f32 %v4907_v40, %v6562_v28 }
0x2112   :  { %5500 = vtanh.f32 %v4444_v6  ;;  %v5049_v6 = vsub.f32 %v5047_v52, %v5048_v51 }
0x2116   :  { %v5499_v2 = vpop.eup %5498 }
0x2117   :  { %4451 = vrot.lane.b32.xlu2 %v5499_v2, %s5623_s0  ;;  %v5044_v2 = vand.u32 4294901760, %v5043_v55 }
0x2118   :  { %v5501_v12 = vpop.eup %5500 }
0x2119   :  { %v4446_v13 = vadd.f32 1.0, %v5501_v12  ;;  %v5054_v12 = vand.u32 4294901760, %v5053_v56 }
0x211b   :  { %v4447_v53 = vmul.f32 0.5, %v4446_v13  ;;  %v5050_v13 = vand.u32 4294901760, %v5049_v6 }
0x211d   :  { %v4449_v39 = vmul.f32 %v4447_v53, %v6495_v47 }
0x2171   :  { %v4452_v33 = vpop.permute.xlu2 %4451 }
0x2172   :  { %v4454_v0 = vmul.f32 %v4452_v33, %v4447_v53 }
0x2174   :  { %4456 = vrot.lane.b32.xlu0 %v4454_v0, %s5624_s15  ;;  %v4899_v0 = vld [vmem:[#allocation2] sm:$0xff] }
0x21e6   :  { %v4457_v42 = vpop.permute.xlu0 %4456 }
0x21e7   :  { %v4459_v19 = vadd.f32 %v4457_v42, %v4449_v39  ;;  %v4914_v39 = vsel %vm443_vm2, %v4899_v0, 0 }
0x21e8   :  { %v6567_v42 = vand.u32 4294901760, %v4914_v39 }
0x21e9   :  { %5502 = vtanh.f32 %v4459_v19 }
0x21ef   :  { %v5503_v16 = vpop.eup %5502 }
0x21f0   :  { %4462 = vrot.lane.b32.xlu1 %v5503_v16, %s5623_s0 }
0x2262   :  { %v4463_v18 = vpop.permute.xlu1 %4462 }
0x2263   :  { %v4465_v43 = vmul.f32 %v4463_v18, %v4447_v53  ;;  %v5055_v53 = vsub.f32 %v5053_v56, %v5054_v12  ;;  %v4958_v18 = vsub.f32 %v4914_v39, %v6567_v42 }
0x2265   :  { %4467 = vrot.lane.b32.xlu2 %v4465_v43, %s5624_s15  ;;  %v5056_v33 = vand.u32 4294901760, %v5055_v53 }
0x22bf   :  { %v4468_v58 = vpop.permute.xlu2 %4467 }
0x22c0   :  { %4470 = vst.msk [vmem:[#allocation2 + $0x28] sm:$0xff] %vm443_vm2, %v4468_v58  ;;  %v4471_v44 = vsel %vm443_vm2, %v4468_v58, 0 }
0x22c1   :  { %v4493_v14 = vand.u32 4294901760, %v4471_v44 }
0x22c3   :  { %v4494_v23 = vsub.f32 %v4471_v44, %v4493_v14  ;;  %4539 = vmatmul.f32.vlgmr.msra.gmra.mxu1 %v4493_v14 }
0x22c4   :  { %4800 = vmatpush.msra.mxu1 %v6243_v60 }
0x22c5   :  { %v4495_v63 = vand.u32 4294901760, %v4494_v23  ;;  %4569 = vmatmul.f32.vlgmr.msra.gmra.mxu2 %v4494_v23 }
0x22c6   :  { %4802 = vmatpush.msra.mxu1 %v6246_v46  ;;  %4829 = vmatpush.msra.mxu2 %v6253_v1 }
0x22c7   :  { %v4496_v38 = vsub.f32 %v4494_v23, %v4495_v63  ;;  %4596 = vmatmul.f32.vlgmr.msra.gmra.mxu3 %v4495_v63  ;;  %v4959_v23 = vand.u32 4294901760, %v4958_v18 }
0x22c8   :  { %4804 = vmatpush.msra.mxu1 %v6255_v62  ;;  %4860 = vmatpush.msra.mxu3 %v6243_v60 }
0x22c9   :  { %v4497_v36 = vand.u32 4294901760, %v4496_v38  ;;  %4833 = vmatpush.msra.mxu2 %v6264_v22 }
0x22ca   :  { %4806 = vmatpush.msra.mxu1 %v6266_v49  ;;  %4862 = vmatpush.msra.mxu3 %v6246_v46 }
0x22cb   :  { %4498 = vmatmul.f32.vlgmr.msra.gmra.mxu0 %v4497_v36  ;;  %4654 = vmatmul.f32.vlgmr.msrb.gmra.mxu1 %v4493_v14  ;;  %v4901_v36 = vld [vmem:[#allocation2 + $0x10] sm:$0xff] }
0x22cc   :  { %4771 = vmatpush.msra.mxu0 %v6249_v27  ;;  %4864 = vmatpush.msra.mxu3 %v6255_v62 }
0x22cd   :  { %4837 = vmatpush.msra.mxu2 %v6277_v34  ;;  %5039 = vmatpush.msrb.mxu1 %v5038_v29 }
0x22ce   :  { %4774 = vmatpush.msra.mxu0 %v6258_v10  ;;  %4866 = vmatpush.msra.mxu3 %v6266_v49 }
0x22cf   :  { %4841 = vmatpush.msra.mxu2 %v6288_v9  ;;  %5045 = vmatpush.msrb.mxu1 %v5044_v2 }
0x22d0   :  { %4777 = vmatpush.msra.mxu0 %v6269_v50 }
0x22d1   :  { %5051 = vmatpush.msrb.mxu1 %v5050_v13 }
0x22d2   :  { %4780 = vmatpush.msra.mxu0 %v6280_v35 }
0x22d3   :  { %4629 = vmatmul.f32.vlgmr.msrb.gmra.mxu0 %v4493_v14  ;;  %5057 = vmatpush.msrb.mxu1 %v5056_v33 }
0x22d4   :  { %4950 = vmatpush.msrb.mxu0 %v4949_v20 }
0x22d6   :  { %4952 = vmatpush.msrb.mxu0 %v4951_v21 }
0x22d8   :  { %4954 = vmatpush.msrb.mxu0 %v4953_v7 }
0x22da   :  { %4956 = vmatpush.msrb.mxu0 %v6562_v28 }
0x2340   :  { %v4540_v60 = vpop.f32.mrf.mxu1 }
0x2348   :  { %v4499_v46 = vpop.f32.mrf.mxu0  ;;  %v4570_v22 = vpop.f32.mrf.mxu2 }
0x2349   :  { %v4500_v1 = vadd.f32 %v4499_v46, %v6350_v37  ;;  %v4655_v31 = vpop.f32.mrf.mxu1  ;;  %v4960_v46 = vsub.f32 %v4958_v18, %v4959_v23 }
0x234a   :  { %v4597_v30 = vpop.f32.mrf.mxu3 }
0x234b   :  { %v4541_v27 = vadd.f32 %v4540_v60, %v4500_v1 }
0x234d   :  { %v4571_v62 = vadd.f32 %v4570_v22, %v4541_v27  ;;  %v4920_v27 = vsel %vm443_vm2, %v4901_v36, 0 }
0x234f   :  { %v4598_v34 = vadd.f32 %v4597_v30, %v4571_v62  ;;  %v4961_v62 = vand.u32 4294901760, %v4960_v46 }
0x2350   :  { %v4630_v57 = vpop.f32.mrf.mxu0 }
0x2351   :  { %v4631_v10 = vadd.f32 %v4630_v57, %v4598_v34  ;;  %v6578_v34 = vand.u32 4294901760, %v4920_v27  ;;  %v4902_v57 = vld [vmem:[#allocation2 + $0x18] sm:$0xff] }
0x2353   :  { %v4656_v49 = vadd.f32 %v4655_v31, %v4631_v10  ;;  %v4974_v31 = vsub.f32 %v4920_v27, %v6578_v34 }
0x2355   :  { %5504 = vtanh.f32 %v4656_v49  ;;  %v4658_v50 = vmul.f32 0.5, %v4656_v49  ;;  %v4923_v49 = vsel %vm443_vm2, %v4902_v57, 0 }
0x2357   :  { %5506 = vtanh.f32 %v4658_v50  ;;  %v4975_v50 = vand.u32 4294901760, %v4974_v31 }
0x235b   :  { %v5505_v9 = vpop.eup %5504 }
0x235c   :  { %4665 = vrot.lane.b32.xlu0 %v5505_v9, %s5623_s0 }
0x235d   :  { %v5507_v35 = vpop.eup %5506 }
0x235e   :  { %v4660_v3 = vadd.f32 1.0, %v5507_v35  ;;  %v6585_v35 = vand.u32 4294901760, %v4923_v49 }
0x2360   :  { %v4661_v48 = vmul.f32 0.5, %v4660_v3  ;;  %v4903_v3 = vld [vmem:[#allocation2 + $0x20] sm:$0xff] }
0x2362   :  { %v4663_v45 = vmul.f32 %v4661_v48, %v4459_v19  ;;  %v4900_v19 = vld [vmem:[#allocation2 + $0x8] sm:$0xff] }
0x2363   :  { %v4917_v58 = vsel %vm443_vm2, %v4900_v19, 0 }
0x2364   :  { %v6573_v63 = vand.u32 4294901760, %v4917_v58 }
0x2366   :  { %v4966_v1 = vsub.f32 %v4917_v58, %v6573_v63 }
0x2368   :  { %v4967_v30 = vand.u32 4294901760, %v4966_v1 }
0x236a   :  { %v4968_v10 = vsub.f32 %v4966_v1, %v4967_v30 }
0x236c   :  { %v4969_v9 = vand.u32 4294901760, %v4968_v10 }
0x23ce   :  { %v4666_v26 = vpop.permute.xlu0 %4665 }
0x23cf   :  { %v4668_v59 = vmul.f32 %v4666_v26, %v4661_v48  ;;  %v4982_v26 = vsub.f32 %v4923_v49, %v6585_v35 }
0x23d1   :  { %4670 = vrot.lane.b32.xlu1 %v4668_v59, %s5624_s15  ;;  %v4926_v59 = vsel %vm443_vm2, %v4903_v3, 0 }
0x2443   :  { %v4671_v47 = vpop.permute.xlu1 %4670 }
0x2444   :  { %v6553_v54 = vadd.f32 %v4671_v47, %v4663_v45  ;;  %v4983_v47 = vand.u32 4294901760, %v4982_v26 }
0x2446   :  { %5508 = vtanh.f32 %v6553_v54 }
0x244c   :  { %v5509_v4 = vpop.eup %5508 }
0x244d   :  { %4676 = vrot.lane.b32.xlu2 %v5509_v4, %s5623_s0  ;;  %v6590_v4 = vand.u32 4294901760, %v4926_v59 }
0x244f   :  { %v4990_v15 = vsub.f32 %v4926_v59, %v6590_v4 }
0x24a7   :  { %v4677_v5 = vpop.permute.xlu2 %4676 }
0x24a8   :  { %v4679_v8 = vmul.f32 %v4677_v5, %v4661_v48  ;;  %v4976_v48 = vsub.f32 %v4974_v31, %v4975_v50  ;;  %v4904_v5 = vld [vmem:[#allocation2 + $0x28] sm:$0xff] }
0x24aa   :  { %4681 = vrot.lane.b32.xlu0 %v4679_v8, %s5624_s15  ;;  %v4977_v45 = vand.u32 4294901760, %v4976_v48  ;;  %v4984_v8 = vsub.f32 %v4982_v26, %v4983_v47 }
0x24ac   :  { %v4985_v24 = vand.u32 4294901760, %v4984_v8 }
0x251c   :  { %v4682_v16 = vpop.permute.xlu0 %4681 }
0x251d   :  { %4684 = vst.msk [vmem:[#allocation2 + $0x30] sm:$0xff] %vm443_vm2, %v4682_v16  ;;  %v4685_v43 = vsel %vm443_vm2, %v4682_v16, 0 }
0x251e   :  { %v4707_v44 = vand.u32 4294901760, %v4685_v43 }
0x2520   :  { %v4708_v14 = vsub.f32 %v4685_v43, %v4707_v44  ;;  %4753 = vmatmul.f32.vlgmr.msrb.gmra.mxu3 %v4707_v44 }
0x2521   :  { %5169 = vmatpush.msrb.mxu3 %v4949_v20 }
0x2522   :  { %v4709_v38 = vand.u32 4294901760, %v4708_v14  ;;  %4783 = vmatmul.f32.vlgmr.msra.gmra.mxu0 %v4708_v14 }
0x2523   :  { %5171 = vmatpush.msrb.mxu3 %v4951_v21  ;;  %5240 = vmatpush.msra.mxu0 %v5036_v61 }
0x2524   :  { %v4710_v60 = vsub.f32 %v4708_v14, %v4709_v38  ;;  %4810 = vmatmul.f32.vlgmr.msra.gmra.mxu1 %v4709_v38  ;;  %v4905_v25 = vld [vmem:[#allocation2 + $0x30] sm:$0xff] }
0x2525   :  { %5173 = vmatpush.msrb.mxu3 %v4953_v7  ;;  %5299 = vmatpush.msra.mxu1 %v4949_v20  ;;  %v4929_v20 = vsel %vm443_vm2, %v4904_v5, 0 }
0x2526   :  { %v4711_v22 = vand.u32 4294901760, %v4710_v60  ;;  %5244 = vmatpush.msra.mxu0 %v5042_v32 }
0x2527   :  { %5175 = vmatpush.msrb.mxu3 %v6562_v28  ;;  %5301 = vmatpush.msra.mxu1 %v4951_v21  ;;  %v6595_v21 = vand.u32 4294901760, %v4929_v20 }
0x2528   :  { %4712 = vmatmul.f32.vlgmr.msrb.gmra.mxu2 %v4711_v22  ;;  %4868 = vmatmul.f32.vlgmr.msra.gmra.mxu3 %v4707_v44 }
0x2529   :  { %5105 = vmatpush.msrb.mxu2 %v6558_v17  ;;  %5248 = vmatpush.msra.mxu0 %v5048_v51  ;;  %v4991_v17 = vand.u32 4294901760, %v4990_v15 }
0x252a   :  { %4962 = vmatmul.f32.vlgmr.msrb.gmra.mxu0 %v4961_v62  ;;  %5303 = vmatpush.msra.mxu1 %v4953_v7  ;;  %v4998_v7 = vsub.f32 %v4929_v20, %v6595_v21 }
0x252b   :  { %5108 = vmatpush.msrb.mxu2 %v5041_v11  ;;  %5252 = vmatpush.msra.mxu0 %v5054_v12  ;;  %v4992_v61 = vsub.f32 %v4990_v15, %v4991_v17  ;;  %v4932_v11 = vsel %vm443_vm2, %v4905_v25, 0 }
0x252c   :  { %5059 = vmatmul.f32.vlgmr.msrb.gmra.mxu1 %v6567_v42  ;;  %v4999_v41 = vand.u32 4294901760, %v4998_v7  ;;  %v6600_v32 = vand.u32 4294901760, %v4932_v11 }
0x252d   :  { %5111 = vmatpush.msrb.mxu2 %v5047_v52  ;;  %5305 = vmatpush.msra.mxu1 %v6562_v28  ;;  %v4993_v40 = vand.u32 4294901760, %v4992_v61 }
0x252e   :  { %v5000_v28 = vsub.f32 %v4998_v7, %v4999_v41  ;;  %v5006_v52 = vsub.f32 %v4932_v11, %v6600_v32 }
0x252f   :  { %5114 = vmatpush.msrb.mxu2 %v5053_v56 }
0x2530   :  { %4843 = vmatmul.f32.vlgmr.msra.gmra.mxu2 %v4707_v44  ;;  %5179 = vmatmul.f32.vlgmr.msrb.gmra.mxu3 %v4959_v23  ;;  %v5001_v29 = vand.u32 4294901760, %v5000_v28  ;;  %v5007_v55 = vand.u32 4294901760, %v5006_v52 }
0x2532   :  { %4970 = vmatmul.f32.gmra.mxu0 %v4969_v9  ;;  %v5008_v51 = vsub.f32 %v5006_v52, %v5007_v55 }
0x2534   :  { %5063 = vmatmul.f32.gmra.mxu1 %v6573_v63  ;;  %v5009_v56 = vand.u32 4294901760, %v5008_v51 }
0x2538   :  { %5117 = vmatmul.f32.vlgmr.msrb.gmra.mxu2 %v4958_v18  ;;  %5185 = vmatmul.f32.gmra.mxu3 %v4967_v30 }
0x253a   :  { %4978 = vmatmul.f32.gmra.mxu0 %v4977_v45 }
0x253c   :  { %5067 = vmatmul.f32.gmra.mxu1 %v6578_v34 }
0x2540   :  { %5122 = vmatmul.f32.gmra.mxu2 %v4966_v1  ;;  %5191 = vmatmul.f32.gmra.mxu3 %v4975_v50 }
0x2542   :  { %4986 = vmatmul.f32.gmra.mxu0 %v4985_v24 }
0x2544   :  { %5071 = vmatmul.f32.gmra.mxu1 %v6585_v35 }
0x2548   :  { %5127 = vmatmul.f32.gmra.mxu2 %v4974_v31  ;;  %5197 = vmatmul.f32.gmra.mxu3 %v4983_v47 }
0x254a   :  { %4994 = vmatmul.f32.gmra.mxu0 %v4993_v40 }
0x254c   :  { %5075 = vmatmul.f32.gmra.mxu1 %v6590_v4 }
0x2550   :  { %5132 = vmatmul.f32.gmra.mxu2 %v4982_v26  ;;  %5203 = vmatmul.f32.gmra.mxu3 %v4991_v17  ;;  %v6638_v17 = vld [vmem:[#allocation3 + $0x118] ss:$0 sm:$0xff] }
0x2552   :  { %5002 = vmatmul.f32.gmra.mxu0 %v5001_v29 }
0x2554   :  { %5079 = vmatmul.f32.gmra.mxu1 %v6595_v21 }
0x2558   :  { %5137 = vmatmul.f32.gmra.mxu2 %v4990_v15  ;;  %5209 = vmatmul.f32.gmra.mxu3 %v4999_v41 }
0x255a   :  { %5010 = vmatmul.f32.gmra.mxu0 %v5009_v56 }
0x255c   :  { %5083 = vmatmul.f32.gmra.mxu1 %v6600_v32 }
0x2560   :  { %5142 = vmatmul.f32.gmra.mxu2 %v4998_v7  ;;  %5215 = vmatmul.f32.gmra.mxu3 %v5007_v55 }
0x2568   :  { %5147 = vmatmul.f32.gmra.mxu2 %v5006_v52 }
0x259f   :  { %v4784_v53 = vpop.f32.mrf.mxu0 }
0x25a1   :  { %v4811_v0 = vpop.f32.mrf.mxu1 }
0x25a3   :  { %v4754_v2 = vpop.f32.mrf.mxu3 }
0x25ab   :  { %v4713_v6 = vpop.f32.mrf.mxu2  ;;  %v4869_v18 = vpop.f32.mrf.mxu3 }
0x25ac   :  { %v4714_v12 = vadd.f32 %v4713_v6, %v6350_v37 }
0x25ae   :  { %v4755_v13 = vadd.f32 %v4754_v2, %v4714_v12 }
0x25b0   :  { %v4785_v33 = vadd.f32 %v4784_v53, %v4755_v13 }
0x25b2   :  { %v4812_v39 = vadd.f32 %v4811_v0, %v4785_v33 }
0x25b3   :  { %v4844_v19 = vpop.f32.mrf.mxu2 }
0x25b4   :  { %v4845_v16 = vadd.f32 %v4844_v19, %v4812_v39 }
0x25b6   :  { %v4870_v43 = vadd.f32 %v4869_v18, %v4845_v16 }
0x25b8   :  { %5510 = vtanh.f32 %v4870_v43  ;;  %v4872_v44 = vmul.f32 0.5, %v4870_v43 }
0x25ba   :  { %5512 = vtanh.f32 %v4872_v44 }
0x25bb   :  { %v5118_v15 = vpop.f32.mrf.mxu2 }
0x25be   :  { %v5511_v58 = vpop.eup %5510 }
0x25bf   :  { %4879 = vrot.lane.b32.xlu1 %v5511_v58, %s5623_s0 }
0x25c0   :  { %v5513_v14 = vpop.eup %5512 }
0x25c1   :  { %v4874_v23 = vadd.f32 1.0, %v5513_v14 }
0x25c3   :  { %v4875_v38 = vmul.f32 0.5, %v4874_v23  ;;  %v5123_v61 = vpop.f32.mrf.mxu2 }
0x25c5   :  { %v4877_v60 = vmul.f32 %v4875_v38, %v6553_v54 }
0x25cb   :  { %v5128_v29 = vpop.f32.mrf.mxu2 }
0x25d3   :  { %v5133_v18 = vpop.f32.mrf.mxu2 }
0x2631   :  { %v4880_v36 = vpop.permute.xlu1 %4879 }
0x2632   :  { %v4882_v37 = vmul.f32 %v4880_v36, %v4875_v38 }
0x2634   :  { %4884 = vrot.lane.b32.xlu2 %v4882_v37, %s5624_s15 }
0x268e   :  { %v4885_v46 = vpop.permute.xlu2 %4884 }
0x268f   :  { %v4887_v1 = vadd.f32 %v4885_v46, %v4877_v60 }
0x2691   :  { %5514 = vtanh.f32 %v4887_v1 }
0x2697   :  { %v5515_v27 = vpop.eup %5514 }
0x2698   :  { %4890 = vrot.lane.b32.xlu0 %v5515_v27, %s5623_s0  ;;  %v5138_v27 = vpop.f32.mrf.mxu2 }
0x270a   :  { %v4891_v22 = vpop.permute.xlu0 %4890 }
0x270b   :  { %v4893_v62 = vmul.f32 %v4891_v22, %v4875_v38 }
0x270d   :  { %4895 = vrot.lane.b32.xlu1 %v4893_v62, %s5624_s15 }
0x277f   :  { %v4896_v30 = vpop.permute.xlu1 %4895 }
0x2780   :  { %4898 = vst.msk [vmem:[#allocation2 + $0x38] sm:$0xff] %vm443_vm2, %v4896_v30 }
0x2787   :  { %v4906_v57 = vld [vmem:[#allocation2 + $0x38] sm:$0xff] }
0x2788   :  { %v4935_v10 = vsel %vm443_vm2, %v4906_v57, 0 }
0x2789   :  { %v5013_v31 = vand.u32 4294901760, %v4935_v10 }
0x278b   :  { %5087 = vmatmul.f32.gmra.mxu1 %v5013_v31  ;;  %v5014_v49 = vsub.f32 %v4935_v10, %v5013_v31 }
0x278d   :  { %5152 = vmatmul.f32.gmra.mxu2 %v5014_v49  ;;  %v5015_v54 = vand.u32 4294901760, %v5014_v49 }
0x278f   :  { %5221 = vmatmul.f32.gmra.mxu3 %v5015_v54  ;;  %v5016_v9 = vsub.f32 %v5014_v49, %v5015_v54 }
0x2791   :  { %v5017_v50 = vand.u32 4294901760, %v5016_v9 }
0x2793   :  { %5018 = vmatmul.f32.gmra.mxu0 %v5017_v50  ;;  %5307 = vmatmul.f32.vlgmr.msra.gmra.mxu1 %v6567_v42 }
0x279b   :  { %5254 = vmatmul.f32.vlgmr.msra.gmra.mxu0 %v6567_v42  ;;  %5311 = vmatmul.f32.gmra.mxu1 %v6573_v63  ;;  %v5060_v42 = vpop.f32.mrf.mxu1 }
0x27a3   :  { %5258 = vmatmul.f32.gmra.mxu0 %v6573_v63  ;;  %5315 = vmatmul.f32.gmra.mxu1 %v6578_v34  ;;  %v4963_v63 = vpop.f32.mrf.mxu0 }
0x27a4   :  { %v4964_v25 = vadd.f32 %v6638_v17, %v4963_v63 }
0x27a6   :  { %v5061_v11 = vadd.f32 %v5060_v42, %v4964_v25  ;;  %v5143_v42 = vpop.f32.mrf.mxu2 }
0x27a8   :  { %v5119_v41 = vadd.f32 %v5118_v15, %v5061_v11 }
0x27ab   :  { %5262 = vmatmul.f32.gmra.mxu0 %v6578_v34  ;;  %5319 = vmatmul.f32.gmra.mxu1 %v6585_v35  ;;  %v5064_v34 = vpop.f32.mrf.mxu1 }
0x27b3   :  { %5266 = vmatmul.f32.gmra.mxu0 %v6585_v35  ;;  %5323 = vmatmul.f32.gmra.mxu1 %v6590_v4  ;;  %v4971_v35 = vpop.f32.mrf.mxu0  ;;  %v5068_v3 = vpop.f32.mrf.mxu1 }
0x27b4   :  { %v4972_v28 = vadd.f32 %v6638_v17, %v4971_v35 }
0x27b6   :  { %v5065_v51 = vadd.f32 %v5064_v34, %v4972_v28 }
0x27b8   :  { %v5124_v6 = vadd.f32 %v5123_v61, %v5065_v51 }
0x27bb   :  { %5270 = vmatmul.f32.gmra.mxu0 %v6590_v4  ;;  %5327 = vmatmul.f32.gmra.mxu1 %v6595_v21  ;;  %v4979_v48 = vpop.f32.mrf.mxu0  ;;  %v5072_v26 = vpop.f32.mrf.mxu1 }
0x27bc   :  { %v4980_v13 = vadd.f32 %v6638_v17, %v4979_v48 }
0x27be   :  { %v5069_v39 = vadd.f32 %v5068_v3, %v4980_v13 }
0x27c0   :  { %v5129_v43 = vadd.f32 %v5128_v29, %v5069_v39 }
0x27c3   :  { %5274 = vmatmul.f32.gmra.mxu0 %v6595_v21  ;;  %5331 = vmatmul.f32.gmra.mxu1 %v6600_v32  ;;  %v4987_v59 = vpop.f32.mrf.mxu0  ;;  %v5076_v45 = vpop.f32.mrf.mxu1 }
0x27c4   :  { %v5180_v21 = vpop.f32.mrf.mxu3  ;;  %v4988_v44 = vadd.f32 %v6638_v17, %v4987_v59 }
0x27c5   :  { %v5181_v52 = vadd.f32 %v5180_v21, %v5119_v41  ;;  %v5148_v21 = vpop.f32.mrf.mxu2 }
0x27c6   :  { %v5073_v36 = vadd.f32 %v5072_v26, %v4988_v44 }
0x27c8   :  { %v5134_v46 = vadd.f32 %v5133_v18, %v5073_v36 }
0x27cb   :  { %5278 = vmatmul.f32.gmra.mxu0 %v6600_v32  ;;  %5335 = vmatmul.f32.gmra.mxu1 %v5013_v31  ;;  %v4995_v47 = vpop.f32.mrf.mxu0  ;;  %v5080_v4 = vpop.f32.mrf.mxu1 }
0x27cc   :  { %v5186_v32 = vpop.f32.mrf.mxu3  ;;  %v4996_v22 = vadd.f32 %v6638_v17, %v4995_v47 }
0x27cd   :  { %v5187_v33 = vadd.f32 %v5186_v32, %v5124_v6 }
0x27ce   :  { %v5077_v57 = vadd.f32 %v5076_v45, %v4996_v22 }
0x27d0   :  { %v5139_v49 = vadd.f32 %v5138_v27, %v5077_v57 }
0x27d3   :  { %5282 = vmatmul.f32.gmra.mxu0 %v5013_v31  ;;  %v5003_v5 = vpop.f32.mrf.mxu0  ;;  %v6634_v8 = vpop.f32.mrf.mxu1 }
0x27d4   :  { %v5192_v53 = vpop.f32.mrf.mxu3  ;;  %v5004_v50 = vadd.f32 %v6638_v17, %v5003_v5 }
0x27d5   :  { %v5193_v14 = vadd.f32 %v5192_v53, %v5129_v43 }
0x27d6   :  { %v5081_v35 = vadd.f32 %v5080_v4, %v5004_v50 }
0x27d8   :  { %v5144_v48 = vadd.f32 %v5143_v42, %v5081_v35 }
0x27db   :  { %v5011_v20 = vpop.f32.mrf.mxu0 }
0x27dc   :  { %v5198_v23 = vpop.f32.mrf.mxu3  ;;  %v5012_v47 = vadd.f32 %v6638_v17, %v5011_v20 }
0x27dd   :  { %v5199_v62 = vadd.f32 %v5198_v23, %v5134_v46 }
0x27de   :  { %v5085_v61 = vadd.f32 %v6634_v8, %v5012_v47 }
0x27e0   :  { %v5149_v5 = vadd.f32 %v5148_v21, %v5085_v61 }
0x27e4   :  { %v5204_v31 = vpop.f32.mrf.mxu3 }
0x27e5   :  { %v5205_v63 = vadd.f32 %v5204_v31, %v5139_v49 }
0x27ec   :  { %v5210_v59 = vpop.f32.mrf.mxu3 }
0x27ed   :  { %v5211_v15 = vadd.f32 %v5210_v59, %v5144_v48 }
0x27f4   :  { %v5216_v4 = vpop.f32.mrf.mxu3 }
0x27f5   :  { %v5217_v28 = vadd.f32 %v5216_v4, %v5149_v5 }
0x2808   :  { %v6636_v24 = vpop.f32.mrf.mxu1 }
0x2810   :  { %v6641_v7 = vpop.f32.mrf.mxu0  ;;  %v5308_v40 = vpop.f32.mrf.mxu1 }
0x2818   :  { %v5255_v55 = vpop.f32.mrf.mxu0  ;;  %v5312_v2 = vpop.f32.mrf.mxu1 }
0x2819   :  { %v5256_v56 = vadd.f32 %v5255_v55, %v5181_v52  ;;  %v5153_v55 = vpop.f32.mrf.mxu2 }
0x281b   :  { %v5309_v12 = vadd.f32 %v5308_v40, %v5256_v56  ;;  %v5020_v40 = vadd.f32 %v6638_v17, %v6641_v7 }
0x281d   :  { %5339 = vst [vmem:[#allocation6] sm:$0xff] %v5309_v12  ;;  %v5089_v32 = vadd.f32 %v6636_v24, %v5020_v40 }
0x281f   :  { %v5154_v51 = vadd.f32 %v5153_v55, %v5089_v32 }
0x2820   :  { %v5259_v0 = vpop.f32.mrf.mxu0  ;;  %v5316_v16 = vpop.f32.mrf.mxu1 }
0x2821   :  { %v5260_v19 = vadd.f32 %v5259_v0, %v5187_v33 }
0x2823   :  { %v5313_v58 = vadd.f32 %v5312_v2, %v5260_v19  ;;  %v5222_v2 = vpop.f32.mrf.mxu3 }
0x2824   :  { %v5223_v8 = vadd.f32 %v5222_v2, %v5154_v51 }
0x2825   :  { %5340 = vst [vmem:[#allocation6 + $0x8] sm:$0xff] %v5313_v58 }
0x2828   :  { %v5263_v38 = vpop.f32.mrf.mxu0  ;;  %v5320_v60 = vpop.f32.mrf.mxu1 }
0x2829   :  { %v5264_v37 = vadd.f32 %v5263_v38, %v5193_v14 }
0x282b   :  { %v5317_v1 = vadd.f32 %v5316_v16, %v5264_v37 }
0x282d   :  { %5341 = vst [vmem:[#allocation6 + $0x10] sm:$0xff] %v5317_v1 }
0x2830   :  { %v5267_v30 = vpop.f32.mrf.mxu0  ;;  %v5324_v9 = vpop.f32.mrf.mxu1 }
0x2831   :  { %v5268_v10 = vadd.f32 %v5267_v30, %v5199_v62 }
0x2833   :  { %v5321_v54 = vadd.f32 %v5320_v60, %v5268_v10 }
0x2835   :  { %5342 = vst [vmem:[#allocation6 + $0x18] sm:$0xff] %v5321_v54 }
0x2838   :  { %v5271_v34 = vpop.f32.mrf.mxu0  ;;  %v5328_v45 = vpop.f32.mrf.mxu1 }
0x2839   :  { %v5272_v3 = vadd.f32 %v5271_v34, %v5205_v63 }
0x283b   :  { %v5325_v26 = vadd.f32 %v5324_v9, %v5272_v3 }
0x283d   :  { %5343 = vst [vmem:[#allocation6 + $0x20] sm:$0xff] %v5325_v26 }
0x2840   :  { %v5275_v25 = vpop.f32.mrf.mxu0  ;;  %v5332_v52 = vpop.f32.mrf.mxu1 }
0x2841   :  { %v5276_v11 = vadd.f32 %v5275_v25, %v5211_v15 }
0x2843   :  { %v5329_v41 = vadd.f32 %v5328_v45, %v5276_v11 }
0x2845   :  { %5344 = vst [vmem:[#allocation6 + $0x28] sm:$0xff] %v5329_v41 }
0x2848   :  { %v5279_v20 = vpop.f32.mrf.mxu0  ;;  %v5336_v7 = vpop.f32.mrf.mxu1 }
0x2849   :  { %v5280_v29 = vadd.f32 %v5279_v20, %v5217_v28 }
0x284b   :  { %v5333_v56 = vadd.f32 %v5332_v52, %v5280_v29 }
0x284d   :  { %5345 = vst [vmem:[#allocation6 + $0x30] sm:$0xff] %v5333_v56 }
0x2850   :  { %v5283_v6 = vpop.f32.mrf.mxu0 }
0x2851   :  { %v5284_v17 = vadd.f32 %v5283_v6, %v5223_v8 }
0x2853   :  { %v5337_v24 = vadd.f32 %v5336_v7, %v5284_v17 }
0x2855   :  { %5346 = vst [vmem:[#allocation6 + $0x38] sm:$0xff] %v5337_v24 }
0x2856   :  { %5361 = dma.vmem_to_hbm [thread:$0]  %s5354_s5, 1024, %s5356_s30, [#allocation5], %s5620_s23, %s5620_s23, %s5621_s24  }
0x2857   :  { %5615 = dma.done.wait [#allocation5], 1024  }
0x2858   :  { %5616 = vsyncadd [#allocation5], 4294966272 }
0x2859   :  { %5617 = dma.done.wait [#allocation8], 256  }
0x285a   :  { %5618 = vsyncadd [#allocation8], 4294967040 }
0x285b   :  { %5396 = vsyncpa [#allocation4], 1 }
0x285c   :  { %5397 = vsyncpa [#allocation5], 1 }
0x285d   :  { %5398 = vsyncpa [#allocation8], 1 }

</bundles_post_ra>
